<compile_context>
chip_gen: v6e
topology: v6e:2x2x1
jax: 0.10.0
libtpu: 0.0.40
codegen_flags: <defaults>
</compile_context>

<pallas_src>
import numpy as np

import jax
import jax.numpy as jnp
from jax.experimental import pallas as pl
from jax.experimental.pallas import tpu as pltpu

TB = 32  # images per grid step (batch tile)


# ---------------------------------------------------------------------------
# Fused forward kernel: conv1 -> relu -> pool -> conv2 -> relu -> pool -> fc
# Row ordering of every activation inside a tile: row = spatial_row * TB + image.
# ---------------------------------------------------------------------------
def _fused_cnn_kernel(x_ref, w1e_ref, w1o_ref, b1_ref, w2_ref, b2_ref,
                      wfc_ref, bfc_ref, o_ref):
    f32 = jnp.float32
    bf16 = jnp.bfloat16

    xc = x_ref[...]                                              # (24*TB, 140) bf16

    # ---- conv1 (single K=140 matmul per parity) with the width-pool folded in:
    #      w1e produces even output columns, w1o the odd ones -> max == 2x W-pool.
    h1e = jnp.dot(xc, w1e_ref[...], preferred_element_type=f32)  # (24*TB, 192)
    h1o = jnp.dot(xc, w1o_ref[...], preferred_element_type=f32)  # (24*TB, 192)
    hw1 = jnp.maximum(jnp.maximum(h1e, h1o) + b1_ref[...], 0.0)  # bias + ReLU (f32)

    # ---- maxpool #1, H direction: rows are (row, image)-ordered, so adjacent row
    #      pairs are adjacent contiguous TB-row blocks.
    p1 = jnp.concatenate(
        [jnp.maximum(hw1[(2 * r) * TB:(2 * r + 1) * TB, :],
                     hw1[(2 * r + 1) * TB:(2 * r + 2) * TB, :])
         for r in range(12)], axis=0).astype(bf16)               # (12*TB, 192) bf16

    # ---- conv2: 5 accumulating ky taps (each tap = contiguous 8*TB-row slice of p1),
    #      output lanes are [even ow' | odd ow'] so the W-pool is max of the halves.
    h2 = None
    for ky in range(5):
        t = jnp.dot(p1[ky * TB:(ky + 8) * TB, :], w2_ref[ky],
                    preferred_element_type=f32)                  # (8*TB, 256)
        h2 = t if h2 is None else h2 + t
    hw2 = jnp.maximum(jnp.maximum(h2[:, :128], h2[:, 128:]) + b2_ref[...], 0.0)

    # ---- maxpool #2, H direction.
    p2 = jnp.concatenate(
        [jnp.maximum(hw2[(2 * r) * TB:(2 * r + 1) * TB, :],
                     hw2[(2 * r + 1) * TB:(2 * r + 2) * TB, :])
         for r in range(4)], axis=0).astype(bf16)                # (4*TB, 128) bf16

    # ---- fc: the 4 pooled rows of each image are the 4 contiguous TB-row blocks of p2;
    #      accumulate 4 (TB,128)x(128,128) matmuls (NCHW flatten folded into wfc).
    acc = None
    for h in range(4):
        t = jnp.dot(p2[h * TB:(h + 1) * TB, :], wfc_ref[h],
                    preferred_element_type=f32)                  # (TB, 128)
        acc = t if acc is None else acc + t
    o_ref[...] = acc + bfc_ref[...]


# ---------------------------------------------------------------------------
# Host-side preparation of banded conv / FC weights (all matmul weights in bf16).
# ---------------------------------------------------------------------------
def prepare_params(params, wdtype=jnp.bfloat16):
    w1 = np.asarray(params["w1"], np.float32)     # (16, 1, 5, 5)   OIHW
    b1 = np.asarray(params["b1"], np.float32)     # (16,)
    w2 = np.asarray(params["w2"], np.float32)     # (32, 16, 5, 5)
    b2 = np.asarray(params["b2"], np.float32)     # (32,)
    fw = np.asarray(params["fc_w"], np.float32)   # (10, 512)
    fb = np.asarray(params["fc_b"], np.float32)   # (10,)

    # conv1 banded weights, K = 5 ky taps * 28 input cols = 140.
    # Even / odd output-column matrices: column group owp holds output col 2*owp (even)
    # resp. 2*owp+1 (odd), channel-minor -> max(even, odd) == width maxpool.
    w1e = np.zeros((140, 12 * 16), np.float32)
    w1o = np.zeros((140, 12 * 16), np.float32)
    for ky in range(5):
        for owp in range(12):
            for kx in range(5):
                w1e[ky * 28 + 2 * owp + kx, owp * 16:(owp + 1) * 16] = w1[:, 0, ky, kx]
                w1o[ky * 28 + 2 * owp + 1 + kx, owp * 16:(owp + 1) * 16] = w1[:, 0, ky, kx]
    b1t = np.tile(b1, 12)[None, :]                # (1, 192)

    # conv2 banded weights per ky tap: (5, 192, 256).
    # Output lanes: [0:128) even output cols (owp*32+co), [128:256) odd output cols.
    w2b = np.zeros((5, 12 * 16, 256), np.float32)
    for ky in range(5):
        for owp in range(4):
            for kx in range(5):
                iwe = 2 * owp + kx          # input col feeding even output col 2*owp
                iwo = 2 * owp + 1 + kx      # input col feeding odd  output col 2*owp+1
                blk = w2[:, :, ky, kx].T    # (ci=16, co=32)
                w2b[ky, iwe * 16:(iwe + 1) * 16, owp * 32:(owp + 1) * 32] = blk
                w2b[ky, iwo * 16:(iwo + 1) * 16, 128 + owp * 32:128 + (owp + 1) * 32] = blk
    b2t = np.tile(b2, 4)[None, :]                 # (1, 128)

    # FC weights: p2 lanes are (w'*32 + c), the 4 pooled rows h come as the 4 matmul
    # taps.  PyTorch flatten of (B, 32, 4, 4) NCHW uses flat index c*16 + h*4 + w.
    # Output channels zero-padded 10 -> 128 for an unmasked lane-dense store.
    wfc = np.zeros((4, 128, 128), np.float32)
    for h in range(4):
        for w in range(4):
            for c in range(32):
                wfc[h, w * 32 + c, :10] = fw[:, c * 16 + h * 4 + w]
    bfc = np.zeros((1, 128), np.float32)
    bfc[0, :10] = fb

    return dict(
        w1e=jnp.asarray(w1e, wdtype), w1o=jnp.asarray(w1o, wdtype),
        b1=jnp.asarray(b1t, jnp.float32),
        w2b=jnp.asarray(w2b, wdtype), b2=jnp.asarray(b2t, jnp.float32),
        wfc=jnp.asarray(wfc, wdtype), bfc=jnp.asarray(bfc, jnp.float32),
    )


# ---------------------------------------------------------------------------
# Forward wrapper.
# ---------------------------------------------------------------------------
def cnn_forward(x_nchw, prep):
    B = x_nchw.shape[0]
    nt = (B + TB - 1) // TB
    Bp = nt * TB

    x = x_nchw.astype(jnp.float32).reshape(B, 28, 28)
    if Bp != B:
        x = jnp.pad(x, ((0, Bp - B), (0, 0), (0, 0)))

    # Layout plumbing (wrapper-side, negligible HBM): lane-concat the 5 row-shifted
    # slabs (conv1 K-fusion, K=140) and reorder rows to (tile, out_row, image) so
    # every in-kernel slice is contiguous and 32-row aligned.
    xcat = jnp.concatenate([x[:, ky:ky + 24, :] for ky in range(5)], axis=-1)   # (Bp,24,140)
    xcat = xcat.reshape(nt, TB, 24, 140).transpose(0, 2, 1, 3)
    xcat = xcat.reshape(nt * 24 * TB, 140).astype(jnp.bfloat16)

    out = pl.pallas_call(
        _fused_cnn_kernel,
        out_shape=jax.ShapeDtypeStruct((Bp, 128), jnp.float32),
        grid=(nt,),
        in_specs=[
            pl.BlockSpec((24 * TB, 140), lambda i: (i, 0)),      # xcat tile
            pl.BlockSpec((140, 192), lambda i: (0, 0)),          # w1 even cols
            pl.BlockSpec((140, 192), lambda i: (0, 0)),          # w1 odd cols
            pl.BlockSpec((1, 192), lambda i: (0, 0)),            # b1
            pl.BlockSpec((5, 192, 256), lambda i: (0, 0, 0)),    # w2 banded taps
            pl.BlockSpec((1, 128), lambda i: (0, 0)),            # b2
            pl.BlockSpec((4, 128, 128), lambda i: (0, 0, 0)),    # fc weights (padded)
            pl.BlockSpec((1, 128), lambda i: (0, 0)),            # fc bias (padded)
        ],
        out_specs=pl.BlockSpec((TB, 128), lambda i: (i, 0)),
        compiler_params=pltpu.CompilerParams(
            dimension_semantics=("parallel",)),
    )(xcat, prep["w1e"], prep["w1o"], prep["b1"], prep["w2b"], prep["b2"],
      prep["wfc"], prep["bfc"])

    return out[:B, :10]


# ---------------------------------------------------------------------------
# Deterministic parameter init (shapes from CNN_Model.__init__).
# ---------------------------------------------------------------------------
def init_params(key):
    ks = jax.random.split(key, 6)

    def u(k, shape, fan_in):
        bound = 1.0 / jnp.sqrt(jnp.float32(fan_in))
        return jax.random.uniform(k, shape, jnp.float32, -bound, bound)

    return {
        "w1": u(ks[0], (16, 1, 5, 5), 1 * 5 * 5),
        "b1": u(ks[1], (16,), 1 * 5 * 5),
        "w2": u(ks[2], (32, 16, 5, 5), 16 * 5 * 5),
        "b2": u(ks[3], (32,), 16 * 5 * 5),
        "fc_w": u(ks[4], (10, 32 * 4 * 4), 32 * 4 * 4),
        "fc_b": u(ks[5], (10,), 32 * 4 * 4),
    }


if __name__ == "__main__":
    key = jax.random.PRNGKey(0)
    pkey, xkey = jax.random.split(key)
    params = init_params(pkey)
    prep = prepare_params(params)

    # MNIST-shaped input (28x28 is required so the FC sees 32*4*4 = 512 features)
    x = jax.random.normal(xkey, (2, 1, 28, 28), jnp.float32)

    fwd = jax.jit(cnn_forward)
    out = jax.block_until_ready(fwd(x, prep))
    assert out.shape == (2, 10) and out.dtype == jnp.float32
    print("KERNEL_OK")
</pallas_src>

<mosaic_0001>
module attributes {stable_mosaic.version = 11 : i64} {
  func.func @_fused_cnn_kernel(%arg0: i32, %arg1: memref<768x140xbf16, #tpu.memory_space<vmem>>, %arg2: memref<140x192xbf16, #tpu.memory_space<vmem>>, %arg3: memref<140x192xbf16, #tpu.memory_space<vmem>>, %arg4: memref<1x192xf32, #tpu.memory_space<vmem>>, %arg5: memref<5x192x256xbf16, #tpu.memory_space<vmem>>, %arg6: memref<1x128xf32, #tpu.memory_space<vmem>>, %arg7: memref<4x128x128xbf16, #tpu.memory_space<vmem>>, %arg8: memref<1x128xf32, #tpu.memory_space<vmem>>, %arg9: memref<32x128xf32, #tpu.memory_space<vmem>>) attributes {dimension_semantics = [#tpu.dimension_semantics<parallel>], iteration_bounds = array<i64: 1>, scalar_prefetch = 0 : i64, scratch_operands = 0 : i64, tpu.core_type = #tpu.core_type<tc>, window_params = [{transform_indices = @transform_0, window_bounds = array<i64: 768, 140>}, {pipeline_mode = #tpu.pipeline_mode<synchronous>, transform_indices = @transform_1, window_bounds = array<i64: 140, 192>}, {pipeline_mode = #tpu.pipeline_mode<synchronous>, transform_indices = @transform_2, window_bounds = array<i64: 140, 192>}, {pipeline_mode = #tpu.pipeline_mode<synchronous>, transform_indices = @transform_3, window_bounds = array<i64: 1, 192>}, {pipeline_mode = #tpu.pipeline_mode<synchronous>, transform_indices = @transform_4, window_bounds = array<i64: 5, 192, 256>}, {pipeline_mode = #tpu.pipeline_mode<synchronous>, transform_indices = @transform_5, window_bounds = array<i64: 1, 128>}, {pipeline_mode = #tpu.pipeline_mode<synchronous>, transform_indices = @transform_6, window_bounds = array<i64: 4, 128, 128>}, {pipeline_mode = #tpu.pipeline_mode<synchronous>, transform_indices = @transform_7, window_bounds = array<i64: 1, 128>}, {transform_indices = @transform_8, window_bounds = array<i64: 32, 128>}]} {
    %c0 = arith.constant 0 : index
    %c0_0 = arith.constant 0 : index
    %0 = vector.load %arg1[%c0, %c0_0] : memref<768x140xbf16, #tpu.memory_space<vmem>>, vector<768x140xbf16>
    %c0_1 = arith.constant 0 : index
    %c0_2 = arith.constant 0 : index
    %1 = vector.load %arg2[%c0_1, %c0_2] : memref<140x192xbf16, #tpu.memory_space<vmem>>, vector<140x192xbf16>
    %cst = arith.constant dense<0.000000e+00> : vector<768x192xf32>
    %2 = tpu.matmul %0, %1, %cst {dimension_numbers = #tpu.dot_dimension_numbers<[1], [0], [0], [1], [0, 0, 1, 1], [], []>} : vector<768x140xbf16>, vector<140x192xbf16>, vector<768x192xf32> -> vector<768x192xf32>
    %c0_3 = arith.constant 0 : index
    %c0_4 = arith.constant 0 : index
    %3 = vector.load %arg3[%c0_3, %c0_4] : memref<140x192xbf16, #tpu.memory_space<vmem>>, vector<140x192xbf16>
    %cst_5 = arith.constant dense<0.000000e+00> : vector<768x192xf32>
    %4 = tpu.matmul %0, %3, %cst_5 {dimension_numbers = #tpu.dot_dimension_numbers<[1], [0], [0], [1], [0, 0, 1, 1], [], []>} : vector<768x140xbf16>, vector<140x192xbf16>, vector<768x192xf32> -> vector<768x192xf32>
    %5 = arith.maximumf %2, %4 : vector<768x192xf32>
    %c0_6 = arith.constant 0 : index
    %c0_7 = arith.constant 0 : index
    %6 = vector.load %arg4[%c0_6, %c0_7] : memref<1x192xf32, #tpu.memory_space<vmem>>, vector<1x192xf32>
    %7 = vector.broadcast %6 : vector<1x192xf32> to vector<768x192xf32>
    %8 = arith.addf %5, %7 : vector<768x192xf32>
    %cst_8 = arith.constant 0.000000e+00 : f32
    %9 = vector.broadcast %cst_8 : f32 to vector<768x192xf32>
    %10 = arith.maximumf %8, %9 : vector<768x192xf32>
    %11 = vector.extract_strided_slice %10 {offsets = [0, 0], sizes = [32, 192], strides = [1, 1]} : vector<768x192xf32> to vector<32x192xf32>
    %12 = vector.extract_strided_slice %10 {offsets = [32, 0], sizes = [32, 192], strides = [1, 1]} : vector<768x192xf32> to vector<32x192xf32>
    %13 = arith.maximumf %11, %12 : vector<32x192xf32>
    %14 = vector.extract_strided_slice %10 {offsets = [64, 0], sizes = [32, 192], strides = [1, 1]} : vector<768x192xf32> to vector<32x192xf32>
    %15 = vector.extract_strided_slice %10 {offsets = [96, 0], sizes = [32, 192], strides = [1, 1]} : vector<768x192xf32> to vector<32x192xf32>
    %16 = arith.maximumf %14, %15 : vector<32x192xf32>
    %17 = vector.extract_strided_slice %10 {offsets = [128, 0], sizes = [32, 192], strides = [1, 1]} : vector<768x192xf32> to vector<32x192xf32>
    %18 = vector.extract_strided_slice %10 {offsets = [160, 0], sizes = [32, 192], strides = [1, 1]} : vector<768x192xf32> to vector<32x192xf32>
    %19 = arith.maximumf %17, %18 : vector<32x192xf32>
    %20 = vector.extract_strided_slice %10 {offsets = [192, 0], sizes = [32, 192], strides = [1, 1]} : vector<768x192xf32> to vector<32x192xf32>
    %21 = vector.extract_strided_slice %10 {offsets = [224, 0], sizes = [32, 192], strides = [1, 1]} : vector<768x192xf32> to vector<32x192xf32>
    %22 = arith.maximumf %20, %21 : vector<32x192xf32>
    %23 = vector.extract_strided_slice %10 {offsets = [256, 0], sizes = [32, 192], strides = [1, 1]} : vector<768x192xf32> to vector<32x192xf32>
    %24 = vector.extract_strided_slice %10 {offsets = [288, 0], sizes = [32, 192], strides = [1, 1]} : vector<768x192xf32> to vector<32x192xf32>
    %25 = arith.maximumf %23, %24 : vector<32x192xf32>
    %26 = vector.extract_strided_slice %10 {offsets = [320, 0], sizes = [32, 192], strides = [1, 1]} : vector<768x192xf32> to vector<32x192xf32>
    %27 = vector.extract_strided_slice %10 {offsets = [352, 0], sizes = [32, 192], strides = [1, 1]} : vector<768x192xf32> to vector<32x192xf32>
    %28 = arith.maximumf %26, %27 : vector<32x192xf32>
    %29 = vector.extract_strided_slice %10 {offsets = [384, 0], sizes = [32, 192], strides = [1, 1]} : vector<768x192xf32> to vector<32x192xf32>
    %30 = vector.extract_strided_slice %10 {offsets = [416, 0], sizes = [32, 192], strides = [1, 1]} : vector<768x192xf32> to vector<32x192xf32>
    %31 = arith.maximumf %29, %30 : vector<32x192xf32>
    %32 = vector.extract_strided_slice %10 {offsets = [448, 0], sizes = [32, 192], strides = [1, 1]} : vector<768x192xf32> to vector<32x192xf32>
    %33 = vector.extract_strided_slice %10 {offsets = [480, 0], sizes = [32, 192], strides = [1, 1]} : vector<768x192xf32> to vector<32x192xf32>
    %34 = arith.maximumf %32, %33 : vector<32x192xf32>
    %35 = vector.extract_strided_slice %10 {offsets = [512, 0], sizes = [32, 192], strides = [1, 1]} : vector<768x192xf32> to vector<32x192xf32>
    %36 = vector.extract_strided_slice %10 {offsets = [544, 0], sizes = [32, 192], strides = [1, 1]} : vector<768x192xf32> to vector<32x192xf32>
    %37 = arith.maximumf %35, %36 : vector<32x192xf32>
    %38 = vector.extract_strided_slice %10 {offsets = [576, 0], sizes = [32, 192], strides = [1, 1]} : vector<768x192xf32> to vector<32x192xf32>
    %39 = vector.extract_strided_slice %10 {offsets = [608, 0], sizes = [32, 192], strides = [1, 1]} : vector<768x192xf32> to vector<32x192xf32>
    %40 = arith.maximumf %38, %39 : vector<32x192xf32>
    %41 = vector.extract_strided_slice %10 {offsets = [640, 0], sizes = [32, 192], strides = [1, 1]} : vector<768x192xf32> to vector<32x192xf32>
    %42 = vector.extract_strided_slice %10 {offsets = [672, 0], sizes = [32, 192], strides = [1, 1]} : vector<768x192xf32> to vector<32x192xf32>
    %43 = arith.maximumf %41, %42 : vector<32x192xf32>
    %44 = vector.extract_strided_slice %10 {offsets = [704, 0], sizes = [32, 192], strides = [1, 1]} : vector<768x192xf32> to vector<32x192xf32>
    %45 = vector.extract_strided_slice %10 {offsets = [736, 0], sizes = [32, 192], strides = [1, 1]} : vector<768x192xf32> to vector<32x192xf32>
    %46 = arith.maximumf %44, %45 : vector<32x192xf32>
    %47 = tpu.concatenate %13, %16, %19, %22, %25, %28, %31, %34, %37, %40, %43, %46 in 0 : vector<32x192xf32>, vector<32x192xf32>, vector<32x192xf32>, vector<32x192xf32>, vector<32x192xf32>, vector<32x192xf32>, vector<32x192xf32>, vector<32x192xf32>, vector<32x192xf32>, vector<32x192xf32>, vector<32x192xf32>, vector<32x192xf32> -> vector<384x192xf32>
    %48 = arith.truncf %47 : vector<384x192xf32> to vector<384x192xbf16>
    %49 = vector.extract_strided_slice %48 {offsets = [0, 0], sizes = [256, 192], strides = [1, 1]} : vector<384x192xbf16> to vector<256x192xbf16>
    %c0_9 = arith.constant 0 : index
    %c0_10 = arith.constant 0 : index
    %c0_11 = arith.constant 0 : index
    %50 = vector.load %arg5[%c0_9, %c0_10, %c0_11] : memref<5x192x256xbf16, #tpu.memory_space<vmem>>, vector<1x192x256xbf16>
    %51 = vector.shape_cast %50 : vector<1x192x256xbf16> to vector<192x256xbf16>
    %cst_12 = arith.constant dense<0.000000e+00> : vector<256x256xf32>
    %52 = tpu.matmul %49, %51, %cst_12 {dimension_numbers = #tpu.dot_dimension_numbers<[1], [0], [0], [1], [0, 0, 1, 1], [], []>} : vector<256x192xbf16>, vector<192x256xbf16>, vector<256x256xf32> -> vector<256x256xf32>
    %53 = vector.extract_strided_slice %48 {offsets = [32, 0], sizes = [256, 192], strides = [1, 1]} : vector<384x192xbf16> to vector<256x192xbf16>
    %c1 = arith.constant 1 : index
    %c0_13 = arith.constant 0 : index
    %c0_14 = arith.constant 0 : index
    %54 = vector.load %arg5[%c1, %c0_13, %c0_14] : memref<5x192x256xbf16, #tpu.memory_space<vmem>>, vector<1x192x256xbf16>
    %55 = vector.shape_cast %54 : vector<1x192x256xbf16> to vector<192x256xbf16>
    %cst_15 = arith.constant dense<0.000000e+00> : vector<256x256xf32>
    %56 = tpu.matmul %53, %55, %cst_15 {dimension_numbers = #tpu.dot_dimension_numbers<[1], [0], [0], [1], [0, 0, 1, 1], [], []>} : vector<256x192xbf16>, vector<192x256xbf16>, vector<256x256xf32> -> vector<256x256xf32>
    %57 = arith.addf %52, %56 : vector<256x256xf32>
    %58 = vector.extract_strided_slice %48 {offsets = [64, 0], sizes = [256, 192], strides = [1, 1]} : vector<384x192xbf16> to vector<256x192xbf16>
    %c2 = arith.constant 2 : index
    %c0_16 = arith.constant 0 : index
    %c0_17 = arith.constant 0 : index
    %59 = vector.load %arg5[%c2, %c0_16, %c0_17] : memref<5x192x256xbf16, #tpu.memory_space<vmem>>, vector<1x192x256xbf16>
    %60 = vector.shape_cast %59 : vector<1x192x256xbf16> to vector<192x256xbf16>
    %cst_18 = arith.constant dense<0.000000e+00> : vector<256x256xf32>
    %61 = tpu.matmul %58, %60, %cst_18 {dimension_numbers = #tpu.dot_dimension_numbers<[1], [0], [0], [1], [0, 0, 1, 1], [], []>} : vector<256x192xbf16>, vector<192x256xbf16>, vector<256x256xf32> -> vector<256x256xf32>
    %62 = arith.addf %57, %61 : vector<256x256xf32>
    %63 = vector.extract_strided_slice %48 {offsets = [96, 0], sizes = [256, 192], strides = [1, 1]} : vector<384x192xbf16> to vector<256x192xbf16>
    %c3 = arith.constant 3 : index
    %c0_19 = arith.constant 0 : index
    %c0_20 = arith.constant 0 : index
    %64 = vector.load %arg5[%c3, %c0_19, %c0_20] : memref<5x192x256xbf16, #tpu.memory_space<vmem>>, vector<1x192x256xbf16>
    %65 = vector.shape_cast %64 : vector<1x192x256xbf16> to vector<192x256xbf16>
    %cst_21 = arith.constant dense<0.000000e+00> : vector<256x256xf32>
    %66 = tpu.matmul %63, %65, %cst_21 {dimension_numbers = #tpu.dot_dimension_numbers<[1], [0], [0], [1], [0, 0, 1, 1], [], []>} : vector<256x192xbf16>, vector<192x256xbf16>, vector<256x256xf32> -> vector<256x256xf32>
    %67 = arith.addf %62, %66 : vector<256x256xf32>
    %68 = vector.extract_strided_slice %48 {offsets = [128, 0], sizes = [256, 192], strides = [1, 1]} : vector<384x192xbf16> to vector<256x192xbf16>
    %c4 = arith.constant 4 : index
    %c0_22 = arith.constant 0 : index
    %c0_23 = arith.constant 0 : index
    %69 = vector.load %arg5[%c4, %c0_22, %c0_23] : memref<5x192x256xbf16, #tpu.memory_space<vmem>>, vector<1x192x256xbf16>
    %70 = vector.shape_cast %69 : vector<1x192x256xbf16> to vector<192x256xbf16>
    %cst_24 = arith.constant dense<0.000000e+00> : vector<256x256xf32>
    %71 = tpu.matmul %68, %70, %cst_24 {dimension_numbers = #tpu.dot_dimension_numbers<[1], [0], [0], [1], [0, 0, 1, 1], [], []>} : vector<256x192xbf16>, vector<192x256xbf16>, vector<256x256xf32> -> vector<256x256xf32>
    %72 = arith.addf %67, %71 : vector<256x256xf32>
    %73 = vector.extract_strided_slice %72 {offsets = [0, 0], sizes = [256, 128], strides = [1, 1]} : vector<256x256xf32> to vector<256x128xf32>
    %74 = vector.extract_strided_slice %72 {offsets = [0, 128], sizes = [256, 128], strides = [1, 1]} : vector<256x256xf32> to vector<256x128xf32>
    %75 = arith.maximumf %73, %74 : vector<256x128xf32>
    %c0_25 = arith.constant 0 : index
    %c0_26 = arith.constant 0 : index
    %76 = vector.load %arg6[%c0_25, %c0_26] : memref<1x128xf32, #tpu.memory_space<vmem>>, vector<1x128xf32>
    %77 = vector.broadcast %76 : vector<1x128xf32> to vector<256x128xf32>
    %78 = arith.addf %75, %77 : vector<256x128xf32>
    %cst_27 = arith.constant 0.000000e+00 : f32
    %79 = vector.broadcast %cst_27 : f32 to vector<256x128xf32>
    %80 = arith.maximumf %78, %79 : vector<256x128xf32>
    %81 = vector.extract_strided_slice %80 {offsets = [0, 0], sizes = [32, 128], strides = [1, 1]} : vector<256x128xf32> to vector<32x128xf32>
    %82 = vector.extract_strided_slice %80 {offsets = [32, 0], sizes = [32, 128], strides = [1, 1]} : vector<256x128xf32> to vector<32x128xf32>
    %83 = arith.maximumf %81, %82 : vector<32x128xf32>
    %84 = vector.extract_strided_slice %80 {offsets = [64, 0], sizes = [32, 128], strides = [1, 1]} : vector<256x128xf32> to vector<32x128xf32>
    %85 = vector.extract_strided_slice %80 {offsets = [96, 0], sizes = [32, 128], strides = [1, 1]} : vector<256x128xf32> to vector<32x128xf32>
    %86 = arith.maximumf %84, %85 : vector<32x128xf32>
    %87 = vector.extract_strided_slice %80 {offsets = [128, 0], sizes = [32, 128], strides = [1, 1]} : vector<256x128xf32> to vector<32x128xf32>
    %88 = vector.extract_strided_slice %80 {offsets = [160, 0], sizes = [32, 128], strides = [1, 1]} : vector<256x128xf32> to vector<32x128xf32>
    %89 = arith.maximumf %87, %88 : vector<32x128xf32>
    %90 = vector.extract_strided_slice %80 {offsets = [192, 0], sizes = [32, 128], strides = [1, 1]} : vector<256x128xf32> to vector<32x128xf32>
    %91 = vector.extract_strided_slice %80 {offsets = [224, 0], sizes = [32, 128], strides = [1, 1]} : vector<256x128xf32> to vector<32x128xf32>
    %92 = arith.maximumf %90, %91 : vector<32x128xf32>
    %93 = tpu.concatenate %83, %86, %89, %92 in 0 : vector<32x128xf32>, vector<32x128xf32>, vector<32x128xf32>, vector<32x128xf32> -> vector<128x128xf32>
    %94 = arith.truncf %93 : vector<128x128xf32> to vector<128x128xbf16>
    %95 = vector.extract_strided_slice %94 {offsets = [0, 0], sizes = [32, 128], strides = [1, 1]} : vector<128x128xbf16> to vector<32x128xbf16>
    %c0_28 = arith.constant 0 : index
    %c0_29 = arith.constant 0 : index
    %c0_30 = arith.constant 0 : index
    %96 = vector.load %arg7[%c0_28, %c0_29, %c0_30] : memref<4x128x128xbf16, #tpu.memory_space<vmem>>, vector<1x128x128xbf16>
    %97 = vector.shape_cast %96 : vector<1x128x128xbf16> to vector<128x128xbf16>
    %cst_31 = arith.constant dense<0.000000e+00> : vector<32x128xf32>
    %98 = tpu.matmul %95, %97, %cst_31 {dimension_numbers = #tpu.dot_dimension_numbers<[1], [0], [0], [1], [0, 0, 1, 1], [], []>} : vector<32x128xbf16>, vector<128x128xbf16>, vector<32x128xf32> -> vector<32x128xf32>
    %99 = vector.extract_strided_slice %94 {offsets = [32, 0], sizes = [32, 128], strides = [1, 1]} : vector<128x128xbf16> to vector<32x128xbf16>
    %c1_32 = arith.constant 1 : index
    %c0_33 = arith.constant 0 : index
    %c0_34 = arith.constant 0 : index
    %100 = vector.load %arg7[%c1_32, %c0_33, %c0_34] : memref<4x128x128xbf16, #tpu.memory_space<vmem>>, vector<1x128x128xbf16>
    %101 = vector.shape_cast %100 : vector<1x128x128xbf16> to vector<128x128xbf16>
    %cst_35 = arith.constant dense<0.000000e+00> : vector<32x128xf32>
    %102 = tpu.matmul %99, %101, %cst_35 {dimension_numbers = #tpu.dot_dimension_numbers<[1], [0], [0], [1], [0, 0, 1, 1], [], []>} : vector<32x128xbf16>, vector<128x128xbf16>, vector<32x128xf32> -> vector<32x128xf32>
    %103 = arith.addf %98, %102 : vector<32x128xf32>
    %104 = vector.extract_strided_slice %94 {offsets = [64, 0], sizes = [32, 128], strides = [1, 1]} : vector<128x128xbf16> to vector<32x128xbf16>
    %c2_36 = arith.constant 2 : index
    %c0_37 = arith.constant 0 : index
    %c0_38 = arith.constant 0 : index
    %105 = vector.load %arg7[%c2_36, %c0_37, %c0_38] : memref<4x128x128xbf16, #tpu.memory_space<vmem>>, vector<1x128x128xbf16>
    %106 = vector.shape_cast %105 : vector<1x128x128xbf16> to vector<128x128xbf16>
    %cst_39 = arith.constant dense<0.000000e+00> : vector<32x128xf32>
    %107 = tpu.matmul %104, %106, %cst_39 {dimension_numbers = #tpu.dot_dimension_numbers<[1], [0], [0], [1], [0, 0, 1, 1], [], []>} : vector<32x128xbf16>, vector<128x128xbf16>, vector<32x128xf32> -> vector<32x128xf32>
    %108 = arith.addf %103, %107 : vector<32x128xf32>
    %109 = vector.extract_strided_slice %94 {offsets = [96, 0], sizes = [32, 128], strides = [1, 1]} : vector<128x128xbf16> to vector<32x128xbf16>
    %c3_40 = arith.constant 3 : index
    %c0_41 = arith.constant 0 : index
    %c0_42 = arith.constant 0 : index
    %110 = vector.load %arg7[%c3_40, %c0_41, %c0_42] : memref<4x128x128xbf16, #tpu.memory_space<vmem>>, vector<1x128x128xbf16>
    %111 = vector.shape_cast %110 : vector<1x128x128xbf16> to vector<128x128xbf16>
    %cst_43 = arith.constant dense<0.000000e+00> : vector<32x128xf32>
    %112 = tpu.matmul %109, %111, %cst_43 {dimension_numbers = #tpu.dot_dimension_numbers<[1], [0], [0], [1], [0, 0, 1, 1], [], []>} : vector<32x128xbf16>, vector<128x128xbf16>, vector<32x128xf32> -> vector<32x128xf32>
    %113 = arith.addf %108, %112 : vector<32x128xf32>
    %c0_44 = arith.constant 0 : index
    %c0_45 = arith.constant 0 : index
    %114 = vector.load %arg8[%c0_44, %c0_45] : memref<1x128xf32, #tpu.memory_space<vmem>>, vector<1x128xf32>
    %115 = vector.broadcast %114 : vector<1x128xf32> to vector<32x128xf32>
    %116 = arith.addf %113, %115 : vector<32x128xf32>
    %c0_46 = arith.constant 0 : index
    %c0_47 = arith.constant 0 : index
    %117 = vector.load %arg9[%c0_46, %c0_47] : memref<32x128xf32, #tpu.memory_space<vmem>>, vector<32x128xf32>
    tpu.vector_store %arg9[%c0_46, %c0_47], %116 {strides = array<i32>} : memref<32x128xf32, #tpu.memory_space<vmem>>, vector<32x128xf32>,
    return
  }
  func.func @transform_0(%arg0: i32) -> (i32, i32) {
    %c0_i32 = arith.constant 0 : i32
    %c0_i32_0 = arith.constant 0 : i32
    return %arg0, %c0_i32 : i32, i32
  }
  func.func @transform_1(%arg0: i32) -> (i32, i32) {
    %c0_i32 = arith.constant 0 : i32
    %c0_i32_0 = arith.constant 0 : i32
    %c0_i32_1 = arith.constant 0 : i32
    return %c0_i32, %c0_i32_0 : i32, i32
  }
  func.func @transform_2(%arg0: i32) -> (i32, i32) {
    %c0_i32 = arith.constant 0 : i32
    %c0_i32_0 = arith.constant 0 : i32
    %c0_i32_1 = arith.constant 0 : i32
    return %c0_i32, %c0_i32_0 : i32, i32
  }
  func.func @transform_3(%arg0: i32) -> (i32, i32) {
    %c0_i32 = arith.constant 0 : i32
    %c0_i32_0 = arith.constant 0 : i32
    %c0_i32_1 = arith.constant 0 : i32
    return %c0_i32, %c0_i32_0 : i32, i32
  }
  func.func @transform_4(%arg0: i32) -> (i32, i32, i32) {
    %c0_i32 = arith.constant 0 : i32
    %c0_i32_0 = arith.constant 0 : i32
    %c0_i32_1 = arith.constant 0 : i32
    %c0_i32_2 = arith.constant 0 : i32
    return %c0_i32, %c0_i32_0, %c0_i32_1 : i32, i32, i32
  }
  func.func @transform_5(%arg0: i32) -> (i32, i32) {
    %c0_i32 = arith.constant 0 : i32
    %c0_i32_0 = arith.constant 0 : i32
    %c0_i32_1 = arith.constant 0 : i32
    return %c0_i32, %c0_i32_0 : i32, i32
  }
  func.func @transform_6(%arg0: i32) -> (i32, i32, i32) {
    %c0_i32 = arith.constant 0 : i32
    %c0_i32_0 = arith.constant 0 : i32
    %c0_i32_1 = arith.constant 0 : i32
    %c0_i32_2 = arith.constant 0 : i32
    return %c0_i32, %c0_i32_0, %c0_i32_1 : i32, i32, i32
  }
  func.func @transform_7(%arg0: i32) -> (i32, i32) {
    %c0_i32 = arith.constant 0 : i32
    %c0_i32_0 = arith.constant 0 : i32
    %c0_i32_1 = arith.constant 0 : i32
    return %c0_i32, %c0_i32_0 : i32, i32
  }
  func.func @transform_8(%arg0: i32) -> (i32, i32) {
    %c0_i32 = arith.constant 0 : i32
    %c0_i32_0 = arith.constant 0 : i32
    return %arg0, %c0_i32 : i32, i32
  }
}

</mosaic_0001>

<bundles_post_ra>
// kernel: cnn_forward.1
= control target key start
LH: loop header
LB: loop body
LE: loop exit
PB: predicated region body
PF: predicated region fallthrough
CT: control target
= control target key end

     0   :  { %vm664_vm0 = vcmask 97280   ;;  %vm809_vm1 = vcmask 1045504   ;;  %vm2855_vm2 = vcmask 523264   ;;  %s9048_s1 = inlined_call_operand.vmem [shape: bf16[140,192], index: 1, kind: input, shape index: {}]   ;;  %s9049_s2 = inlined_call_operand.vmem [shape: bf16[140,192], index: 2, kind: input, shape index: {}]   ;;  %s9050_s0 = inlined_call_operand.vmem [shape: bf16[768,140], index: 0, kind: input, shape index: {}]   ;;  %s9051_s4 = inlined_call_operand.vmem [shape: bf16[5,192,256], index: 4, kind: input, shape index: {}]   ;;  %s9052_s3 = inlined_call_operand.vmem [shape: f32[1,192], index: 3, kind: input, shape index: {}]   ;;  %s9053_s6 = inlined_call_operand.vmem [shape: bf16[4,128,128], index: 6, kind: input, shape index: {}]   ;;  %s9054_s5 = inlined_call_operand.vmem [shape: f32[1,128], index: 5, kind: input, shape index: {}]   ;;  %s9055_s7 = inlined_call_operand.vmem [shape: f32[1,128], index: 7, kind: input, shape index: {}]   ;;  %s9056_s8 = inlined_call_operand.vmem [shape: f32[32,128], index: 8, kind: output, shape index: {}]  }
   0x1   :  { %v5977_v0 = vld [vmem:[%s9048_s1 + $0x74] ss:$8 sps:$4 sm:$0xff]   ;;  %v5981_v2 = vld [vmem:[%s9048_s1 + $0x70] ss:$8 sps:$4 sm:$0xff]   ;;  %v5983_v4 = vld [vmem:[%s9048_s1 + $0x64] ss:$8 sps:$4 sm:$0xff]  }
   0x2   :  { %v5979_v1 = vld [vmem:[%s9049_s2 + $0x74] ss:$8 sps:$4 sm:$0xff]   ;;  %816 = vmatprep.subr.bf16.mxu0 %v5977_v0  ;;  %v5982_v3 = vld [vmem:[%s9049_s2 + $0x70] ss:$8 sps:$4 sm:$0xff]   ;;  %v5985_v5 = vld [vmem:[%s9049_s2 + $0x64] ss:$8 sps:$4 sm:$0xff]  }
   0x3   :  { %1441 = vmatprep.subr.bf16.mxu1 %v5979_v1  ;;  %817 = vmatpush1.bf16.msra.mxu0 %v5981_v2  ;;  %v5987_v6 = vld [vmem:[%s9048_s1 + $0x60] ss:$8 sps:$4 sm:$0xff]   ;;  %v5989_v8 = vld [vmem:[%s9048_s1 + $0x54] ss:$8 sps:$4 sm:$0xff]   ;;  %v5993_v10 = vld [vmem:[%s9048_s1 + $0x50] ss:$8 sps:$4 sm:$0xff]  }
   0x4   :  { %1442 = vmatpush1.bf16.msra.mxu1 %v5982_v3  ;;  %818 = vmatprep.subr.bf16.mxu0 %v5983_v4  ;;  %v5988_v7 = vld [vmem:[%s9049_s2 + $0x60] ss:$8 sps:$4 sm:$0xff]   ;;  %v5991_v9 = vld [vmem:[%s9049_s2 + $0x54] ss:$8 sps:$4 sm:$0xff]   ;;  %v5994_v11 = vld [vmem:[%s9049_s2 + $0x50] ss:$8 sps:$4 sm:$0xff]  }
   0x5   :  { %1443 = vmatprep.subr.bf16.mxu1 %v5985_v5  ;;  %v5995_v12 = vld [vmem:[%s9048_s1 + $0x44] ss:$8 sps:$4 sm:$0xff]   ;;  %v5999_v14 = vld [vmem:[%s9048_s1 + $0x40] ss:$8 sps:$4 sm:$0xff]   ;;  %v6001_v16 = vld [vmem:[%s9048_s1 + $0x34] ss:$8 sps:$4 sm:$0xff]  }
   0x6   :  { %v5997_v13 = vld [vmem:[%s9049_s2 + $0x44] ss:$8 sps:$4 sm:$0xff]   ;;  %v6000_v15 = vld [vmem:[%s9049_s2 + $0x40] ss:$8 sps:$4 sm:$0xff]   ;;  %v6003_v17 = vld [vmem:[%s9049_s2 + $0x34] ss:$8 sps:$4 sm:$0xff]  }
   0x7   :  { %819 = vmatpush1.bf16.msra.mxu0 %v5987_v6  ;;  %v6005_v18 = vld [vmem:[%s9048_s1 + $0x30] ss:$8 sps:$4 sm:$0xff]   ;;  %v6007_v20 = vld [vmem:[%s9048_s1 + $0x24] ss:$8 sps:$4 sm:$0xff]   ;;  %v6011_v22 = vld [vmem:[%s9048_s1 + $0x20] ss:$8 sps:$4 sm:$0xff]  }
   0x8   :  { %1444 = vmatpush1.bf16.msra.mxu1 %v5988_v7  ;;  %820 = vmatprep.subr.bf16.mxu0 %v5989_v8  ;;  %v6006_v19 = vld [vmem:[%s9049_s2 + $0x30] ss:$8 sps:$4 sm:$0xff]   ;;  %v6009_v21 = vld [vmem:[%s9049_s2 + $0x24] ss:$8 sps:$4 sm:$0xff]   ;;  %v6012_v23 = vld [vmem:[%s9049_s2 + $0x20] ss:$8 sps:$4 sm:$0xff]  }
   0x9   :  { %1445 = vmatprep.subr.bf16.mxu1 %v5991_v9  ;;  %v6013_v24 = vld [vmem:[%s9048_s1 + $0x14] ss:$8 sps:$4 sm:$0xff]   ;;  %v6017_v26 = vld [vmem:[%s9048_s1 + $0x10] ss:$8 sps:$4 sm:$0xff]   ;;  %v6019_v28 = vld [vmem:[%s9048_s1 + $0x4] ss:$8 sps:$4 sm:$0xff]  }
   0xa   :  { %v6015_v25 = vld [vmem:[%s9049_s2 + $0x14] ss:$8 sps:$4 sm:$0xff]   ;;  %v6018_v27 = vld [vmem:[%s9049_s2 + $0x10] ss:$8 sps:$4 sm:$0xff]   ;;  %v6021_v29 = vld [vmem:[%s9049_s2 + $0x4] ss:$8 sps:$4 sm:$0xff]  }
   0xb   :  { %821 = vmatpush1.bf16.msra.mxu0 %v5993_v10  ;;  %v6033_v30 = vld [vmem:[%s9050_s0 + $0x4] ss:$8 sps:$4 sm:$0xff]   ;;  %v6023_v31 = vld [vmem:[%s9048_s1] ss:$8 sps:$4 sm:$0xff]   ;;  %v6036_v39 = vld [vmem:[%s9051_s4 + $0x134] ss:$8 sps:$4 sm:$0xff]  }
   0xc   :  { %1446 = vmatpush1.bf16.msra.mxu1 %v5994_v11  ;;  %822 = vmatprep.subr.bf16.mxu0 %v5995_v12  ;;  %v6024_v32 = vld [vmem:[%s9049_s2] ss:$8 sps:$4 sm:$0xff]   ;;  %v6025_v33 = vld [vmem:[%s9048_s1 + $0x84] ss:$8 sps:$4 sm:$0x3f]  }
   0xd   :  { %1447 = vmatprep.subr.bf16.mxu1 %v5997_v13  ;;  %v6027_v34 = vld [vmem:[%s9049_s2 + $0x84] ss:$8 sps:$4 sm:$0x3f]   ;;  %5364 = vmatprep.mubr.msk.bf16.mxu0 %vm664_vm0, %v6033_v30  ;;  %v6029_v35 = vld [vmem:[%s9048_s1 + $0x80] ss:$8 sps:$4 sm:$0x3f]  }
   0xe   :  { %5431 = vmatprep.mubr.msk.bf16.mxu1 %vm664_vm0, %v6033_v30  ;;  %v6030_v36 = vld [vmem:[%s9049_s2 + $0x80] ss:$8 sps:$4 sm:$0x3f]   ;;  %v811_v37 = vsel %vm809_vm1, %v6029_v35, 0  ;;  %v6034_v41 = vld [vmem:[%s9051_s4 + $0x130] ss:$8 sps:$4 sm:$0xff]  }
   0xf   :  { %823 = vmatpush1.bf16.msra.mxu0 %v5999_v14  ;;  %v1436_v38 = vsel %vm809_vm1, %v6030_v36, 0  ;;  %v6031_v40 = vld [vmem:[%s9050_s0] ss:$8 sps:$4 sm:$0xff]   ;;  %v6037_v42 = vld [vmem:[%s9050_s0 + $0x14] ss:$8 sps:$4 sm:$0xff]  }
  0x10   :  { %1448 = vmatpush1.bf16.msra.mxu1 %v6000_v15  ;;  %824 = vmatprep.subr.bf16.mxu0 %v6001_v16  ;;  %v6051_v43 = vld [vmem:[%s9051_s4 + $0x124] ss:$8 sps:$4 sm:$0xff]   ;;  %v6049_v44 = vld [vmem:[%s9051_s4 + $0x120] ss:$8 sps:$4 sm:$0xff]   ;;  %v6066_v45 = vld [vmem:[%s9051_s4 + $0x114] ss:$8 sps:$4 sm:$0xff]  }
  0x11   :  { %1449 = vmatprep.subr.bf16.mxu1 %v6003_v17  ;;  %v6039_v46 = vld [vmem:[%s9050_s0 + $0x10] ss:$8 sps:$4 sm:$0xff]   ;;  %v6040_v47 = vld [vmem:[%s9050_s0 + $0x24] ss:$8 sps:$4 sm:$0xff]   ;;  %v6079_v50 = vld [vmem:[%s9051_s4 + $0x100] ss:$8 sps:$4 sm:$0xff]  }
  0x12   :  { %v6064_v48 = vld [vmem:[%s9051_s4 + $0x110] ss:$8 sps:$4 sm:$0xff]   ;;  %v6081_v49 = vld [vmem:[%s9051_s4 + $0x104] ss:$8 sps:$4 sm:$0xff]   ;;  %v6042_v51 = vld [vmem:[%s9050_s0 + $0x20] ss:$8 sps:$4 sm:$0xff]  }
  0x13   :  { %825 = vmatpush1.bf16.msra.mxu0 %v6005_v18  ;;  %v6043_v52 = vld [vmem:[%s9050_s0 + $0x34] ss:$8 sps:$4 sm:$0xff]   ;;  %v6091_v54 = vld [vmem:[%s9051_s4 + $0x70] ss:$8 sps:$4 sm:$0xff]   ;;  %v6046_v58 = vld [vmem:[%s9050_s0 + $0x44] ss:$8 sps:$4 sm:$0xff]  }
  0x14   :  { %1450 = vmatpush1.bf16.msra.mxu1 %v6006_v19  ;;  %826 = vmatprep.subr.bf16.mxu0 %v6007_v20  ;;  %v6093_v53 = vld [vmem:[%s9051_s4 + $0x74] ss:$8 sps:$4 sm:$0xff]   ;;  %v6097_v55 = vld [vmem:[%s9051_s4 + $0xf0] ss:$8 sps:$4 sm:$0xff]   ;;  %v6109_v59 = vld [vmem:[%s9051_s4 + $0x60] ss:$8 sps:$4 sm:$0xff]  }
  0x15   :  { %1451 = vmatprep.subr.bf16.mxu1 %v6009_v21  ;;  %v6099_v56 = vld [vmem:[%s9051_s4 + $0xf4] ss:$8 sps:$4 sm:$0xff]   ;;  %v6045_v57 = vld [vmem:[%s9050_s0 + $0x30] ss:$8 sps:$4 sm:$0xff]   ;;  %v6111_v60 = vld [vmem:[%s9051_s4 + $0x64] ss:$8 sps:$4 sm:$0xff]  }
  0x16   :  { %v6048_v61 = vld [vmem:[%s9050_s0 + $0x40] ss:$8 sps:$4 sm:$0xff]   ;;  %v6052_v62 = vld [vmem:[%s9050_s0 + $0x54] ss:$8 sps:$4 sm:$0xff]   ;;  %v6117_v0 = vld [vmem:[%s9051_s4 + $0xe4] ss:$8 sps:$4 sm:$0xff]  }
  0x17   :  { %827 = vmatpush1.bf16.msra.mxu0 %v6011_v22  ;;  %v6115_v63 = vld [vmem:[%s9051_s4 + $0xe0] ss:$8 sps:$4 sm:$0xff]   ;;  %v6054_v1 = vld [vmem:[%s9050_s0 + $0x50] ss:$8 sps:$4 sm:$0xff]   ;;  %v6055_v2 = vld [vmem:[%s9050_s0 + $0x64] ss:$8 sps:$4 sm:$0xff]  }
  0x18   :  { %1452 = vmatpush1.bf16.msra.mxu1 %v6012_v23  ;;  %828 = vmatprep.subr.bf16.mxu0 %v6013_v24  ;;  %v6057_v3 = vld [vmem:[%s9050_s0 + $0x60] ss:$8 sps:$4 sm:$0xff]   ;;  %v6058_v4 = vld [vmem:[%s9050_s0 + $0x74] ss:$8 sps:$4 sm:$0xff]   ;;  %v6060_v5 = vld [vmem:[%s9050_s0 + $0x70] ss:$8 sps:$4 sm:$0xff]  }
  0x19   :  { %1453 = vmatprep.subr.bf16.mxu1 %v6015_v25  ;;  %v6061_v6 = vld [vmem:[%s9050_s0 + $0x84] ss:$8 sps:$4 sm:$0xff]   ;;  %v6127_v7 = vld [vmem:[%s9051_s4 + $0x50] ss:$8 sps:$4 sm:$0xff]   ;;  %v6129_v8 = vld [vmem:[%s9051_s4 + $0x54] ss:$8 sps:$4 sm:$0xff]  }
  0x1a   :  { %v6063_v9 = vld [vmem:[%s9050_s0 + $0x80] ss:$8 sps:$4 sm:$0xff]   ;;  %v6067_v10 = vld [vmem:[%s9050_s0 + $0x94] ss:$8 sps:$4 sm:$0xff]   ;;  %v6069_v11 = vld [vmem:[%s9050_s0 + $0x90] ss:$8 sps:$4 sm:$0xff]  }
  0x1b   :  { %829 = vmatpush1.bf16.msra.mxu0 %v6017_v26  ;;  %v6070_v12 = vld [vmem:[%s9050_s0 + $0xa4] ss:$8 sps:$4 sm:$0xff]   ;;  %v6135_v13 = vld [vmem:[%s9051_s4 + $0xd4] ss:$8 sps:$4 sm:$0xff]   ;;  %v6133_v14 = vld [vmem:[%s9051_s4 + $0xd0] ss:$8 sps:$4 sm:$0xff]  }
  0x1c   :  { %1454 = vmatpush1.bf16.msra.mxu1 %v6018_v27  ;;  %830 = vmatprep.subr.bf16.mxu0 %v6019_v28  ;;  %v6072_v15 = vld [vmem:[%s9050_s0 + $0xa0] ss:$8 sps:$4 sm:$0xff]   ;;  %v6073_v16 = vld [vmem:[%s9050_s0 + $0xb4] ss:$8 sps:$4 sm:$0xff]   ;;  %v6075_v17 = vld [vmem:[%s9050_s0 + $0xb0] ss:$8 sps:$4 sm:$0xff]  }
  0x1d   :  { %1455 = vmatprep.subr.bf16.mxu1 %v6021_v29  ;;  %v6076_v18 = vld [vmem:[%s9050_s0 + $0xc4] ss:$8 sps:$4 sm:$0xff]   ;;  %v6078_v19 = vld [vmem:[%s9050_s0 + $0xc0] ss:$8 sps:$4 sm:$0xff]   ;;  %v6082_v20 = vld [vmem:[%s9050_s0 + $0xd4] ss:$8 sps:$4 sm:$0xff]  }
  0x1e   :  { %v6084_v21 = vld [vmem:[%s9050_s0 + $0xd0] ss:$8 sps:$4 sm:$0xff]   ;;  %v6085_v22 = vld [vmem:[%s9050_s0 + $0xe4] ss:$8 sps:$4 sm:$0xff]   ;;  %v6145_v24 = vld [vmem:[%s9051_s4 + $0x40] ss:$8 sps:$4 sm:$0xff]  }
  0x1f   :  { %831 = vmatpush1.bf16.msra.mxu0 %v6023_v31  ;;  %v6147_v23 = vld [vmem:[%s9051_s4 + $0x44] ss:$8 sps:$4 sm:$0xff]   ;;  %v6151_v25 = vld [vmem:[%s9051_s4 + $0xc0] ss:$8 sps:$4 sm:$0xff]   ;;  %v6088_v28 = vld [vmem:[%s9050_s0 + $0xf4] ss:$8 sps:$4 sm:$0xff]  }
  0x20   :  { %1456 = vmatpush1.bf16.msra.mxu1 %v6024_v32  ;;  %5363 = vmatprep.subr.msk.bf16.mxu0 %vm809_vm1, %v6025_v33  ;;  %v6153_v26 = vld [vmem:[%s9051_s4 + $0xc4] ss:$8 sps:$4 sm:$0xff]   ;;  %v6087_v27 = vld [vmem:[%s9050_s0 + $0xe0] ss:$8 sps:$4 sm:$0xff]   ;;  %v6090_v29 = vld [vmem:[%s9050_s0 + $0xf0] ss:$8 sps:$4 sm:$0xff]  }
  0x21   :  { %5430 = vmatprep.subr.msk.bf16.mxu1 %vm809_vm1, %v6027_v34  ;;  %v6094_v30 = vld [vmem:[%s9050_s0 + $0x104] ss:$8 sps:$4 sm:$0xff]   ;;  %v6096_v31 = vld [vmem:[%s9050_s0 + $0x100] ss:$8 sps:$4 sm:$0xff]   ;;  %v6100_v32 = vld [vmem:[%s9050_s0 + $0x114] ss:$8 sps:$4 sm:$0xff]  }
  0x22   :  { %v6102_v33 = vld [vmem:[%s9050_s0 + $0x110] ss:$8 sps:$4 sm:$0xff]   ;;  %v6103_v34 = vld [vmem:[%s9050_s0 + $0x124] ss:$8 sps:$4 sm:$0xff]   ;;  %v6165_v35 = vld [vmem:[%s9051_s4 + $0x34] ss:$8 sps:$4 sm:$0xff]  }
  0x23   :  { %847 = vmatpush2.bf16.msra.mxu0 %v811_v37  ;;  %v6163_v36 = vld [vmem:[%s9051_s4 + $0x30] ss:$8 sps:$4 sm:$0xff]  }
  0x24   :  { %1472 = vmatpush2.bf16.msra.mxu1 %v1436_v38  ;;  %2904 = vmatprep.subr.bf16.mxu0 %v6036_v39  ;;  %v6169_v37 = vld [vmem:[%s9051_s4 + $0x170] ss:$8 sps:$4 sm:$0xff]   ;;  %v6171_v38 = vld [vmem:[%s9051_s4 + $0x174] ss:$8 sps:$4 sm:$0xff]   ;;  %v6105_v39 = vld [vmem:[%s9050_s0 + $0x120] ss:$8 sps:$4 sm:$0xff]  }
  0x25   :  { %3223 = vmatprep.subr.bf16.mxu1 %v6093_v53  ;;  %v6126_v53 = vld [vmem:[%s9050_s0 + $0x170] ss:$8 sps:$4 sm:$0xff]  }
  0x26   :  { %849 = vmatmul.mubr.bf16.vlgmr.msra.gmra.mxu0 %v6031_v40 }
  0x27   :  { %1474 = vmatmul.mubr.bf16.vlgmr.msra.gmra.mxu1 %v6031_v40  ;;  %2905 = vmatpush1.bf16.msra.mxu0 %v6034_v41  ;;  %v6106_v40 = vld [vmem:[%s9050_s0 + $0x134] ss:$8 sps:$4 sm:$0xff]   ;;  %v6108_v41 = vld [vmem:[%s9050_s0 + $0x130] ss:$8 sps:$4 sm:$0xff]  }
  0x28   :  { %5365 = vmatprep.mubr.msk.bf16.mxu0 %vm664_vm0, %v6037_v42  ;;  %5432 = vmatprep.mubr.msk.bf16.mxu1 %vm664_vm0, %v6037_v42  ;;  %v6112_v42 = vld [vmem:[%s9050_s0 + $0x144] ss:$8 sps:$4 sm:$0xff]  }
  0x29   :  { %2906 = vmatprep.subr.bf16.mxu0 %v6051_v43  ;;  %3224 = vmatpush1.bf16.msra.mxu1 %v6091_v54  ;;  %v6114_v43 = vld [vmem:[%s9050_s0 + $0x140] ss:$8 sps:$4 sm:$0xff]   ;;  %v6130_v54 = vld [vmem:[%s9050_s0 + $0x184] ss:$8 sps:$4 sm:$0xff]  }
  0x2a   :  { %3225 = vmatprep.subr.bf16.mxu1 %v6111_v60  ;;  %v2148_v60 = vlaneseq }
  0x2b   :  { %2907 = vmatpush1.bf16.msra.mxu0 %v6049_v44  ;;  %v6118_v44 = vld [vmem:[%s9050_s0 + $0x154] ss:$8 sps:$4 sm:$0xff]  }
  0x2c   :  { %2908 = vmatprep.subr.bf16.mxu0 %v6066_v45  ;;  %v6120_v45 = vld [vmem:[%s9050_s0 + $0x150] ss:$8 sps:$4 sm:$0xff]  }
  0x2d   :  { %3226 = vmatpush1.bf16.msra.mxu1 %v6109_v59 }
  0x2e   :  { %859 = vmatmul.mubr.bf16.gmra.mxu0 %v6039_v46  ;;  %3227 = vmatprep.subr.bf16.mxu1 %v6129_v8  ;;  %v6201_v8 = vld [vmem:[%s9051_s4 + $0x14] ss:$8 sps:$4 sm:$0xff]  }
  0x2f   :  { %1484 = vmatmul.mubr.bf16.gmra.mxu1 %v6039_v46  ;;  %5366 = vmatprep.mubr.msk.bf16.mxu0 %vm664_vm0, %v6040_v47  ;;  %v6121_v46 = vld [vmem:[%s9050_s0 + $0x164] ss:$8 sps:$4 sm:$0xff]  }
  0x30   :  { %5433 = vmatprep.mubr.msk.bf16.mxu1 %vm664_vm0, %v6040_v47  ;;  %2909 = vmatpush1.bf16.msra.mxu0 %v6064_v48  ;;  %v6183_v47 = vld [vmem:[%s9051_s4 + $0x24] ss:$8 sps:$4 sm:$0xff]   ;;  %v6181_v48 = vld [vmem:[%s9051_s4 + $0x20] ss:$8 sps:$4 sm:$0xff]  }
  0x31   :  { %2910 = vmatprep.subr.bf16.mxu0 %v6081_v49  ;;  %3228 = vmatpush1.bf16.msra.mxu1 %v6127_v7  ;;  %v6187_v49 = vld [vmem:[%s9051_s4 + $0x160] ss:$8 sps:$4 sm:$0xff]  }
  0x32   :  { %3229 = vmatprep.subr.bf16.mxu1 %v6147_v23 }
  0x34   :  { %2911 = vmatpush1.bf16.msra.mxu0 %v6079_v50  ;;  %v6189_v50 = vld [vmem:[%s9051_s4 + $0x164] ss:$8 sps:$4 sm:$0xff]  }
  0x35   :  { %2912 = vmatprep.subr.bf16.mxu0 %v6099_v56  ;;  %3230 = vmatpush1.bf16.msra.mxu1 %v6145_v24  ;;  %v6136_v56 = vld [vmem:[%s9050_s0 + $0x194] ss:$8 sps:$4 sm:$0xff]   ;;  %v6141_v24 = vld [vmem:[%s9050_s0 + $0x1a0] ss:$8 sps:$4 sm:$0xff]  }
  0x36   :  { %869 = vmatmul.mubr.bf16.gmra.mxu0 %v6042_v51  ;;  %3231 = vmatprep.subr.bf16.mxu1 %v6165_v35 }
  0x37   :  { %1494 = vmatmul.mubr.bf16.gmra.mxu1 %v6042_v51  ;;  %5367 = vmatprep.mubr.msk.bf16.mxu0 %vm664_vm0, %v6043_v52  ;;  %v6123_v51 = vld [vmem:[%s9050_s0 + $0x160] ss:$8 sps:$4 sm:$0xff]  }
  0x38   :  { %5434 = vmatprep.mubr.msk.bf16.mxu1 %vm664_vm0, %v6043_v52  ;;  %2913 = vmatpush1.bf16.msra.mxu0 %v6097_v55  ;;  %v6124_v52 = vld [vmem:[%s9050_s0 + $0x174] ss:$8 sps:$4 sm:$0xff]   ;;  %v6132_v55 = vld [vmem:[%s9050_s0 + $0x180] ss:$8 sps:$4 sm:$0xff]  }
  0x39   :  { %2914 = vmatprep.subr.bf16.mxu0 %v6117_v0  ;;  %3232 = vmatpush1.bf16.msra.mxu1 %v6163_v36 }
  0x3a   :  { %3233 = vmatprep.subr.bf16.mxu1 %v6183_v47 }
  0x3c   :  { %2915 = vmatpush1.bf16.msra.mxu0 %v6115_v63 }
  0x3d   :  { %2916 = vmatprep.subr.bf16.mxu0 %v6135_v13  ;;  %3234 = vmatpush1.bf16.msra.mxu1 %v6181_v48 }
  0x3e   :  { %879 = vmatmul.mubr.bf16.gmra.mxu0 %v6045_v57  ;;  %3235 = vmatprep.subr.bf16.mxu1 %v6201_v8 }
  0x3f   :  { %1504 = vmatmul.mubr.bf16.gmra.mxu1 %v6045_v57  ;;  %5368 = vmatprep.mubr.msk.bf16.mxu0 %vm664_vm0, %v6046_v58 }
  0x40   :  { %5435 = vmatprep.mubr.msk.bf16.mxu1 %vm664_vm0, %v6046_v58  ;;  %2917 = vmatpush1.bf16.msra.mxu0 %v6133_v14 }
  0x41   :  { %2918 = vmatprep.subr.bf16.mxu0 %v6153_v26 }
  0x44   :  { %2919 = vmatpush1.bf16.msra.mxu0 %v6151_v25 }
  0x45   :  { %2928 = vmatprep.subr.bf16.mxu0 %v6171_v38 }
  0x46   :  { %889 = vmatmul.mubr.bf16.gmra.mxu0 %v6048_v61 }
  0x47   :  { %1514 = vmatmul.mubr.bf16.gmra.mxu1 %v6048_v61  ;;  %5369 = vmatprep.mubr.msk.bf16.mxu0 %vm664_vm0, %v6052_v62 }
  0x48   :  { %5436 = vmatprep.mubr.msk.bf16.mxu1 %vm664_vm0, %v6052_v62  ;;  %2929 = vmatpush2.bf16.msra.mxu0 %v6169_v37 }
  0x49   :  { %2930 = vmatprep.subr.bf16.mxu0 %v6189_v50 }
  0x4c   :  { %2931 = vmatpush2.bf16.msra.mxu0 %v6187_v49  ;;  %v6148_v49 = vld [vmem:[%s9050_s0 + $0x1c4] ss:$8 sps:$4 sm:$0xff]  }
  0x4e   :  { %899 = vmatmul.mubr.bf16.gmra.mxu0 %v6054_v1 }
  0x4f   :  { %1524 = vmatmul.mubr.bf16.gmra.mxu1 %v6054_v1  ;;  %5370 = vmatprep.mubr.msk.bf16.mxu0 %vm664_vm0, %v6055_v2 }
  0x50   :  { %5437 = vmatprep.mubr.msk.bf16.mxu1 %vm664_vm0, %v6055_v2  ;;  %v6138_v2 = vld [vmem:[%s9050_s0 + $0x190] ss:$8 sps:$4 sm:$0xff]  }
  0x56   :  { %909 = vmatmul.mubr.bf16.gmra.mxu0 %v6057_v3 }
  0x57   :  { %1534 = vmatmul.mubr.bf16.gmra.mxu1 %v6057_v3  ;;  %5371 = vmatprep.mubr.msk.bf16.mxu0 %vm664_vm0, %v6058_v4  ;;  %v2149_v3 = vshrl.u32 %v2148_v60, 7 }
  0x58   :  { %5438 = vmatprep.mubr.msk.bf16.mxu1 %vm664_vm0, %v6058_v4 }
  0x5e   :  { %919 = vmatmul.mubr.bf16.gmra.mxu0 %v6060_v5 }
  0x5f   :  { %1544 = vmatmul.mubr.bf16.gmra.mxu1 %v6060_v5  ;;  %5372 = vmatprep.mubr.msk.bf16.mxu0 %vm664_vm0, %v6061_v6  ;;  %v6139_v5 = vld [vmem:[%s9050_s0 + $0x1a4] ss:$8 sps:$4 sm:$0xff]  }
  0x60   :  { %5439 = vmatprep.mubr.msk.bf16.mxu1 %vm664_vm0, %v6061_v6 }
  0x66   :  { %929 = vmatmul.mubr.bf16.gmra.mxu0 %v6063_v9 }
  0x67   :  { %1554 = vmatmul.mubr.bf16.gmra.mxu1 %v6063_v9  ;;  %5373 = vmatprep.mubr.msk.bf16.mxu0 %vm664_vm0, %v6067_v10 }
  0x68   :  { %5440 = vmatprep.mubr.msk.bf16.mxu1 %vm664_vm0, %v6067_v10  ;;  %v6199_v10 = vld [vmem:[%s9051_s4 + $0x10] ss:$8 sps:$4 sm:$0xff]  }
  0x69   :  { %3236 = vmatpush1.bf16.msra.mxu1 %v6199_v10 }
  0x6e   :  { %939 = vmatmul.mubr.bf16.gmra.mxu0 %v6069_v11 }
  0x6f   :  { %1564 = vmatmul.mubr.bf16.gmra.mxu1 %v6069_v11  ;;  %5374 = vmatprep.mubr.msk.bf16.mxu0 %vm664_vm0, %v6070_v12  ;;  %v6205_v11 = vld [vmem:[%s9051_s4 + $0x150] ss:$8 sps:$4 sm:$0xff]  }
  0x70   :  { %5441 = vmatprep.mubr.msk.bf16.mxu1 %vm664_vm0, %v6070_v12  ;;  %v6207_v12 = vld [vmem:[%s9051_s4 + $0x154] ss:$8 sps:$4 sm:$0xff]  }
  0x71   :  { %2932 = vmatprep.subr.bf16.mxu0 %v6207_v12 }
  0x72   :  { %2933 = vmatpush2.bf16.msra.mxu0 %v6205_v11 }
  0x76   :  { %949 = vmatmul.mubr.bf16.gmra.mxu0 %v6072_v15 }
  0x77   :  { %1574 = vmatmul.mubr.bf16.gmra.mxu1 %v6072_v15  ;;  %5375 = vmatprep.mubr.msk.bf16.mxu0 %vm664_vm0, %v6073_v16  ;;  %v2150_v15 = vsub.s32 0, %v2149_v3 }
  0x78   :  { %5442 = vmatprep.mubr.msk.bf16.mxu1 %vm664_vm0, %v6073_v16 }
  0x7e   :  { %959 = vmatmul.mubr.bf16.gmra.mxu0 %v6075_v17 }
  0x7f   :  { %1584 = vmatmul.mubr.bf16.gmra.mxu1 %v6075_v17  ;;  %5376 = vmatprep.mubr.msk.bf16.mxu0 %vm664_vm0, %v6076_v18  ;;  %v2146_v17 = vld [vmem:[%s9052_s3] sm:$0x3] }
  0x80   :  { %5443 = vmatprep.mubr.msk.bf16.mxu1 %vm664_vm0, %v6076_v18  ;;  %v2154_v18 = vsub.s32 1, %v2149_v3  ;;  %v6871_v25 = vrot.slane %v2146_v17, %v2150_v15 }
  0x86   :  { %969 = vmatmul.mubr.bf16.gmra.mxu0 %v6078_v19 }
  0x87   :  { %1594 = vmatmul.mubr.bf16.gmra.mxu1 %v6078_v19  ;;  %5377 = vmatprep.mubr.msk.bf16.mxu0 %vm664_vm0, %v6082_v20 }
  0x88   :  { %5444 = vmatprep.mubr.msk.bf16.mxu1 %vm664_vm0, %v6082_v20 }
  0x8e   :  { %979 = vmatmul.mubr.bf16.gmra.mxu0 %v6084_v21 }
  0x8f   :  { %1604 = vmatmul.mubr.bf16.gmra.mxu1 %v6084_v21  ;;  %5378 = vmatprep.mubr.msk.bf16.mxu0 %vm664_vm0, %v6085_v22 }
  0x90   :  { %5445 = vmatprep.mubr.msk.bf16.mxu1 %vm664_vm0, %v6085_v22 }
  0x96   :  { %989 = vmatmul.mubr.bf16.gmra.mxu0 %v6087_v27 }
  0x97   :  { %1614 = vmatmul.mubr.bf16.gmra.mxu1 %v6087_v27  ;;  %5379 = vmatprep.mubr.msk.bf16.mxu0 %vm664_vm0, %v6088_v28  ;;  %v6142_v27 = vld [vmem:[%s9050_s0 + $0x1b4] ss:$8 sps:$4 sm:$0xff]  }
  0x98   :  { %5446 = vmatprep.mubr.msk.bf16.mxu1 %vm664_vm0, %v6088_v28  ;;  %v6878_v28 = vrot.slane %v2146_v17, %v2154_v18  ;;  %v6154_v18 = vld [vmem:[%s9050_s0 + $0x1d4] ss:$8 sps:$4 sm:$0xff]  }
  0x9e   :  { %999 = vmatmul.mubr.bf16.gmra.mxu0 %v6090_v29 }
  0x9f   :  { %1624 = vmatmul.mubr.bf16.gmra.mxu1 %v6090_v29  ;;  %5380 = vmatprep.mubr.msk.bf16.mxu0 %vm664_vm0, %v6094_v30 }
  0xa0   :  { %5447 = vmatprep.mubr.msk.bf16.mxu1 %vm664_vm0, %v6094_v30 }
  0xa6   :  { %1009 = vmatmul.mubr.bf16.gmra.mxu0 %v6096_v31 }
  0xa7   :  { %1634 = vmatmul.mubr.bf16.gmra.mxu1 %v6096_v31  ;;  %5381 = vmatprep.mubr.msk.bf16.mxu0 %vm664_vm0, %v6100_v32 }
  0xa8   :  { %5448 = vmatprep.mubr.msk.bf16.mxu1 %vm664_vm0, %v6100_v32 }
  0xae   :  { %1019 = vmatmul.mubr.bf16.gmra.mxu0 %v6102_v33 }
  0xaf   :  { %1644 = vmatmul.mubr.bf16.gmra.mxu1 %v6102_v33  ;;  %5382 = vmatprep.mubr.msk.bf16.mxu0 %vm664_vm0, %v6103_v34 }
  0xb0   :  { %5449 = vmatprep.mubr.msk.bf16.mxu1 %vm664_vm0, %v6103_v34 }
  0xb6   :  { %1029 = vmatmul.mubr.bf16.gmra.mxu0 %v6105_v39 }
  0xb7   :  { %1654 = vmatmul.mubr.bf16.gmra.mxu1 %v6105_v39  ;;  %5383 = vmatprep.mubr.msk.bf16.mxu0 %vm664_vm0, %v6106_v40 }
  0xb8   :  { %5450 = vmatprep.mubr.msk.bf16.mxu1 %vm664_vm0, %v6106_v40 }
  0xbe   :  { %1039 = vmatmul.mubr.bf16.gmra.mxu0 %v6108_v41 }
  0xbf   :  { %1664 = vmatmul.mubr.bf16.gmra.mxu1 %v6108_v41  ;;  %5384 = vmatprep.mubr.msk.bf16.mxu0 %vm664_vm0, %v6112_v42 }
  0xc0   :  { %5451 = vmatprep.mubr.msk.bf16.mxu1 %vm664_vm0, %v6112_v42 }
  0xc6   :  { %1049 = vmatmul.mubr.bf16.gmra.mxu0 %v6114_v43 }
  0xc7   :  { %1674 = vmatmul.mubr.bf16.gmra.mxu1 %v6114_v43  ;;  %5385 = vmatprep.mubr.msk.bf16.mxu0 %vm664_vm0, %v6118_v44 }
  0xc8   :  { %5452 = vmatprep.mubr.msk.bf16.mxu1 %vm664_vm0, %v6118_v44  ;;  %v6144_v44 = vld [vmem:[%s9050_s0 + $0x1b0] ss:$8 sps:$4 sm:$0xff]  }
  0xce   :  { %1059 = vmatmul.mubr.bf16.gmra.mxu0 %v6120_v45 }
  0xcf   :  { %1684 = vmatmul.mubr.bf16.gmra.mxu1 %v6120_v45  ;;  %5386 = vmatprep.mubr.msk.bf16.mxu0 %vm664_vm0, %v6121_v46 }
  0xd0   :  { %5453 = vmatprep.mubr.msk.bf16.mxu1 %vm664_vm0, %v6121_v46 }
  0xd6   :  { %1069 = vmatmul.mubr.bf16.gmra.mxu0 %v6123_v51 }
  0xd7   :  { %1694 = vmatmul.mubr.bf16.gmra.mxu1 %v6123_v51  ;;  %5387 = vmatprep.mubr.msk.bf16.mxu0 %vm664_vm0, %v6124_v52 }
  0xd8   :  { %5454 = vmatprep.mubr.msk.bf16.mxu1 %vm664_vm0, %v6124_v52 }
  0xde   :  { %1079 = vmatmul.mubr.bf16.gmra.mxu0 %v6126_v53 }
  0xdf   :  { %1704 = vmatmul.mubr.bf16.gmra.mxu1 %v6126_v53  ;;  %5388 = vmatprep.mubr.msk.bf16.mxu0 %vm664_vm0, %v6130_v54 }
  0xe0   :  { %5455 = vmatprep.mubr.msk.bf16.mxu1 %vm664_vm0, %v6130_v54 }
  0xe6   :  { %v850_v57 = vpop.f32.mrf.mxu0  ;;  %1089 = vmatmul.mubr.bf16.gmra.mxu0 %v6132_v55 }
  0xe7   :  { %v1475_v58 = vpop.f32.mrf.mxu1  ;;  %1714 = vmatmul.mubr.bf16.gmra.mxu1 %v6132_v55  ;;  %5389 = vmatprep.mubr.msk.bf16.mxu0 %vm664_vm0, %v6136_v56 }
  0xe8   :  { %v1954_v59 = vmax.f32 %v850_v57, %v1475_v58  ;;  %5456 = vmatprep.mubr.msk.bf16.mxu1 %vm664_vm0, %v6136_v56  ;;  %v852_v61 = vpop.f32.mrf.mxu0 }
  0xe9   :  { %v1477_v62 = vpop.f32.mrf.mxu1 }
  0xea   :  { %v1955_v63 = vmax.f32 %v852_v61, %v1477_v62  ;;  %v854_v0 = vpop.f32.mrf.mxu0  ;;  %v2158_v34 = vadd.f32 %v6871_v25, %v1954_v59 }
  0xeb   :  { %v1479_v1 = vpop.f32.mrf.mxu1 }
  0xec   :  { %v1956_v4 = vmax.f32 %v854_v0, %v1479_v1  ;;  %v856_v6 = vpop.f32.mrf.mxu0  ;;  %v2159_v36 = vadd.f32 %v6878_v28, %v1955_v63  ;;  %v2350_v45 = vmax.f32 %v2158_v34, 0.0 }
  0xed   :  { %v1481_v7 = vpop.f32.mrf.mxu1 }
  0xee   :  { %v1957_v9 = vmax.f32 %v856_v6, %v1481_v7  ;;  %v860_v13 = vpop.f32.mrf.mxu0  ;;  %1099 = vmatmul.mubr.bf16.gmra.mxu0 %v6138_v2  ;;  %v2160_v41 = vadd.f32 %v6871_v25, %v1956_v4  ;;  %v2351_v50 = vmax.f32 %v2159_v36, 0.0 }
  0xef   :  { %v1485_v14 = vpop.f32.mrf.mxu1  ;;  %1724 = vmatmul.mubr.bf16.gmra.mxu1 %v6138_v2  ;;  %5390 = vmatprep.mubr.msk.bf16.mxu0 %vm664_vm0, %v6139_v5 }
  0xf0   :  { %v1958_v16 = vmax.f32 %v860_v13, %v1485_v14  ;;  %5457 = vmatprep.mubr.msk.bf16.mxu1 %vm664_vm0, %v6139_v5  ;;  %v862_v19 = vpop.f32.mrf.mxu0  ;;  %v2161_v51 = vadd.f32 %v6878_v28, %v1957_v9  ;;  %v2352_v58 = vmax.f32 %v2160_v41, 0.0  ;;  %v6150_v13 = vld [vmem:[%s9050_s0 + $0x1c0] ss:$8 sps:$4 sm:$0xff]  }
  0xf1   :  { %v1487_v20 = vpop.f32.mrf.mxu1 }
  0xf2   :  { %v1959_v21 = vmax.f32 %v862_v19, %v1487_v20  ;;  %v6864_v22 = vpop.f32.mrf.mxu0  ;;  %v2162_v59 = vadd.f32 %v6871_v25, %v1958_v16  ;;  %v2353_v2 = vmax.f32 %v2161_v51, 0.0 }
  0xf3   :  { %v6866_v23 = vpop.f32.mrf.mxu1 }
  0xf4   :  { %v1960_v26 = vmax.f32 %v6864_v22, %v6866_v23  ;;  %v6880_v29 = vpop.f32.mrf.mxu0  ;;  %v2163_v3 = vadd.f32 %v6878_v28, %v1959_v21  ;;  %v2354_v10 = vmax.f32 %v2162_v59, 0.0 }
  0xf5   :  { %v6882_v30 = vpop.f32.mrf.mxu1 }
  0xf6   :  { %v1961_v31 = vmax.f32 %v6880_v29, %v6882_v30  ;;  %v870_v32 = vpop.f32.mrf.mxu0  ;;  %1109 = vmatmul.mubr.bf16.gmra.mxu0 %v6141_v24  ;;  %v2355_v19 = vmax.f32 %v2163_v3, 0.0  ;;  %v2164_v20 = vadd.f32 %v6871_v25, %v1960_v26 }
  0xf7   :  { %v1495_v33 = vpop.f32.mrf.mxu1  ;;  %1734 = vmatmul.mubr.bf16.gmra.mxu1 %v6141_v24  ;;  %5391 = vmatprep.mubr.msk.bf16.mxu0 %vm664_vm0, %v6142_v27 }
  0xf8   :  { %v1962_v35 = vmax.f32 %v870_v32, %v1495_v33  ;;  %5458 = vmatprep.mubr.msk.bf16.mxu1 %vm664_vm0, %v6142_v27  ;;  %v872_v37 = vpop.f32.mrf.mxu0  ;;  %v2165_v21 = vadd.f32 %v6878_v28, %v1961_v31  ;;  %v2356_v31 = vmax.f32 %v2164_v20, 0.0 }
  0xf9   :  { %v1497_v38 = vpop.f32.mrf.mxu1 }
  0xfa   :  { %v2166_v39 = vadd.f32 %v6871_v25, %v1962_v35  ;;  %v1963_v40 = vmax.f32 %v872_v37, %v1497_v38  ;;  %v874_v42 = vpop.f32.mrf.mxu0  ;;  %v2357_v41 = vmax.f32 %v2165_v21, 0.0 }
  0xfb   :  { %v1499_v43 = vpop.f32.mrf.mxu1 }
  0xfc   :  { %v2358_v46 = vmax.f32 %v2166_v39, 0.0  ;;  %v2167_v47 = vadd.f32 %v6878_v28, %v1963_v40  ;;  %v1964_v48 = vmax.f32 %v874_v42, %v1499_v43  ;;  %v876_v52 = vpop.f32.mrf.mxu0 }
  0xfd   :  { %v1501_v53 = vpop.f32.mrf.mxu1 }
  0xfe   :  { %v6900_v54 = vmax.f32 %v2350_v45, %v2358_v46  ;;  %v2359_v55 = vmax.f32 %v2167_v47, 0.0  ;;  %v2168_v56 = vadd.f32 %v6871_v25, %v1964_v48  ;;  %v1965_v57 = vmax.f32 %v876_v52, %v1501_v53  ;;  %v880_v60 = vpop.f32.mrf.mxu0  ;;  %1119 = vmatmul.mubr.bf16.gmra.mxu0 %v6144_v44  ;;  %v6156_v47 = vld [vmem:[%s9050_s0 + $0x1d0] ss:$8 sps:$4 sm:$0xff]  }
  0xff   :  { %v1505_v61 = vpop.f32.mrf.mxu1  ;;  %1744 = vmatmul.mubr.bf16.gmra.mxu1 %v6144_v44  ;;  %5392 = vmatprep.mubr.msk.bf16.mxu0 %vm664_vm0, %v6148_v49 }
 0x100   :  { %v6904_v62 = vmax.f32 %v2351_v50, %v2359_v55  ;;  %v2360_v63 = vmax.f32 %v2168_v56, 0.0  ;;  %v2169_v0 = vadd.f32 %v6878_v28, %v1965_v57  ;;  %v1966_v1 = vmax.f32 %v880_v60, %v1505_v61  ;;  %5459 = vmatprep.mubr.msk.bf16.mxu1 %vm664_vm0, %v6148_v49  ;;  %v882_v4 = vpop.f32.mrf.mxu0  ;;  %v6157_v50 = vld [vmem:[%s9050_s0 + $0x1e4] ss:$8 sps:$4 sm:$0xff]   ;;  %v6217_v56 = vld [vmem:[%s9051_s4] ss:$8 sps:$4 sm:$0xff]  }
 0x101   :  { %v1507_v5 = vpop.f32.mrf.mxu1  ;;  %v6219_v57 = vld [vmem:[%s9051_s4 + $0x4] ss:$8 sps:$4 sm:$0xff]   ;;  %v6223_v61 = vld [vmem:[%s9051_s4 + $0x140] ss:$8 sps:$4 sm:$0xff]  }
 0x102   :  { %v6910_v6 = vmax.f32 %v2352_v58, %v2360_v63  ;;  %v2361_v7 = vmax.f32 %v2169_v0, 0.0  ;;  %v2170_v8 = vadd.f32 %v6871_v25, %v1966_v1  ;;  %v1967_v9 = vmax.f32 %v882_v4, %v1507_v5  ;;  %v884_v11 = vpop.f32.mrf.mxu0  ;;  %v6225_v63 = vld [vmem:[%s9051_s4 + $0x144] ss:$8 sps:$4 sm:$0xff]   ;;  %3237 = vmatprep.subr.bf16.mxu1 %v6219_v57 }
 0x103   :  { %v1509_v12 = vpop.f32.mrf.mxu1  ;;  %2934 = vmatprep.subr.bf16.mxu0 %v6225_v63  ;;  %3238 = vmatpush1.bf16.msra.mxu1 %v6217_v56 }
 0x104   :  { %v2638_v14 = vpack.c.bf16 %v6910_v6, %v6900_v54  ;;  %v6918_v15 = vmax.f32 %v2353_v2, %v2361_v7  ;;  %v2362_v16 = vmax.f32 %v2170_v8, 0.0  ;;  %v2171_v17 = vadd.f32 %v6878_v28, %v1967_v9  ;;  %v886_v27 = vpop.f32.mrf.mxu0  ;;  %2935 = vmatpush2.bf16.msra.mxu0 %v6223_v61  ;;  %v6159_v7 = vld [vmem:[%s9050_s0 + $0x1e0] ss:$8 sps:$4 sm:$0xff]   ;;  %v6160_v9 = vld [vmem:[%s9050_s0 + $0x1f4] ss:$8 sps:$4 sm:$0xff]  }
 0x105   :  { %v1968_v24 = vmax.f32 %v884_v11, %v1509_v12  ;;  %v1511_v29 = vpop.f32.mrf.mxu1 }
 0x106   :  { %v6929_v30 = vmax.f32 %v2354_v10, %v2362_v16  ;;  %v2363_v32 = vmax.f32 %v2171_v17, 0.0  ;;  %v1969_v33 = vmax.f32 %v886_v27, %v1511_v29  ;;  %v2639_v34 = vpack.c.bf16 %v6918_v15, %v6904_v62  ;;  %v890_v36 = vpop.f32.mrf.mxu0  ;;  %1129 = vmatmul.mubr.bf16.gmra.mxu0 %v6150_v13 }
 0x107   :  { %v2172_v35 = vadd.f32 %v6871_v25, %v1968_v24  ;;  %v1515_v37 = vpop.f32.mrf.mxu1  ;;  %1754 = vmatmul.mubr.bf16.gmra.mxu1 %v6150_v13  ;;  %5393 = vmatprep.mubr.msk.bf16.mxu0 %vm664_vm0, %v6154_v18  ;;  %v6234_v13 = vld [vmem:[%s9051_s4 + $0xb4] ss:$8 sps:$4 sm:$0xff]  }
 0x108   :  { %v6934_v22 = vmax.f32 %v2355_v19, %v2363_v32  ;;  %v2173_v23 = vadd.f32 %v6878_v28, %v1969_v33  ;;  %v1970_v26 = vmax.f32 %v890_v36, %v1515_v37  ;;  %5460 = vmatprep.mubr.msk.bf16.mxu1 %vm664_vm0, %v6154_v18  ;;  %v892_v39 = vpop.f32.mrf.mxu0  ;;  %v6232_v18 = vld [vmem:[%s9051_s4 + $0xb0] ss:$8 sps:$4 sm:$0xff]   ;;  %3247 = vmatprep.subr.bf16.mxu1 %v6234_v13  ;;  %v6237_v33 = vld [vmem:[%s9051_s4 + $0xa4] ss:$8 sps:$4 sm:$0xff]  }
 0x109   :  { %v2364_v38 = vmax.f32 %v2172_v35, 0.0  ;;  %v1517_v40 = vpop.f32.mrf.mxu1  ;;  %3248 = vmatpush2.bf16.msra.mxu1 %v6232_v18 }
 0x10a   :  { %v2365_v42 = vmax.f32 %v2173_v23, 0.0  ;;  %v1971_v43 = vmax.f32 %v892_v39, %v1517_v40  ;;  %v894_v45 = vpop.f32.mrf.mxu0  ;;  %v2174_v19 = vadd.f32 %v6871_v25, %v1970_v26  ;;  %v6162_v23 = vld [vmem:[%s9050_s0 + $0x1f0] ss:$8 sps:$4 sm:$0xff]   ;;  %v6235_v26 = vld [vmem:[%s9051_s4 + $0xa0] ss:$8 sps:$4 sm:$0xff]   ;;  %3249 = vmatprep.subr.bf16.mxu1 %v6237_v33 }
 0x10b   :  { %v6939_v44 = vmax.f32 %v2356_v31, %v2364_v38  ;;  %v1519_v46 = vpop.f32.mrf.mxu1 }
 0x10c   :  { %v6944_v48 = vmax.f32 %v2357_v41, %v2365_v42  ;;  %v1972_v49 = vmax.f32 %v894_v45, %v1519_v46  ;;  %v896_v52 = vpop.f32.mrf.mxu0  ;;  %v2175_v21 = vadd.f32 %v6878_v28, %v1971_v43  ;;  %v2366_v31 = vmax.f32 %v2174_v19, 0.0  ;;  %v6166_v41 = vld [vmem:[%s9050_s0 + $0x204] ss:$8 sps:$4 sm:$0xff]  }
 0x10d   :  { %v2640_v51 = vpack.c.bf16 %v6939_v44, %v6929_v30  ;;  %v1521_v53 = vpop.f32.mrf.mxu1  ;;  %3250 = vmatpush2.bf16.msra.mxu1 %v6235_v26  ;;  %v6283_v30 = vld [vmem:[%s9051_s4 + $0x280] ss:$8 sps:$4 sm:$0xff]   ;;  %v6261_v44 = vld [vmem:[%s9051_s4 + $0x1b4] ss:$8 sps:$4 sm:$0xff]  }
 0x10e   :  { %v1973_v55 = vmax.f32 %v896_v52, %v1521_v53  ;;  %v2641_v58 = vpack.c.bf16 %v6944_v48, %v6934_v22  ;;  %v6959_v59 = vpop.f32.mrf.mxu0  ;;  %1139 = vmatmul.mubr.bf16.gmra.mxu0 %v6156_v47  ;;  %v2176_v35 = vadd.f32 %v6871_v25, %v1972_v49  ;;  %v2367_v42 = vmax.f32 %v2175_v21, 0.0  ;;  %v6243_v53 = vld [vmem:[%s9051_s4 + $0x94] ss:$8 sps:$4 sm:$0xff]   ;;  %v6274_v22 = vld [vmem:[%s9051_s4 + $0x2a0] ss:$8 sps:$4 sm:$0xff]  }
 0x10f   :  { %v6961_v60 = vpop.f32.mrf.mxu1  ;;  %1764 = vmatmul.mubr.bf16.gmra.mxu1 %v6156_v47  ;;  %5394 = vmatprep.mubr.msk.bf16.mxu0 %vm664_vm0, %v6157_v50 }
 0x110   :  { %v1974_v0 = vmax.f32 %v6959_v59, %v6961_v60  ;;  %5461 = vmatprep.mubr.msk.bf16.mxu1 %vm664_vm0, %v6157_v50  ;;  %v6973_v1 = vpop.f32.mrf.mxu0  ;;  %v2177_v43 = vadd.f32 %v6878_v28, %v1973_v55  ;;  %v2368_v56 = vmax.f32 %v2176_v35, 0.0  ;;  %v6241_v55 = vld [vmem:[%s9051_s4 + $0x90] ss:$8 sps:$4 sm:$0xff]   ;;  %3251 = vmatprep.subr.bf16.mxu1 %v6243_v53 }
 0x111   :  { %v6975_v2 = vpop.f32.mrf.mxu1  ;;  %3252 = vmatpush2.bf16.msra.mxu1 %v6241_v55  ;;  %v6174_v55 = vld [vmem:[%s9050_s0 + $0x210] ss:$8 sps:$4 sm:$0xff]  }
 0x112   :  { %v1975_v3 = vmax.f32 %v6973_v1, %v6975_v2  ;;  %v6979_v4 = vpop.f32.mrf.mxu0  ;;  %v2178_v57 = vadd.f32 %v6871_v25, %v1974_v0  ;;  %v2369_v13 = vmax.f32 %v2177_v43, 0.0  ;;  %v6168_v1 = vld [vmem:[%s9050_s0 + $0x200] ss:$8 sps:$4 sm:$0xff]  }
 0x113   :  { %v6981_v5 = vpop.f32.mrf.mxu1  ;;  %v6244_v2 = vld [vmem:[%s9051_s4 + $0x80] ss:$8 sps:$4 sm:$0xff]  }
 0x114   :  { %v1976_v8 = vmax.f32 %v6979_v4, %v6981_v5  ;;  %v6991_v10 = vpop.f32.mrf.mxu0  ;;  %v2179_v0 = vadd.f32 %v6878_v28, %v1975_v3 }
 0x115   :  { %v6993_v11 = vpop.f32.mrf.mxu1 }
 0x116   :  { %v1977_v12 = vmax.f32 %v6991_v10, %v6993_v11  ;;  %v910_v16 = vpop.f32.mrf.mxu0  ;;  %1149 = vmatmul.mubr.bf16.gmra.mxu0 %v6159_v7  ;;  %v2180_v26 = vadd.f32 %v6871_v25, %v1976_v8 }
 0x117   :  { %v1535_v17 = vpop.f32.mrf.mxu1  ;;  %1774 = vmatmul.mubr.bf16.gmra.mxu1 %v6159_v7  ;;  %5395 = vmatprep.mubr.msk.bf16.mxu0 %vm664_vm0, %v6160_v9 }
 0x118   :  { %v1978_v20 = vmax.f32 %v910_v16, %v1535_v17  ;;  %5462 = vmatprep.mubr.msk.bf16.mxu1 %vm664_vm0, %v6160_v9  ;;  %v912_v24 = vpop.f32.mrf.mxu0  ;;  %v2372_v11 = vmax.f32 %v2180_v26, 0.0 }
 0x119   :  { %v1537_v27 = vpop.f32.mrf.mxu1 }
 0x11a   :  { %v2182_v29 = vadd.f32 %v6871_v25, %v1978_v20  ;;  %v1979_v32 = vmax.f32 %v912_v24, %v1537_v27  ;;  %v914_v36 = vpop.f32.mrf.mxu0  ;;  %v6246_v24 = vld [vmem:[%s9051_s4 + $0x84] ss:$8 sps:$4 sm:$0xff]   ;;  %v2370_v27 = vmax.f32 %v2178_v57, 0.0 }
 0x11b   :  { %v1539_v37 = vpop.f32.mrf.mxu1  ;;  %3253 = vmatprep.subr.bf16.mxu1 %v6246_v24 }
 0x11c   :  { %v2374_v38 = vmax.f32 %v2182_v29, 0.0  ;;  %v2183_v39 = vadd.f32 %v6878_v28, %v1979_v32  ;;  %v1980_v40 = vmax.f32 %v914_v36, %v1539_v37  ;;  %v916_v45 = vpop.f32.mrf.mxu0  ;;  %v6172_v37 = vld [vmem:[%s9050_s0 + $0x214] ss:$8 sps:$4 sm:$0xff]   ;;  %3254 = vmatpush2.bf16.msra.mxu1 %v6244_v2  ;;  %v6177_v2 = vld [vmem:[%s9050_s0 + $0x220] ss:$8 sps:$4 sm:$0xff]  }
 0x11d   :  { %v1541_v46 = vpop.f32.mrf.mxu1 }
 0x11e   :  { %v2550_v47 = vmax.f32 %v2366_v31, %v2374_v38  ;;  %v2375_v49 = vmax.f32 %v2183_v39, 0.0  ;;  %v2184_v50 = vadd.f32 %v6871_v25, %v1980_v40  ;;  %v1981_v52 = vmax.f32 %v916_v45, %v1541_v46  ;;  %v920_v59 = vpop.f32.mrf.mxu0  ;;  %1159 = vmatmul.mubr.bf16.gmra.mxu0 %v6162_v23 }
 0x11f   :  { %v1545_v60 = vpop.f32.mrf.mxu1  ;;  %1784 = vmatmul.mubr.bf16.gmra.mxu1 %v6162_v23  ;;  %5396 = vmatprep.mubr.msk.bf16.mxu0 %vm664_vm0, %v6166_v41  ;;  %v2371_v23 = vmax.f32 %v2179_v0, 0.0  ;;  %v2181_v31 = vadd.f32 %v6878_v28, %v1977_v12 }
 0x120   :  { %v2551_v61 = vmax.f32 %v2367_v42, %v2375_v49  ;;  %v2376_v63 = vmax.f32 %v2184_v50, 0.0  ;;  %v2185_v7 = vadd.f32 %v6878_v28, %v1981_v52  ;;  %v1982_v9 = vmax.f32 %v920_v59, %v1545_v60  ;;  %5463 = vmatprep.mubr.msk.bf16.mxu1 %vm664_vm0, %v6166_v41  ;;  %v922_v16 = vpop.f32.mrf.mxu0 }
 0x121   :  { %v1547_v17 = vpop.f32.mrf.mxu1  ;;  %v2373_v52 = vmax.f32 %v2181_v31, 0.0 }
 0x122   :  { %v2552_v18 = vmax.f32 %v2368_v56, %v2376_v63  ;;  %v2377_v19 = vmax.f32 %v2185_v7, 0.0  ;;  %v2186_v20 = vadd.f32 %v6871_v25, %v1982_v9  ;;  %v1983_v21 = vmax.f32 %v922_v16, %v1547_v17  ;;  %v924_v29 = vpop.f32.mrf.mxu0  ;;  %v6175_v7 = vld [vmem:[%s9050_s0 + $0x224] ss:$8 sps:$4 sm:$0xff]   ;;  %v6249_v17 = vld [vmem:[%s9051_s4 + $0x1f4] ss:$8 sps:$4 sm:$0xff]  }
 0x123   :  { %v1549_v32 = vpop.f32.mrf.mxu1  ;;  %3567 = vmatprep.subr.bf16.mxu0 %v6249_v17 }
 0x124   :  { %v7048_v3 = vpack.c.bf16 %v2552_v18, %v2550_v47  ;;  %v2553_v33 = vmax.f32 %v2369_v13, %v2377_v19  ;;  %v2378_v35 = vmax.f32 %v2186_v20, 0.0  ;;  %v2187_v36 = vadd.f32 %v6878_v28, %v1983_v21  ;;  %v926_v39 = vpop.f32.mrf.mxu0 }
 0x125   :  { %v1984_v38 = vmax.f32 %v924_v29, %v1549_v32  ;;  %v1551_v40 = vpop.f32.mrf.mxu1 }
 0x126   :  { %v2554_v41 = vmax.f32 %v2370_v27, %v2378_v35  ;;  %v2379_v42 = vmax.f32 %v2187_v36, 0.0  ;;  %v1985_v43 = vmax.f32 %v926_v39, %v1551_v40  ;;  %v7062_v45 = vpack.c.bf16 %v2553_v33, %v2551_v61  ;;  %v930_v47 = vpop.f32.mrf.mxu0  ;;  %1169 = vmatmul.mubr.bf16.gmra.mxu0 %v6168_v1  ;;  %v6178_v35 = vld [vmem:[%s9050_s0 + $0x234] ss:$8 sps:$4 sm:$0xff]  }
 0x127   :  { %v2188_v46 = vadd.f32 %v6871_v25, %v1984_v38  ;;  %v1555_v4 = vpop.f32.mrf.mxu1  ;;  %1794 = vmatmul.mubr.bf16.gmra.mxu1 %v6168_v1  ;;  %5397 = vmatprep.mubr.msk.bf16.mxu0 %vm664_vm0, %v6172_v37 }
 0x128   :  { %v2555_v5 = vmax.f32 %v2371_v23, %v2379_v42  ;;  %v2189_v8 = vadd.f32 %v6878_v28, %v1985_v43  ;;  %v1986_v10 = vmax.f32 %v930_v47, %v1555_v4  ;;  %5464 = vmatprep.mubr.msk.bf16.mxu1 %vm664_vm0, %v6172_v37  ;;  %v932_v49 = vpop.f32.mrf.mxu0 }
 0x129   :  { %v2380_v12 = vmax.f32 %v2188_v46, 0.0  ;;  %v1557_v50 = vpop.f32.mrf.mxu1 }
 0x12a   :  { %v2381_v53 = vmax.f32 %v2189_v8, 0.0  ;;  %v1987_v56 = vmax.f32 %v932_v49, %v1557_v50  ;;  %v934_v59 = vpop.f32.mrf.mxu0  ;;  %v2190_v38 = vadd.f32 %v6871_v25, %v1986_v10  ;;  %v6180_v8 = vld [vmem:[%s9050_s0 + $0x230] ss:$8 sps:$4 sm:$0xff]   ;;  %v6184_v50 = vld [vmem:[%s9050_s0 + $0x244] ss:$8 sps:$4 sm:$0xff]  }
 0x12b   :  { %v2556_v57 = vmax.f32 %v2372_v11, %v2380_v12  ;;  %v1559_v60 = vpop.f32.mrf.mxu1 }
 0x12c   :  { %v2557_v61 = vmax.f32 %v2373_v52, %v2381_v53  ;;  %v1988_v63 = vmax.f32 %v934_v59, %v1559_v60  ;;  %v936_v13 = vpop.f32.mrf.mxu0  ;;  %v2191_v40 = vadd.f32 %v6878_v28, %v1987_v56  ;;  %v2382_v10 = vmax.f32 %v2190_v38, 0.0 }
 0x12d   :  { %v7074_v9 = vpack.c.bf16 %v2556_v57, %v2554_v41  ;;  %v1561_v0 = vpop.f32.mrf.mxu1 }
 0x12e   :  { %v1989_v16 = vmax.f32 %v936_v13, %v1561_v0  ;;  %v7079_v18 = vpack.c.bf16 %v2557_v61, %v2555_v5  ;;  %v940_v19 = vpop.f32.mrf.mxu0  ;;  %1179 = vmatmul.mubr.bf16.gmra.mxu0 %v6174_v55  ;;  %v2192_v47 = vadd.f32 %v6871_v25, %v1988_v63  ;;  %v2383_v52 = vmax.f32 %v2191_v40, 0.0  ;;  %v6186_v40 = vld [vmem:[%s9050_s0 + $0x240] ss:$8 sps:$4 sm:$0xff]  }
 0x12f   :  { %v1565_v20 = vpop.f32.mrf.mxu1  ;;  %1804 = vmatmul.mubr.bf16.gmra.mxu1 %v6174_v55  ;;  %5398 = vmatprep.mubr.msk.bf16.mxu0 %vm664_vm0, %v6175_v7 }
 0x130   :  { %v1990_v21 = vmax.f32 %v940_v19, %v1565_v20  ;;  %5465 = vmatprep.mubr.msk.bf16.mxu1 %vm664_vm0, %v6175_v7  ;;  %v942_v24 = vpop.f32.mrf.mxu0  ;;  %v2193_v53 = vadd.f32 %v6878_v28, %v1989_v16  ;;  %v2384_v63 = vmax.f32 %v2192_v47, 0.0 }
 0x131   :  { %v1567_v27 = vpop.f32.mrf.mxu1 }
 0x132   :  { %v1991_v29 = vmax.f32 %v942_v24, %v1567_v27  ;;  %v7083_v32 = vpop.f32.mrf.mxu0  ;;  %v2194_v7 = vadd.f32 %v6871_v25, %v1990_v21  ;;  %v2385_v16 = vmax.f32 %v2193_v53, 0.0 }
 0x133   :  { %v7085_v1 = vpop.f32.mrf.mxu1 }
 0x134   :  { %v1992_v33 = vmax.f32 %v7083_v32, %v7085_v1  ;;  %v7095_v36 = vpop.f32.mrf.mxu0  ;;  %v2195_v27 = vadd.f32 %v6878_v28, %v1991_v29 }
 0x135   :  { %v7097_v37 = vpop.f32.mrf.mxu1 }
 0x136   :  { %v1993_v23 = vmax.f32 %v7095_v36, %v7097_v37  ;;  %v950_v26 = vpop.f32.mrf.mxu0  ;;  %1189 = vmatmul.mubr.bf16.gmra.mxu0 %v6177_v2  ;;  %v2387_v47 = vmax.f32 %v2195_v27, 0.0 }
 0x137   :  { %v1575_v31 = vpop.f32.mrf.mxu1  ;;  %1814 = vmatmul.mubr.bf16.gmra.mxu1 %v6177_v2  ;;  %5399 = vmatprep.mubr.msk.bf16.mxu0 %vm664_vm0, %v6178_v35 }
 0x138   :  { %v1994_v39 = vmax.f32 %v950_v26, %v1575_v31  ;;  %5466 = vmatprep.mubr.msk.bf16.mxu1 %vm664_vm0, %v6178_v35  ;;  %v952_v41 = vpop.f32.mrf.mxu0  ;;  %v2386_v31 = vmax.f32 %v2194_v7, 0.0 }
 0x139   :  { %v1577_v42 = vpop.f32.mrf.mxu1 }
 0x13a   :  { %v2198_v43 = vadd.f32 %v6871_v25, %v1994_v39  ;;  %v1995_v46 = vmax.f32 %v952_v41, %v1577_v42  ;;  %v954_v4 = vpop.f32.mrf.mxu0 }
 0x13b   :  { %v1579_v5 = vpop.f32.mrf.mxu1 }
 0x13c   :  { %v2390_v11 = vmax.f32 %v2198_v43, 0.0  ;;  %v2199_v12 = vadd.f32 %v6878_v28, %v1995_v46  ;;  %v1996_v49 = vmax.f32 %v954_v4, %v1579_v5  ;;  %v956_v56 = vpop.f32.mrf.mxu0  ;;  %v6190_v46 = vld [vmem:[%s9050_s0 + $0x254] ss:$8 sps:$4 sm:$0xff]   ;;  %v2196_v4 = vadd.f32 %v6871_v25, %v1992_v33 }
 0x13d   :  { %v1581_v57 = vpop.f32.mrf.mxu1  ;;  %v2197_v5 = vadd.f32 %v6878_v28, %v1993_v23 }
 0x13e   :  { %v2558_v59 = vmax.f32 %v2382_v10, %v2390_v11  ;;  %v2391_v60 = vmax.f32 %v2199_v12, 0.0  ;;  %v2200_v55 = vadd.f32 %v6871_v25, %v1996_v49  ;;  %v1997_v61 = vmax.f32 %v956_v56, %v1581_v57  ;;  %v960_v13 = vpop.f32.mrf.mxu0  ;;  %1199 = vmatmul.mubr.bf16.gmra.mxu0 %v6180_v8 }
 0x13f   :  { %v1585_v0 = vpop.f32.mrf.mxu1  ;;  %1824 = vmatmul.mubr.bf16.gmra.mxu1 %v6180_v8  ;;  %5400 = vmatprep.mubr.msk.bf16.mxu0 %vm664_vm0, %v6184_v50  ;;  %v2388_v33 = vmax.f32 %v2196_v4, 0.0 }
 0x140   :  { %v2559_v17 = vmax.f32 %v2383_v52, %v2391_v60  ;;  %v2392_v19 = vmax.f32 %v2200_v55, 0.0  ;;  %v2201_v20 = vadd.f32 %v6878_v28, %v1997_v61  ;;  %v1998_v24 = vmax.f32 %v960_v13, %v1585_v0  ;;  %5467 = vmatprep.mubr.msk.bf16.mxu1 %vm664_vm0, %v6184_v50  ;;  %v962_v2 = vpop.f32.mrf.mxu0 }
 0x141   :  { %v1587_v35 = vpop.f32.mrf.mxu1  ;;  %v2389_v61 = vmax.f32 %v2197_v5, 0.0 }
 0x142   :  { %v2560_v36 = vmax.f32 %v2384_v63, %v2392_v19  ;;  %v2393_v21 = vmax.f32 %v2201_v20, 0.0  ;;  %v2202_v37 = vadd.f32 %v6871_v25, %v1998_v24  ;;  %v1999_v26 = vmax.f32 %v962_v2, %v1587_v35  ;;  %v964_v38 = vpop.f32.mrf.mxu0  ;;  %v6192_v19 = vld [vmem:[%s9050_s0 + $0x250] ss:$8 sps:$4 sm:$0xff]  }
 0x143   :  { %v1589_v39 = vpop.f32.mrf.mxu1 }
 0x144   :  { %v7125_v41 = vpack.c.bf16 %v2560_v36, %v2558_v59  ;;  %v2561_v42 = vmax.f32 %v2385_v16, %v2393_v21  ;;  %v2394_v43 = vmax.f32 %v2202_v37, 0.0  ;;  %v2203_v29 = vadd.f32 %v6878_v28, %v1999_v26  ;;  %v966_v10 = vpop.f32.mrf.mxu0  ;;  %v6193_v16 = vld [vmem:[%s9050_s0 + $0x264] ss:$8 sps:$4 sm:$0xff]  }
 0x145   :  { %v2000_v8 = vmax.f32 %v964_v38, %v1589_v39  ;;  %v1591_v11 = vpop.f32.mrf.mxu1 }
 0x146   :  { %9083 = vst [vmem:[#allocation2_spill] sm:$0xff] %v7125_v41  ;;  %v2562_v12 = vmax.f32 %v2386_v31, %v2394_v43  ;;  %v2395_v49 = vmax.f32 %v2203_v29, 0.0  ;;  %v2001_v50 = vmax.f32 %v966_v10, %v1591_v11  ;;  %v7136_v52 = vpack.c.bf16 %v2561_v42, %v2559_v17  ;;  %v970_v56 = vpop.f32.mrf.mxu0  ;;  %1209 = vmatmul.mubr.bf16.gmra.mxu0 %v6186_v40  ;;  %v6195_v29 = vld [vmem:[%s9050_s0 + $0x260] ss:$8 sps:$4 sm:$0xff]  }
 0x147   :  { %v2204_v53 = vadd.f32 %v6871_v25, %v2000_v8  ;;  %v1595_v57 = vpop.f32.mrf.mxu1  ;;  %1834 = vmatmul.mubr.bf16.gmra.mxu1 %v6186_v40  ;;  %5401 = vmatprep.mubr.msk.bf16.mxu0 %vm664_vm0, %v6190_v46 }
 0x148   :  { %9084 = vst [vmem:[#allocation3_spill] sm:$0xff] %v7136_v52  ;;  %v2563_v59 = vmax.f32 %v2387_v47, %v2395_v49  ;;  %v2205_v32 = vadd.f32 %v6878_v28, %v2001_v50  ;;  %v2002_v1 = vmax.f32 %v970_v56, %v1595_v57  ;;  %5468 = vmatprep.mubr.msk.bf16.mxu1 %vm664_vm0, %v6190_v46  ;;  %v972_v60 = vpop.f32.mrf.mxu0  ;;  %v6196_v47 = vld [vmem:[%s9050_s0 + $0x274] ss:$8 sps:$4 sm:$0xff]  }
 0x149   :  { %v2396_v23 = vmax.f32 %v2204_v53, 0.0  ;;  %v1597_v55 = vpop.f32.mrf.mxu1 }
 0x14a   :  { %v2397_v63 = vmax.f32 %v2205_v32, 0.0  ;;  %v2003_v7 = vmax.f32 %v972_v60, %v1597_v55  ;;  %v974_v0 = vpop.f32.mrf.mxu0 }
 0x14b   :  { %v2564_v13 = vmax.f32 %v2388_v33, %v2396_v23  ;;  %v1599_v17 = vpop.f32.mrf.mxu1 }
 0x14c   :  { %v2565_v20 = vmax.f32 %v2389_v61, %v2397_v63  ;;  %v2004_v24 = vmax.f32 %v974_v0, %v1599_v17  ;;  %v976_v2 = vpop.f32.mrf.mxu0  ;;  %v2207_v50 = vadd.f32 %v6878_v28, %v2003_v7  ;;  %v6202_v7 = vld [vmem:[%s9050_s0 + $0x284] ss:$8 sps:$4 sm:$0xff]  }
 0x14d   :  { %v7148_v27 = vpack.c.bf16 %v2564_v13, %v2562_v12  ;;  %v1601_v35 = vpop.f32.mrf.mxu1  ;;  %v2206_v12 = vadd.f32 %v6871_v25, %v2002_v1  ;;  %v6198_v1 = vld [vmem:[%s9050_s0 + $0x270] ss:$8 sps:$4 sm:$0xff]  }
 0x14e   :  { %v2005_v36 = vmax.f32 %v976_v2, %v1601_v35  ;;  %v7150_v21 = vpack.c.bf16 %v2565_v20, %v2563_v59  ;;  %v980_v37 = vpop.f32.mrf.mxu0  ;;  %1219 = vmatmul.mubr.bf16.gmra.mxu0 %v6192_v19  ;;  %v2208_v32 = vadd.f32 %v6871_v25, %v2004_v24  ;;  %v2399_v13 = vmax.f32 %v2207_v50, 0.0 }
 0x14f   :  { %9085 = vst [vmem:[#allocation4_spill] sm:$0xff] %v7148_v27  ;;  %v1605_v26 = vpop.f32.mrf.mxu1  ;;  %1844 = vmatmul.mubr.bf16.gmra.mxu1 %v6192_v19  ;;  %5402 = vmatprep.mubr.msk.bf16.mxu0 %vm664_vm0, %v6193_v16  ;;  %v2398_v60 = vmax.f32 %v2206_v12, 0.0 }
 0x150   :  { %9086 = vst [vmem:[#allocation5_spill] sm:$0xff] %v7150_v21  ;;  %v2006_v31 = vmax.f32 %v980_v37, %v1605_v26  ;;  %5469 = vmatprep.mubr.msk.bf16.mxu1 %vm664_vm0, %v6193_v16  ;;  %v982_v38 = vpop.f32.mrf.mxu0  ;;  %v2209_v0 = vadd.f32 %v6878_v28, %v2005_v36  ;;  %v2400_v35 = vmax.f32 %v2208_v32, 0.0 }
 0x151   :  { %v1607_v39 = vpop.f32.mrf.mxu1 }
 0x152   :  { %v2007_v40 = vmax.f32 %v982_v38, %v1607_v39  ;;  %v7154_v42 = vpop.f32.mrf.mxu0  ;;  %v2210_v37 = vadd.f32 %v6871_v25, %v2006_v31  ;;  %v2401_v36 = vmax.f32 %v2209_v0, 0.0 }
 0x153   :  { %v7156_v43 = vpop.f32.mrf.mxu1 }
 0x154   :  { %v2008_v46 = vmax.f32 %v7154_v42, %v7156_v43  ;;  %v7166_v4 = vpop.f32.mrf.mxu0 }
 0x155   :  { %v7168_v5 = vpop.f32.mrf.mxu1 }
 0x156   :  { %v2009_v8 = vmax.f32 %v7166_v4, %v7168_v5  ;;  %v990_v10 = vpop.f32.mrf.mxu0  ;;  %1229 = vmatmul.mubr.bf16.gmra.mxu0 %v6195_v29  ;;  %v2211_v5 = vadd.f32 %v6878_v28, %v2007_v40 }
 0x157   :  { %v1615_v11 = vpop.f32.mrf.mxu1  ;;  %1854 = vmatmul.mubr.bf16.gmra.mxu1 %v6195_v29  ;;  %5403 = vmatprep.mubr.msk.bf16.mxu0 %vm664_vm0, %v6196_v47 }
 0x158   :  { %v2010_v49 = vmax.f32 %v990_v10, %v1615_v11  ;;  %5470 = vmatprep.mubr.msk.bf16.mxu1 %vm664_vm0, %v6196_v47  ;;  %v992_v53 = vpop.f32.mrf.mxu0 }
 0x159   :  { %v1617_v56 = vpop.f32.mrf.mxu1 }
 0x15a   :  { %v2214_v57 = vadd.f32 %v6871_v25, %v2010_v49  ;;  %v2011_v59 = vmax.f32 %v992_v53, %v1617_v56  ;;  %v994_v33 = vpop.f32.mrf.mxu0  ;;  %v2402_v53 = vmax.f32 %v2210_v37, 0.0 }
 0x15b   :  { %v1619_v23 = vpop.f32.mrf.mxu1 }
 0x15c   :  { %v2406_v55 = vmax.f32 %v2214_v57, 0.0  ;;  %v2215_v61 = vadd.f32 %v6878_v28, %v2011_v59  ;;  %v2012_v63 = vmax.f32 %v994_v33, %v1619_v23  ;;  %v996_v17 = vpop.f32.mrf.mxu0  ;;  %v6204_v59 = vld [vmem:[%s9050_s0 + $0x280] ss:$8 sps:$4 sm:$0xff]  }
 0x15d   :  { %v1621_v19 = vpop.f32.mrf.mxu1 }
 0x15e   :  { %v2566_v20 = vmax.f32 %v2398_v60, %v2406_v55  ;;  %v2407_v24 = vmax.f32 %v2215_v61, 0.0  ;;  %v2216_v16 = vadd.f32 %v6871_v25, %v2012_v63  ;;  %v2013_v2 = vmax.f32 %v996_v17, %v1621_v19  ;;  %v1000_v26 = vpop.f32.mrf.mxu0  ;;  %1239 = vmatmul.mubr.bf16.gmra.mxu0 %v6198_v1 }
 0x15f   :  { %v1625_v38 = vpop.f32.mrf.mxu1  ;;  %1864 = vmatmul.mubr.bf16.gmra.mxu1 %v6198_v1  ;;  %5404 = vmatprep.mubr.msk.bf16.mxu0 %vm664_vm0, %v6202_v7  ;;  %v6208_v1 = vld [vmem:[%s9050_s0 + $0x294] ss:$8 sps:$4 sm:$0xff]   ;;  %v2403_v60 = vmax.f32 %v2211_v5, 0.0  ;;  %v2212_v55 = vadd.f32 %v6871_v25, %v2008_v46  ;;  %v2213_v61 = vadd.f32 %v6878_v28, %v2009_v8  ;;  %v6210_v5 = vld [vmem:[%s9050_s0 + $0x290] ss:$8 sps:$4 sm:$0xff]  }
 0x160   :  { %v2567_v39 = vmax.f32 %v2399_v13, %v2407_v24  ;;  %v2408_v29 = vmax.f32 %v2216_v16, 0.0  ;;  %v2217_v47 = vadd.f32 %v6878_v28, %v2013_v2  ;;  %v2014_v4 = vmax.f32 %v1000_v26, %v1625_v38  ;;  %5471 = vmatprep.mubr.msk.bf16.mxu1 %vm664_vm0, %v6202_v7  ;;  %v1002_v10 = vpop.f32.mrf.mxu0 }
 0x161   :  { %v1627_v11 = vpop.f32.mrf.mxu1  ;;  %v2404_v46 = vmax.f32 %v2212_v55, 0.0  ;;  %v2405_v38 = vmax.f32 %v2213_v61, 0.0  ;;  %v6213_v61 = vld [vmem:[%s9050_s0 + $0x2a0] ss:$8 sps:$4 sm:$0xff]  }
 0x162   :  { %v2568_v12 = vmax.f32 %v2400_v35, %v2408_v29  ;;  %v2409_v31 = vmax.f32 %v2217_v47, 0.0  ;;  %v2218_v49 = vadd.f32 %v6871_v25, %v2014_v4  ;;  %v2015_v50 = vmax.f32 %v1002_v10, %v1627_v11  ;;  %v1004_v56 = vpop.f32.mrf.mxu0 }
 0x163   :  { %v1629_v57 = vpop.f32.mrf.mxu1 }
 0x164   :  { %v7196_v32 = vpack.c.bf16 %v2568_v12, %v2566_v20  ;;  %v2569_v33 = vmax.f32 %v2401_v36, %v2409_v31  ;;  %v2410_v23 = vmax.f32 %v2218_v49, 0.0  ;;  %v2219_v40 = vadd.f32 %v6878_v28, %v2015_v50  ;;  %v1006_v7 = vpop.f32.mrf.mxu0  ;;  %v6211_v12 = vld [vmem:[%s9050_s0 + $0x2a4] ss:$8 sps:$4 sm:$0xff]  }
 0x165   :  { %v2016_v63 = vmax.f32 %v1004_v56, %v1629_v57  ;;  %v1631_v13 = vpop.f32.mrf.mxu1 }
 0x166   :  { %9087 = vst [vmem:[#allocation6_spill] sm:$0xff] %v7196_v32  ;;  %v2570_v0 = vmax.f32 %v2402_v53, %v2410_v23  ;;  %v2411_v17 = vmax.f32 %v2219_v40, 0.0  ;;  %v2017_v19 = vmax.f32 %v1006_v7, %v1631_v13  ;;  %v7207_v20 = vpack.c.bf16 %v2569_v33, %v2567_v39  ;;  %v1010_v16 = vpop.f32.mrf.mxu0  ;;  %1249 = vmatmul.mubr.bf16.gmra.mxu0 %v6204_v59  ;;  %v6214_v7 = vld [vmem:[%s9050_s0 + $0x2b4] ss:$8 sps:$4 sm:$0xff]  }
 0x167   :  { %v2220_v24 = vadd.f32 %v6871_v25, %v2016_v63  ;;  %v1635_v2 = vpop.f32.mrf.mxu1  ;;  %1874 = vmatmul.mubr.bf16.gmra.mxu1 %v6204_v59  ;;  %5405 = vmatprep.mubr.msk.bf16.mxu0 %vm664_vm0, %v6208_v1 }
 0x168   :  { %9088 = vst [vmem:[#allocation7_spill] sm:$0xff] %v7207_v20  ;;  %v2571_v35 = vmax.f32 %v2403_v60, %v2411_v17  ;;  %v2221_v42 = vadd.f32 %v6878_v28, %v2017_v19  ;;  %v2018_v43 = vmax.f32 %v1010_v16, %v1635_v2  ;;  %5472 = vmatprep.mubr.msk.bf16.mxu1 %vm664_vm0, %v6208_v1  ;;  %v1012_v37 = vpop.f32.mrf.mxu0  ;;  %v6273_v16 = vld [vmem:[%s9051_s4 + $0x2b4] ss:$8 sps:$4 sm:$0xff]  }
 0x169   :  { %v2412_v8 = vmax.f32 %v2220_v24, 0.0  ;;  %v1637_v26 = vpop.f32.mrf.mxu1  ;;  %3975 = vmatprep.subr.bf16.mxu1 %v6273_v16 }
 0x16a   :  { %v2413_v39 = vmax.f32 %v2221_v42, 0.0  ;;  %v2019_v29 = vmax.f32 %v1012_v37, %v1637_v26  ;;  %v1014_v4 = vpop.f32.mrf.mxu0  ;;  %v2222_v2 = vadd.f32 %v6871_v25, %v2018_v43  ;;  %v6216_v43 = vld [vmem:[%s9050_s0 + $0x2b0] ss:$8 sps:$4 sm:$0xff]  }
 0x16b   :  { %v2572_v47 = vmax.f32 %v2404_v46, %v2412_v8  ;;  %v1639_v36 = vpop.f32.mrf.mxu1 }
 0x16c   :  { %v2573_v10 = vmax.f32 %v2405_v38, %v2413_v39  ;;  %v2020_v11 = vmax.f32 %v1014_v4, %v1639_v36  ;;  %v1016_v49 = vpop.f32.mrf.mxu0  ;;  %v2223_v42 = vadd.f32 %v6878_v28, %v2019_v29  ;;  %v2414_v4 = vmax.f32 %v2222_v2, 0.0  ;;  %v6220_v29 = vld [vmem:[%s9050_s0 + $0x2c4] ss:$8 sps:$4 sm:$0xff]  }
 0x16d   :  { %v7219_v31 = vpack.c.bf16 %v2572_v47, %v2570_v0  ;;  %v1641_v50 = vpop.f32.mrf.mxu1 }
 0x16e   :  { %v2021_v53 = vmax.f32 %v1016_v49, %v1641_v50  ;;  %v7221_v56 = vpack.c.bf16 %v2573_v10, %v2571_v35  ;;  %v1020_v57 = vpop.f32.mrf.mxu0  ;;  %1259 = vmatmul.mubr.bf16.gmra.mxu0 %v6210_v5  ;;  %v2224_v38 = vadd.f32 %v6871_v25, %v2020_v11 }
 0x16f   :  { %9089 = vst [vmem:[#allocation8_spill] sm:$0xff] %v7219_v31  ;;  %v1645_v59 = vpop.f32.mrf.mxu1  ;;  %1884 = vmatmul.mubr.bf16.gmra.mxu1 %v6210_v5  ;;  %5406 = vmatprep.mubr.msk.bf16.mxu0 %vm664_vm0, %v6211_v12 }
 0x170   :  { %9090 = vst [vmem:[#allocation9_spill] sm:$0xff] %v7221_v56  ;;  %v2022_v33 = vmax.f32 %v1020_v57, %v1645_v59  ;;  %5473 = vmatprep.mubr.msk.bf16.mxu1 %vm664_vm0, %v6211_v12  ;;  %v1022_v23 = vpop.f32.mrf.mxu0  ;;  %v2415_v12 = vmax.f32 %v2223_v42, 0.0  ;;  %v2225_v49 = vadd.f32 %v6878_v28, %v2021_v53 }
 0x171   :  { %v1647_v40 = vpop.f32.mrf.mxu1 }
 0x172   :  { %v2023_v1 = vmax.f32 %v1022_v23, %v1647_v40  ;;  %v7225_v60 = vpop.f32.mrf.mxu0  ;;  %v2417_v53 = vmax.f32 %v2225_v49, 0.0 }
 0x173   :  { %v7227_v55 = vpop.f32.mrf.mxu1 }
 0x174   :  { %v2024_v63 = vmax.f32 %v7225_v60, %v7227_v55  ;;  %v7237_v13 = vpop.f32.mrf.mxu0 }
 0x175   :  { %v7239_v0 = vpop.f32.mrf.mxu1 }
 0x176   :  { %v2025_v17 = vmax.f32 %v7237_v13, %v7239_v0  ;;  %v1030_v19 = vpop.f32.mrf.mxu0  ;;  %1269 = vmatmul.mubr.bf16.gmra.mxu0 %v6213_v61 }
 0x177   :  { %v1655_v24 = vpop.f32.mrf.mxu1  ;;  %1894 = vmatmul.mubr.bf16.gmra.mxu1 %v6213_v61  ;;  %5407 = vmatprep.mubr.msk.bf16.mxu0 %vm664_vm0, %v6214_v7  ;;  %v2416_v61 = vmax.f32 %v2224_v38, 0.0 }
 0x178   :  { %v2026_v35 = vmax.f32 %v1030_v19, %v1655_v24  ;;  %5474 = vmatprep.mubr.msk.bf16.mxu1 %vm664_vm0, %v6214_v7  ;;  %v1032_v46 = vpop.f32.mrf.mxu0  ;;  %v2226_v7 = vadd.f32 %v6871_v25, %v2022_v33 }
 0x179   :  { %v1657_v8 = vpop.f32.mrf.mxu1 }
 0x17a   :  { %v2230_v37 = vadd.f32 %v6871_v25, %v2026_v35  ;;  %v2027_v26 = vmax.f32 %v1032_v46, %v1657_v8  ;;  %v1034_v39 = vpop.f32.mrf.mxu0  ;;  %v2227_v46 = vadd.f32 %v6878_v28, %v2023_v1 }
 0x17b   :  { %v1659_v47 = vpop.f32.mrf.mxu1 }
 0x17c   :  { %v2422_v36 = vmax.f32 %v2230_v37, 0.0  ;;  %v2231_v5 = vadd.f32 %v6878_v28, %v2027_v26  ;;  %v2028_v10 = vmax.f32 %v1034_v39, %v1659_v47  ;;  %v1036_v50 = vpop.f32.mrf.mxu0  ;;  %v2418_v47 = vmax.f32 %v2226_v7, 0.0 }
 0x17d   :  { %v1661_v11 = vpop.f32.mrf.mxu1  ;;  %v2419_v49 = vmax.f32 %v2227_v46, 0.0 }
 0x17e   :  { %v2574_v57 = vmax.f32 %v2414_v4, %v2422_v36  ;;  %v2423_v59 = vmax.f32 %v2231_v5, 0.0  ;;  %v2232_v23 = vadd.f32 %v6871_v25, %v2028_v10  ;;  %v2029_v40 = vmax.f32 %v1036_v50, %v1661_v11  ;;  %v1040_v19 = vpop.f32.mrf.mxu0  ;;  %1279 = vmatmul.mubr.bf16.gmra.mxu0 %v6216_v43  ;;  %v6222_v36 = vld [vmem:[%s9050_s0 + $0x2c0] ss:$8 sps:$4 sm:$0xff]  }
 0x17f   :  { %v1665_v24 = vpop.f32.mrf.mxu1  ;;  %1904 = vmatmul.mubr.bf16.gmra.mxu1 %v6216_v43  ;;  %5408 = vmatprep.mubr.msk.bf16.mxu0 %vm664_vm0, %v6220_v29  ;;  %v2228_v50 = vadd.f32 %v6871_v25, %v2024_v63  ;;  %v2229_v11 = vadd.f32 %v6878_v28, %v2025_v17 }
 0x180   :  { %v2575_v16 = vmax.f32 %v2415_v12, %v2423_v59  ;;  %v2424_v2 = vmax.f32 %v2232_v23, 0.0  ;;  %v2233_v35 = vadd.f32 %v6878_v28, %v2029_v40  ;;  %v2030_v42 = vmax.f32 %v1040_v19, %v1665_v24  ;;  %5475 = vmatprep.mubr.msk.bf16.mxu1 %vm664_vm0, %v6220_v29  ;;  %v1042_v8 = vpop.f32.mrf.mxu0  ;;  %v6226_v12 = vld [vmem:[%s9050_s0 + $0x2d4] ss:$8 sps:$4 sm:$0xff]  }
 0x181   :  { %v1667_v37 = vpop.f32.mrf.mxu1  ;;  %v2420_v0 = vmax.f32 %v2228_v50, 0.0 }
 0x182   :  { %v2576_v26 = vmax.f32 %v2416_v61, %v2424_v2  ;;  %v2425_v33 = vmax.f32 %v2233_v35, 0.0  ;;  %v2234_v38 = vadd.f32 %v6871_v25, %v2030_v42  ;;  %v2031_v39 = vmax.f32 %v1042_v8, %v1667_v37  ;;  %v1044_v43 = vpop.f32.mrf.mxu0 }
 0x183   :  { %v1669_v4 = vpop.f32.mrf.mxu1  ;;  %v2421_v42 = vmax.f32 %v2229_v11, 0.0 }
 0x184   :  { %v7270_v5 = vpack.c.bf16 %v2576_v26, %v2574_v57  ;;  %v2577_v10 = vmax.f32 %v2417_v53, %v2425_v33  ;;  %v2426_v29 = vmax.f32 %v2234_v38, 0.0  ;;  %v2235_v1 = vadd.f32 %v6878_v28, %v2031_v39  ;;  %v1046_v59 = vpop.f32.mrf.mxu0  ;;  %v6228_v33 = vld [vmem:[%s9050_s0 + $0x2d0] ss:$8 sps:$4 sm:$0xff]  }
 0x185   :  { %v2032_v57 = vmax.f32 %v1044_v43, %v1669_v4  ;;  %v1671_v23 = vpop.f32.mrf.mxu1 }
 0x186   :  { %9091 = vst [vmem:[#allocation10_spill] sm:$0xff] %v7270_v5  ;;  %v7284_v40 = vpack.c.bf16 %v2577_v10, %v2575_v16  ;;  %v2578_v61 = vmax.f32 %v2418_v47, %v2426_v29  ;;  %v2427_v7 = vmax.f32 %v2235_v1, 0.0  ;;  %v2033_v19 = vmax.f32 %v1046_v59, %v1671_v23  ;;  %v1050_v2 = vpop.f32.mrf.mxu0  ;;  %1289 = vmatmul.mubr.bf16.gmra.mxu0 %v6222_v36  ;;  %v6229_v47 = vld [vmem:[%s9050_s0 + $0x2e4] ss:$8 sps:$4 sm:$0xff]  }
 0x187   :  { %v2236_v24 = vadd.f32 %v6871_v25, %v2032_v57  ;;  %v1675_v60 = vpop.f32.mrf.mxu1  ;;  %1914 = vmatmul.mubr.bf16.gmra.mxu1 %v6222_v36  ;;  %5409 = vmatprep.mubr.msk.bf16.mxu0 %vm664_vm0, %v6226_v12 }
 0x188   :  { %9092 = vst [vmem:[#allocation11_spill] sm:$0xff] %v7284_v40  ;;  %v2579_v55 = vmax.f32 %v2419_v49, %v2427_v7  ;;  %v2237_v63 = vadd.f32 %v6878_v28, %v2033_v19  ;;  %v2034_v13 = vmax.f32 %v1050_v2, %v1675_v60  ;;  %5476 = vmatprep.mubr.msk.bf16.mxu1 %vm664_vm0, %v6226_v12  ;;  %v1052_v16 = vpop.f32.mrf.mxu0  ;;  %v6238_v19 = vld [vmem:[%s9050_s0 + $0x2f4] ss:$8 sps:$4 sm:$0xff]  }
 0x189   :  { %v2428_v17 = vmax.f32 %v2236_v24, 0.0  ;;  %v1677_v35 = vpop.f32.mrf.mxu1 }
 0x18a   :  { %v2429_v53 = vmax.f32 %v2237_v63, 0.0  ;;  %v2035_v46 = vmax.f32 %v1052_v16, %v1677_v35  ;;  %v1054_v37 = vpop.f32.mrf.mxu0 }
 0x18b   :  { %v2580_v8 = vmax.f32 %v2420_v0, %v2428_v17  ;;  %v1679_v26 = vpop.f32.mrf.mxu1 }
 0x18c   :  { %v2581_v38 = vmax.f32 %v2421_v42, %v2429_v53  ;;  %v2036_v39 = vmax.f32 %v1054_v37, %v1679_v26  ;;  %v1056_v4 = vpop.f32.mrf.mxu0 }
 0x18d   :  { %v7296_v43 = vpack.c.bf16 %v2580_v8, %v2578_v61  ;;  %v1681_v36 = vpop.f32.mrf.mxu1  ;;  %v6231_v61 = vld [vmem:[%s9050_s0 + $0x2e0] ss:$8 sps:$4 sm:$0xff]  }
 0x18e   :  { %v7298_v10 = vpack.c.bf16 %v2581_v38, %v2579_v55  ;;  %v2037_v29 = vmax.f32 %v1056_v4, %v1681_v36  ;;  %v1060_v1 = vpop.f32.mrf.mxu0  ;;  %1299 = vmatmul.mubr.bf16.gmra.mxu0 %v6228_v33  ;;  %v2238_v55 = vadd.f32 %v6871_v25, %v2034_v13  ;;  %v6240_v13 = vld [vmem:[%s9050_s0 + $0x2f0] ss:$8 sps:$4 sm:$0xff]   ;;  %v2239_v36 = vadd.f32 %v6878_v28, %v2035_v46 }
 0x18f   :  { %v1685_v12 = vpop.f32.mrf.mxu1  ;;  %1924 = vmatmul.mubr.bf16.gmra.mxu1 %v6228_v33  ;;  %5410 = vmatprep.mubr.msk.bf16.mxu0 %vm664_vm0, %v6229_v47  ;;  %v2240_v33 = vadd.f32 %v6871_v25, %v2036_v39 }
 0x190   :  { %9093 = vst [vmem:[#allocation12_spill] sm:$0xff] %v7298_v10  ;;  %v2038_v49 = vmax.f32 %v1060_v1, %v1685_v12  ;;  %5477 = vmatprep.mubr.msk.bf16.mxu1 %vm664_vm0, %v6229_v47  ;;  %v7302_v50 = vpop.f32.mrf.mxu0  ;;  %v2430_v8 = vmax.f32 %v2238_v55, 0.0  ;;  %v2241_v1 = vadd.f32 %v6878_v28, %v2037_v29  ;;  %v2431_v29 = vmax.f32 %v2239_v36, 0.0 }
 0x191   :  { %v7304_v11 = vpop.f32.mrf.mxu1 }
 0x192   :  { %v2039_v57 = vmax.f32 %v7302_v50, %v7304_v11  ;;  %v7308_v59 = vpop.f32.mrf.mxu0  ;;  %v2242_v55 = vadd.f32 %v6871_v25, %v2038_v49  ;;  %v2433_v49 = vmax.f32 %v2241_v1, 0.0 }
 0x193   :  { %v7310_v23 = vpop.f32.mrf.mxu1 }
 0x194   :  { %v2040_v7 = vmax.f32 %v7308_v59, %v7310_v23  ;;  %v7320_v24 = vpop.f32.mrf.mxu0  ;;  %v2243_v15 = vadd.f32 %v6878_v28, %v2039_v57 }
 0x195   :  { %v7322_v2 = vpop.f32.mrf.mxu1 }
 0x196   :  { %v2041_v60 = vmax.f32 %v7320_v24, %v7322_v2  ;;  %v1070_v63 = vpop.f32.mrf.mxu0  ;;  %1309 = vmatmul.mubr.bf16.gmra.mxu0 %v6231_v61  ;;  %v2435_v48 = vmax.f32 %v2243_v15, 0.0 }
 0x197   :  { %v1695_v0 = vpop.f32.mrf.mxu1  ;;  %1934 = vmatmul.mubr.bf16.gmra.mxu1 %v6231_v61  ;;  %5411 = vmatprep.mubr.msk.bf16.mxu0 %vm664_vm0, %v6238_v19 }
 0x198   :  { %v2042_v17 = vmax.f32 %v1070_v63, %v1695_v0  ;;  %5478 = vmatprep.mubr.msk.bf16.mxu1 %vm664_vm0, %v6238_v19  ;;  %v1072_v16 = vpop.f32.mrf.mxu0  ;;  %v2245_v50 = vadd.f32 %v6878_v28, %v2041_v60  ;;  %v6250_v60 = vld [vmem:[%s9051_s4 + $0x1e0] ss:$8 sps:$4 sm:$0xff]  }
 0x199   :  { %v1697_v35 = vpop.f32.mrf.mxu1 }
 0x19a   :  { %v2246_v42 = vadd.f32 %v6871_v25, %v2042_v17  ;;  %v2043_v53 = vmax.f32 %v1072_v16, %v1697_v35  ;;  %v1074_v37 = vpop.f32.mrf.mxu0  ;;  %v2432_v17 = vmax.f32 %v2240_v33, 0.0  ;;  %v2434_v33 = vmax.f32 %v2242_v55, 0.0  ;;  %v6247_v55 = vld [vmem:[%s9051_s4 + $0x1f0] ss:$8 sps:$4 sm:$0xff]  }
 0x19b   :  { %v1699_v26 = vpop.f32.mrf.mxu1 }
 0x19c   :  { %v2438_v38 = vmax.f32 %v2246_v42, 0.0  ;;  %v2247_v47 = vadd.f32 %v6878_v28, %v2043_v53  ;;  %v2044_v4 = vmax.f32 %v1074_v37, %v1699_v26  ;;  %v1076_v12 = vpop.f32.mrf.mxu0 }
 0x19d   :  { %v1701_v59 = vpop.f32.mrf.mxu1 }
 0x19e   :  { %v2582_v23 = vmax.f32 %v2430_v8, %v2438_v38  ;;  %v2248_v61 = vadd.f32 %v6871_v25, %v2044_v4  ;;  %v2045_v19 = vmax.f32 %v1076_v12, %v1701_v59  ;;  %v2439_v63 = vmax.f32 %v2247_v47, 0.0  ;;  %v1080_v0 = vpop.f32.mrf.mxu0  ;;  %1319 = vmatmul.mubr.bf16.gmra.mxu0 %v6240_v13 }
 0x19f   :  { %v1705_v39 = vpop.f32.mrf.mxu1  ;;  %1944 = vmatmul.mubr.bf16.gmra.mxu1 %v6240_v13  ;;  %5527 = vmatprep.mubr.msk.bf16.mxu0 %vm2855_vm2, %v7062_v45 }
 0x1a0   :  { %v2440_v16 = vmax.f32 %v2248_v61, 0.0  ;;  %v2249_v46 = vadd.f32 %v6878_v28, %v2045_v19  ;;  %v2046_v35 = vmax.f32 %v1080_v0, %v1705_v39  ;;  %5567 = vmatprep.mubr.msk.bf16.mxu1 %vm2855_vm2, %v2639_v34  ;;  %v1082_v42 = vpop.f32.mrf.mxu0  ;;  %v2583_v38 = vmax.f32 %v2431_v29, %v2439_v63  ;;  %v6252_v63 = vld [vmem:[%s9051_s4 + $0x1e4] ss:$8 sps:$4 sm:$0xff]  }
 0x1a1   :  { %v1707_v53 = vpop.f32.mrf.mxu1  ;;  %v2244_v34 = vadd.f32 %v6871_v25, %v2040_v7  ;;  %v6276_v0 = vld [vmem:[%s9051_s4 + $0x2a4] ss:$8 sps:$4 sm:$0xff]  }
 0x1a2   :  { %v2584_v8 = vmax.f32 %v2432_v17, %v2440_v16  ;;  %v2441_v37 = vmax.f32 %v2249_v46, 0.0  ;;  %v2250_v26 = vadd.f32 %v6871_v25, %v2046_v35  ;;  %v2047_v13 = vmax.f32 %v1082_v42, %v1707_v53  ;;  %v1084_v47 = vpop.f32.mrf.mxu0 }
 0x1a3   :  { %v1709_v4 = vpop.f32.mrf.mxu1  ;;  %v2436_v46 = vmax.f32 %v2244_v34, 0.0 }
 0x1a4   :  { %v7347_v12 = vpack.c.bf16 %v2584_v8, %v2582_v23  ;;  %v2585_v59 = vmax.f32 %v2433_v49, %v2441_v37  ;;  %v2442_v61 = vmax.f32 %v2250_v26, 0.0  ;;  %v2251_v62 = vadd.f32 %v6878_v28, %v2047_v13  ;;  %v1086_v1 = vpop.f32.mrf.mxu0  ;;  %v6271_v23 = vld [vmem:[%s9051_s4 + $0x2b0] ss:$8 sps:$4 sm:$0xff]   ;;  %v6282_v49 = vld [vmem:[%s9051_s4 + $0x294] ss:$8 sps:$4 sm:$0xff]  }
 0x1a5   :  { %v2048_v36 = vmax.f32 %v1084_v47, %v1709_v4  ;;  %v1711_v19 = vpop.f32.mrf.mxu1  ;;  %v6253_v47 = vld [vmem:[%s9051_s4 + $0x1d0] ss:$8 sps:$4 sm:$0xff]  }
 0x1a6   :  { %v7365_v11 = vpack.c.bf16 %v2585_v59, %v2583_v38  ;;  %v2586_v57 = vmax.f32 %v2434_v33, %v2442_v61  ;;  %v2049_v7 = vmax.f32 %v1086_v1, %v1711_v19  ;;  %v7374_v17 = vpop.f32.mrf.mxu0  ;;  %2937 = vmatmul.mubr.bf16.vlgmr.msra.gmra.mxu0 %v7048_v3  ;;  %v2443_v24 = vmax.f32 %v2251_v62, 0.0  ;;  %v6280_v4 = vld [vmem:[%s9051_s4 + $0x290] ss:$8 sps:$4 sm:$0xff]   ;;  %v6258_v61 = vld [vmem:[%s9051_s4 + $0x1c4] ss:$8 sps:$4 sm:$0xff]  }
 0x1a7   :  { %v2252_v39 = vadd.f32 %v6871_v25, %v2048_v36  ;;  %v7376_v16 = vpop.f32.mrf.mxu1  ;;  %3256 = vmatmul.mubr.bf16.vlgmr.msra.gmra.mxu1 %v2638_v14  ;;  %5528 = vmatprep.mubr.msk.bf16.mxu0 %vm2855_vm2, %v7079_v18  ;;  %v6255_v14 = vld [vmem:[%s9051_s4 + $0x1d4] ss:$8 sps:$4 sm:$0xff]   ;;  %v6285_v62 = vld [vmem:[%s9051_s4 + $0x284] ss:$8 sps:$4 sm:$0xff]   ;;  %v6256_v19 = vld [vmem:[%s9051_s4 + $0x1c0] ss:$8 sps:$4 sm:$0xff]  }
 0x1a8   :  { %v2253_v2 = vadd.f32 %v6878_v28, %v2049_v7  ;;  %5568 = vmatprep.mubr.msk.bf16.mxu1 %vm2855_vm2, %v2641_v58  ;;  %3568 = vmatpush1.bf16.msra.mxu0 %v6247_v55  ;;  %v7392_v54 = vpop.f32.mrf.mxu0  ;;  %v2437_v58 = vmax.f32 %v2245_v50, 0.0  ;;  %v2587_v37 = vmax.f32 %v2435_v48, %v2443_v24  ;;  %v6289_v7 = vld [vmem:[%s9051_s4 + $0x270] ss:$8 sps:$4 sm:$0xff]  }
 0x1a9   :  { %v2444_v35 = vmax.f32 %v2252_v39, 0.0  ;;  %v7394_v6 = vpop.f32.mrf.mxu1  ;;  %3976 = vmatpush1.bf16.msra.mxu1 %v6271_v23  ;;  %3569 = vmatprep.subr.bf16.mxu0 %v6252_v63  ;;  %v6264_v63 = vld [vmem:[%s9051_s4 + $0x1a4] ss:$8 sps:$4 sm:$0xff]  }
 0x1aa   :  { %v2445_v29 = vmax.f32 %v2253_v2, 0.0  ;;  %3977 = vmatprep.subr.bf16.mxu1 %v6276_v0  ;;  %v7405_v53 = vpop.f32.mrf.mxu0  ;;  %v6294_v0 = vld [vmem:[%s9051_s4 + $0x264] ss:$8 sps:$4 sm:$0xff]   ;;  %v2050_v2 = vmax.f32 %v7374_v17, %v7376_v16  ;;  %v6292_v17 = vld [vmem:[%s9051_s4 + $0x260] ss:$8 sps:$4 sm:$0xff]  }
 0x1ab   :  { %v2588_v42 = vmax.f32 %v2436_v46, %v2444_v35  ;;  %v7407_v8 = vpop.f32.mrf.mxu1 }
 0x1ac   :  { %v2589_v26 = vmax.f32 %v2437_v58, %v2445_v29  ;;  %v7411_v33 = vpop.f32.mrf.mxu0  ;;  %3570 = vmatpush1.bf16.msra.mxu0 %v6250_v60  ;;  %v2052_v60 = vmax.f32 %v7405_v53, %v7407_v8  ;;  %v2254_v29 = vadd.f32 %v6871_v25, %v2050_v2  ;;  %v6301_v2 = vld [vmem:[%s9051_s4 + $0x240] ss:$8 sps:$4 sm:$0xff]  }
 0x1ad   :  { %v7409_v13 = vpack.c.bf16 %v2588_v42, %v2586_v57  ;;  %v7413_v38 = vpop.f32.mrf.mxu1  ;;  %3978 = vmatpush1.bf16.msra.mxu1 %v6274_v22  ;;  %3571 = vmatprep.subr.bf16.mxu0 %v6255_v14  ;;  %v6259_v57 = vld [vmem:[%s9051_s4 + $0x1b0] ss:$8 sps:$4 sm:$0xff]   ;;  %v6297_v22 = vld [vmem:[%s9051_s4 + $0x254] ss:$8 sps:$4 sm:$0xff]  }
 0x1ae   :  { %v7421_v59 = vpack.c.bf16 %v2589_v26, %v2587_v37  ;;  %3979 = vmatprep.subr.bf16.mxu1 %v6282_v49  ;;  %v7429_v15 = vpop.f32.mrf.mxu0  ;;  %2947 = vmatmul.mubr.bf16.gmra.mxu0 %v7074_v9  ;;  %v2256_v49 = vadd.f32 %v6871_v25, %v2052_v60  ;;  %v6265_v37 = vld [vmem:[%s9051_s4 + $0x190] ss:$8 sps:$4 sm:$0xff]  }
 0x1af   :  { %v7431_v34 = vpop.f32.mrf.mxu1  ;;  %3266 = vmatmul.mubr.bf16.gmra.mxu1 %v2640_v51  ;;  %5529 = vmatprep.mubr.msk.bf16.mxu0 %vm2855_vm2, %v7136_v52  ;;  %v6291_v51 = vld [vmem:[%s9051_s4 + $0x274] ss:$8 sps:$4 sm:$0xff]   ;;  %v6295_v26 = vld [vmem:[%s9051_s4 + $0x250] ss:$8 sps:$4 sm:$0xff]  }
 0x1b0   :  { %5569 = vmatprep.mubr.msk.bf16.mxu1 %vm2855_vm2, %v7062_v45  ;;  %v7441_v36 = vpop.f32.mrf.mxu0  ;;  %3572 = vmatpush1.bf16.msra.mxu0 %v6253_v47 }
 0x1b1   :  { %v7443_v1 = vpop.f32.mrf.mxu1  ;;  %3980 = vmatpush1.bf16.msra.mxu1 %v6280_v4  ;;  %3573 = vmatprep.subr.bf16.mxu0 %v6258_v61  ;;  %v6270_v61 = vld [vmem:[%s9051_s4 + $0x184] ss:$8 sps:$4 sm:$0xff]  }
 0x1b2   :  { %3981 = vmatprep.subr.bf16.mxu1 %v6285_v62  ;;  %v7457_v45 = vpop.f32.mrf.mxu0  ;;  %v6303_v62 = vld [vmem:[%s9051_s4 + $0x244] ss:$8 sps:$4 sm:$0xff]  }
 0x1b3   :  { %v7459_v55 = vpop.f32.mrf.mxu1 }
 0x1b4   :  { %v7461_v23 = vpop.f32.mrf.mxu0  ;;  %3574 = vmatpush1.bf16.msra.mxu0 %v6256_v19 }
 0x1b5   :  { %v7463_v50 = vpop.f32.mrf.mxu1  ;;  %3982 = vmatpush1.bf16.msra.mxu1 %v6283_v30  ;;  %3575 = vmatprep.subr.bf16.mxu0 %v6261_v44  ;;  %v2446_v44 = vmax.f32 %v2254_v29, 0.0  ;;  %v6277_v29 = vld [vmem:[%s9051_s4 + $0x230] ss:$8 sps:$4 sm:$0xff]  }
 0x1b6   :  { %3983 = vmatprep.subr.bf16.mxu1 %v6291_v51  ;;  %v1110_v39 = vpop.f32.mrf.mxu0  ;;  %2957 = vmatmul.mubr.bf16.gmra.mxu0 %v7125_v41  ;;  %v2448_v51 = vmax.f32 %v2256_v49, 0.0  ;;  %v6304_v49 = vld [vmem:[%s9051_s4 + $0x2f0] ss:$8 sps:$4 sm:$0xff]  }
 0x1b7   :  { %v1735_v24 = vpop.f32.mrf.mxu1  ;;  %3276 = vmatmul.mubr.bf16.gmra.mxu1 %v7048_v3  ;;  %5530 = vmatprep.mubr.msk.bf16.mxu0 %vm2855_vm2, %v7150_v21  ;;  %v6262_v3 = vld [vmem:[%s9051_s4 + $0x1a0] ss:$8 sps:$4 sm:$0xff]  }
 0x1b8   :  { %v2058_v46 = vmax.f32 %v1110_v39, %v1735_v24  ;;  %5570 = vmatprep.mubr.msk.bf16.mxu1 %vm2855_vm2, %v7079_v18  ;;  %v7487_v35 = vpop.f32.mrf.mxu0  ;;  %3576 = vmatpush1.bf16.msra.mxu0 %v6259_v57  ;;  %v6267_v18 = vld [vmem:[%s9051_s4 + $0x194] ss:$8 sps:$4 sm:$0xff]  }
 0x1b9   :  { %v7489_v14 = vpop.f32.mrf.mxu1  ;;  %3984 = vmatpush1.bf16.msra.mxu1 %v6289_v7  ;;  %3577 = vmatprep.subr.bf16.mxu0 %v6264_v63  ;;  %v2054_v63 = vmax.f32 %v7429_v15, %v7431_v34  ;;  %v6279_v15 = vld [vmem:[%s9051_s4 + $0x234] ss:$8 sps:$4 sm:$0xff]  }
 0x1ba   :  { %v2262_v16 = vadd.f32 %v6871_v25, %v2058_v46  ;;  %3985 = vmatprep.subr.bf16.mxu1 %v6294_v0  ;;  %v1114_v48 = vpop.f32.mrf.mxu0  ;;  %v2056_v0 = vmax.f32 %v7457_v45, %v7459_v55  ;;  %v6306_v34 = vld [vmem:[%s9051_s4 + $0x2f4] ss:$8 sps:$4 sm:$0xff]  }
 0x1bb   :  { %v1739_v58 = vpop.f32.mrf.mxu1 }
 0x1bc   :  { %v2060_v42 = vmax.f32 %v1114_v48, %v1739_v58  ;;  %v7506_v53 = vpop.f32.mrf.mxu0  ;;  %3578 = vmatpush1.bf16.msra.mxu0 %v6262_v3  ;;  %v2454_v47 = vmax.f32 %v2262_v16, 0.0  ;;  %v2258_v16 = vadd.f32 %v6871_v25, %v2054_v63  ;;  %v6300_v63 = vld [vmem:[%s9051_s4 + $0x214] ss:$8 sps:$4 sm:$0xff]  }
 0x1bd   :  { %v7508_v8 = vpop.f32.mrf.mxu1  ;;  %3986 = vmatpush1.bf16.msra.mxu1 %v6292_v17  ;;  %3579 = vmatprep.subr.bf16.mxu0 %v6267_v18  ;;  %v2260_v18 = vadd.f32 %v6871_v25, %v2056_v0  ;;  %v6315_v0 = vld [vmem:[%s9051_s4 + $0x2d4] ss:$8 sps:$4 sm:$0xff]  }
 0x1be   :  { %v2264_v4 = vadd.f32 %v6871_v25, %v2060_v42  ;;  %3987 = vmatprep.subr.bf16.mxu1 %v6297_v22  ;;  %v1120_v19 = vpop.f32.mrf.mxu0  ;;  %2967 = vmatmul.mubr.bf16.gmra.mxu0 %v7148_v27  ;;  %v2590_v60 = vmax.f32 %v2446_v44, %v2454_v47  ;;  %v6288_v42 = vld [vmem:[%s9051_s4 + $0x224] ss:$8 sps:$4 sm:$0xff]  }
 0x1bf   :  { %v1745_v30 = vpop.f32.mrf.mxu1  ;;  %3286 = vmatmul.mubr.bf16.gmra.mxu1 %v7074_v9  ;;  %5531 = vmatprep.mubr.msk.bf16.mxu0 %vm2855_vm2, %v7207_v20  ;;  %v6268_v9 = vld [vmem:[%s9051_s4 + $0x180] ss:$8 sps:$4 sm:$0xff]  }
 0x1c0   :  { %v2456_v57 = vmax.f32 %v2264_v4, 0.0  ;;  %v2062_v7 = vmax.f32 %v1120_v19, %v1745_v30  ;;  %5571 = vmatprep.mubr.msk.bf16.mxu1 %vm2855_vm2, %v7136_v52  ;;  %v7533_v39 = vpop.f32.mrf.mxu0  ;;  %3580 = vmatpush1.bf16.msra.mxu0 %v6265_v37  ;;  %v6309_v37 = vld [vmem:[%s9051_s4 + $0x2e4] ss:$8 sps:$4 sm:$0xff]   ;;  %v2450_v19 = vmax.f32 %v2258_v16, 0.0  ;;  %v2452_v30 = vmax.f32 %v2260_v18, 0.0 }
 0x1c1   :  { %v7535_v24 = vpop.f32.mrf.mxu1  ;;  %3988 = vmatpush1.bf16.msra.mxu1 %v6295_v26  ;;  %3581 = vmatprep.subr.bf16.mxu0 %v6270_v61  ;;  %v6312_v16 = vld [vmem:[%s9051_s4 + $0x204] ss:$8 sps:$4 sm:$0xff]  }
 0x1c2   :  { %v2592_v46 = vmax.f32 %v2448_v51, %v2456_v57  ;;  %3989 = vmatprep.subr.bf16.mxu1 %v6303_v62  ;;  %v2266_v45 = vadd.f32 %v6871_v25, %v2062_v7  ;;  %v1124_v55 = vpop.f32.mrf.mxu0  ;;  %v6286_v62 = vld [vmem:[%s9051_s4 + $0x220] ss:$8 sps:$4 sm:$0xff]   ;;  %v6318_v18 = vld [vmem:[%s9051_s4 + $0x2c4] ss:$8 sps:$4 sm:$0xff]  }
 0x1c3   :  { %v1749_v3 = vpop.f32.mrf.mxu1  ;;  %v6307_v7 = vld [vmem:[%s9051_s4 + $0x2e0] ss:$8 sps:$4 sm:$0xff]  }
 0x1c4   :  { %v7550_v17 = vpack.c.bf16 %v2592_v46, %v2590_v60  ;;  %v2064_v22 = vmax.f32 %v1124_v55, %v1749_v3  ;;  %v7554_v48 = vpop.f32.mrf.mxu0  ;;  %3582 = vmatpush1.bf16.msra.mxu0 %v6268_v9  ;;  %v2458_v26 = vmax.f32 %v2266_v45, 0.0  ;;  %v6298_v55 = vld [vmem:[%s9051_s4 + $0x210] ss:$8 sps:$4 sm:$0xff]  }
 0x1c5   :  { %v7556_v58 = vpop.f32.mrf.mxu1  ;;  %3990 = vmatpush1.bf16.msra.mxu1 %v6301_v2  ;;  %3591 = vmatprep.subr.bf16.mxu0 %v6279_v15  ;;  %v6313_v3 = vld [vmem:[%s9051_s4 + $0x2d0] ss:$8 sps:$4 sm:$0xff]  }
 0x1c6   :  { %3999 = vmatprep.subr.bf16.mxu1 %v6306_v34  ;;  %v2268_v47 = vadd.f32 %v6871_v25, %v2064_v22  ;;  %v7571_v4 = vpop.f32.mrf.mxu0  ;;  %2977 = vmatmul.mubr.bf16.gmra.mxu0 %v7196_v32  ;;  %v2594_v9 = vmax.f32 %v2450_v19, %v2458_v26  ;;  %v6316_v26 = vld [vmem:[%s9051_s4 + $0x2c0] ss:$8 sps:$4 sm:$0xff]  }
 0x1c7   :  { %v7573_v61 = vpop.f32.mrf.mxu1  ;;  %3296 = vmatmul.mubr.bf16.gmra.mxu1 %v7125_v41  ;;  %5532 = vmatprep.mubr.msk.bf16.mxu0 %vm2855_vm2, %v7221_v56 }
 0x1c8   :  { %5572 = vmatprep.mubr.msk.bf16.mxu1 %vm2855_vm2, %v7150_v21  ;;  %v2460_v44 = vmax.f32 %v2268_v47, 0.0  ;;  %v7584_v51 = vpop.f32.mrf.mxu0  ;;  %3592 = vmatpush2.bf16.msra.mxu0 %v6277_v29  ;;  %v6321_v47 = vld [vmem:[%s9051_s4 + $0x374] ss:$8 sps:$4 sm:$0xff]  }
 0x1c9   :  { %v7586_v57 = vpop.f32.mrf.mxu1  ;;  %4000 = vmatpush2.bf16.msra.mxu1 %v6304_v49  ;;  %3593 = vmatprep.subr.bf16.mxu0 %v6288_v42 }
 0x1ca   :  { %4001 = vmatprep.subr.bf16.mxu1 %v6309_v37  ;;  %v2596_v2 = vmax.f32 %v2452_v30, %v2460_v44  ;;  %v7597_v60 = vpop.f32.mrf.mxu0  ;;  %v6310_v37 = vld [vmem:[%s9051_s4 + $0x200] ss:$8 sps:$4 sm:$0xff]  }
 0x1cb   :  { %v7599_v46 = vpop.f32.mrf.mxu1 }
 0x1cc   :  { %v7601_v15 = vpack.c.bf16 %v2596_v2, %v2594_v9  ;;  %v7603_v34 = vpop.f32.mrf.mxu0  ;;  %3594 = vmatpush2.bf16.msra.mxu0 %v6286_v62 }
 0x1cd   :  { %v7605_v45 = vpop.f32.mrf.mxu1  ;;  %4002 = vmatpush2.bf16.msra.mxu1 %v6307_v7  ;;  %3595 = vmatprep.subr.bf16.mxu0 %v6300_v63 }
 0x1ce   :  { %4003 = vmatprep.subr.bf16.mxu1 %v6315_v0  ;;  %v7619_v22 = vpop.f32.mrf.mxu0  ;;  %2987 = vmatmul.mubr.bf16.gmra.mxu0 %v7219_v31 }
 0x1cf   :  { %v7621_v29 = vpop.f32.mrf.mxu1  ;;  %3306 = vmatmul.mubr.bf16.gmra.mxu1 %v7148_v27  ;;  %5533 = vmatprep.mubr.msk.bf16.mxu0 %vm2855_vm2, %v7284_v40  ;;  %v2059_v27 = vmax.f32 %v7487_v35, %v7489_v14 }
 0x1d0   :  { %5573 = vmatprep.mubr.msk.bf16.mxu1 %vm2855_vm2, %v7207_v20  ;;  %v7629_v49 = vpop.f32.mrf.mxu0  ;;  %3596 = vmatpush2.bf16.msra.mxu0 %v6298_v55 }
 0x1d1   :  { %v7631_v42 = vpop.f32.mrf.mxu1  ;;  %4004 = vmatpush2.bf16.msra.mxu1 %v6313_v3  ;;  %3597 = vmatprep.subr.bf16.mxu0 %v6312_v16  ;;  %v2263_v35 = vadd.f32 %v6878_v28, %v2059_v27  ;;  %v2057_v27 = vmax.f32 %v7461_v23, %v7463_v50 }
 0x1d2   :  { %4005 = vmatprep.subr.bf16.mxu1 %v6318_v18  ;;  %v7642_v62 = vpop.f32.mrf.mxu0  ;;  %v2061_v18 = vmax.f32 %v7506_v53, %v7508_v8 }
 0x1d3   :  { %v7644_v19 = vpop.f32.mrf.mxu1  ;;  %v2455_v20 = vmax.f32 %v2263_v35, 0.0 }
 0x1d4   :  { %v7646_v30 = vpop.f32.mrf.mxu0  ;;  %3598 = vmatpush2.bf16.msra.mxu0 %v6310_v37 }
 0x1d5   :  { %v7648_v44 = vpop.f32.mrf.mxu1  ;;  %4006 = vmatpush2.bf16.msra.mxu1 %v6316_v26  ;;  %4383 = vmatprep.subr.bf16.mxu0 %v6321_v47  ;;  %v2053_v47 = vmax.f32 %v7411_v33, %v7413_v38 }
 0x1d6   :  { %v7650_v7 = vpop.f32.mrf.mxu0  ;;  %2997 = vmatmul.mubr.bf16.gmra.mxu0 %v7270_v5 }
 0x1d7   :  { %v7652_v63 = vpop.f32.mrf.mxu1  ;;  %3316 = vmatmul.mubr.bf16.gmra.mxu1 %v7196_v32  ;;  %5534 = vmatprep.mubr.msk.bf16.mxu0 %vm2855_vm2, %v7298_v10  ;;  %v2257_v38 = vadd.f32 %v6878_v28, %v2053_v47 }
 0x1d8   :  { %5574 = vmatprep.mubr.msk.bf16.mxu1 %vm2855_vm2, %v7221_v56  ;;  %v7660_v0 = vpop.f32.mrf.mxu0  ;;  %v2051_v56 = vmax.f32 %v7392_v54, %v7394_v6  ;;  %v2065_v54 = vmax.f32 %v7554_v48, %v7556_v58 }
 0x1d9   :  { %v7662_v9 = vpop.f32.mrf.mxu1  ;;  %v2449_v47 = vmax.f32 %v2257_v38, 0.0  ;;  %v2055_v38 = vmax.f32 %v7441_v36, %v7443_v1 }
 0x1da   :  { %v7664_v2 = vpop.f32.mrf.mxu0  ;;  %v2255_v32 = vadd.f32 %v6878_v28, %v2051_v56  ;;  %v2063_v56 = vmax.f32 %v7533_v39, %v7535_v24  ;;  %v2269_v23 = vadd.f32 %v6878_v28, %v2065_v54  ;;  %v2261_v24 = vadd.f32 %v6878_v28, %v2057_v27 }
 0x1db   :  { %v7666_v55 = vpop.f32.mrf.mxu1  ;;  %v2069_v27 = vmax.f32 %v7603_v34, %v7605_v45 }
 0x1dc   :  { %v7668_v3 = vpop.f32.mrf.mxu0  ;;  %v2447_v58 = vmax.f32 %v2255_v32, 0.0  ;;  %v2259_v32 = vadd.f32 %v6878_v28, %v2055_v38 }
 0x1dd   :  { %v7670_v16 = vpop.f32.mrf.mxu1  ;;  %v2273_v38 = vadd.f32 %v6878_v28, %v2069_v27 }
 0x1de   :  { %v7674_v37 = vpop.f32.mrf.mxu0  ;;  %3007 = vmatmul.mubr.bf16.gmra.mxu0 %v7296_v43  ;;  %v2591_v35 = vmax.f32 %v2447_v58, %v2455_v20  ;;  %v2077_v36 = vmax.f32 %v7668_v3, %v7670_v16  ;;  %v2453_v20 = vmax.f32 %v2261_v24, 0.0  ;;  %v2076_v24 = vmax.f32 %v7664_v2, %v7666_v55 }
 0x1df   :  { %v7676_v26 = vpop.f32.mrf.mxu1  ;;  %3326 = vmatmul.mubr.bf16.gmra.mxu1 %v7219_v31  ;;  %5535 = vmatprep.mubr.msk.bf16.mxu0 %vm2855_vm2, %v7365_v11  ;;  %v2265_v31 = vadd.f32 %v6878_v28, %v2061_v18  ;;  %v2465_v55 = vmax.f32 %v2273_v38, 0.0 }
 0x1e0   :  { %5575 = vmatprep.mubr.msk.bf16.mxu1 %vm2855_vm2, %v7284_v40  ;;  %v7688_v53 = vpop.f32.mrf.mxu0  ;;  %v2281_v34 = vadd.f32 %v6878_v28, %v2077_v36 }
 0x1e1   :  { %v7690_v8 = vpop.f32.mrf.mxu1  ;;  %v2457_v41 = vmax.f32 %v2265_v31, 0.0 }
 0x1e2   :  { %v7695_v21 = vpop.f32.mrf.mxu0 }
 0x1e3   :  { %v7697_v33 = vpop.f32.mrf.mxu1 }
 0x1e4   :  { %v7701_v14 = vpop.f32.mrf.mxu0 }
 0x1e5   :  { %v7703_v40 = vpop.f32.mrf.mxu1 }
 0x1e6   :  { %v7708_v6 = vpop.f32.mrf.mxu0  ;;  %3017 = vmatmul.mubr.bf16.gmra.mxu0 %v7347_v12  ;;  %v2081_v36 = vmax.f32 %v7701_v14, %v7703_v40  ;;  %v2079_v40 = vmax.f32 %v7688_v53, %v7690_v8 }
 0x1e7   :  { %9094 = vst [vmem:[#allocation13_spill] sm:$0xff] %v7708_v6  ;;  %v7710_v18 = vpop.f32.mrf.mxu1  ;;  %3336 = vmatmul.mubr.bf16.gmra.mxu1 %v7270_v5  ;;  %5536 = vmatprep.mubr.msk.bf16.mxu0 %vm2855_vm2, %v7421_v59  ;;  %v2593_v5 = vmax.f32 %v2449_v47, %v2457_v41  ;;  %v2461_v41 = vmax.f32 %v2269_v23, 0.0 }
 0x1e8   :  { %9095 = vst [vmem:[#allocation14_spill] sm:$0xff] %v7710_v18  ;;  %5576 = vmatprep.mubr.msk.bf16.mxu1 %vm2855_vm2, %v7298_v10  ;;  %v7722_v31 = vpop.f32.mrf.mxu0  ;;  %v2267_v10 = vadd.f32 %v6878_v28, %v2063_v56  ;;  %v2451_v56 = vmax.f32 %v2259_v32, 0.0  ;;  %v2285_v53 = vadd.f32 %v6878_v28, %v2081_v36  ;;  %v2072_v36 = vmax.f32 %v7642_v62, %v7644_v19 }
 0x1e9   :  { %v7724_v48 = vpop.f32.mrf.mxu1  ;;  %v7740_v18 = vpack.c.bf16 %v2593_v5, %v2591_v35  ;;  %v2075_v5 = vmax.f32 %v7660_v0, %v7662_v9  ;;  %v2597_v58 = vmax.f32 %v2453_v20, %v2461_v41  ;;  %v2068_v20 = vmax.f32 %v7597_v60, %v7599_v46 }
 0x1ea   :  { %v7729_v50 = vpop.f32.mrf.mxu0  ;;  %v2459_v47 = vmax.f32 %v2267_v10, 0.0  ;;  %v2067_v10 = vmax.f32 %v7584_v51, %v7586_v57  ;;  %v2473_v57 = vmax.f32 %v2281_v34, 0.0  ;;  %v2066_v60 = vmax.f32 %v7571_v4, %v7573_v61 }
 0x1eb   :  { %v7731_v39 = vpop.f32.mrf.mxu1  ;;  %v2279_v23 = vadd.f32 %v6878_v28, %v2075_v5  ;;  %v2073_v5 = vmax.f32 %v7646_v30, %v7648_v44  ;;  %v2071_v46 = vmax.f32 %v7629_v49, %v7631_v42  ;;  %v2272_v8 = vadd.f32 %v6871_v25, %v2068_v20 }
 0x1ec   :  { %v7735_v52 = vpop.f32.mrf.mxu0  ;;  %v2595_v9 = vmax.f32 %v2451_v56, %v2459_v47  ;;  %v2271_v51 = vadd.f32 %v6878_v28, %v2067_v10  ;;  %v2074_v47 = vmax.f32 %v7650_v7, %v7652_v63  ;;  %v2280_v7 = vadd.f32 %v6871_v25, %v2076_v24 }
 0x1ed   :  { %v7737_v6 = vpop.f32.mrf.mxu1  ;;  %v2471_v56 = vmax.f32 %v2279_v23, 0.0  ;;  %v2601_v14 = vmax.f32 %v2465_v55, %v2473_v57  ;;  %v2070_v4 = vmax.f32 %v7619_v22, %v7621_v29  ;;  %v2277_v61 = vadd.f32 %v6878_v28, %v2073_v5 }
 0x1ee   :  { %v7744_v1 = vpop.f32.mrf.mxu0  ;;  %3027 = vmatmul.mubr.bf16.gmra.mxu0 %v7409_v13  ;;  %v7777_v41 = vpack.c.bf16 %v2597_v58, %v2595_v9  ;;  %v2463_v44 = vmax.f32 %v2271_v51, 0.0  ;;  %v2278_v58 = vadd.f32 %v6871_v25, %v2074_v47  ;;  %v2283_v42 = vadd.f32 %v6878_v28, %v2079_v40 }
 0x1ef   :  { %v7746_v54 = vpop.f32.mrf.mxu1  ;;  %3346 = vmatmul.mubr.bf16.gmra.mxu1 %v7296_v43  ;;  %5537 = vmatprep.mubr.msk.bf16.mxu0 %vm2855_vm2, %v7740_v18  ;;  %v2270_v9 = vadd.f32 %v6871_v25, %v2066_v60  ;;  %v2275_v38 = vadd.f32 %v6878_v28, %v2071_v46  ;;  %v2472_v23 = vmax.f32 %v2280_v7, 0.0  ;;  %v2080_v24 = vmax.f32 %v7695_v21, %v7697_v33 }
 0x1f0   :  { %5577 = vmatprep.mubr.msk.bf16.mxu1 %vm2855_vm2, %v7365_v11  ;;  %v7758_v3 = vpop.f32.mrf.mxu0  ;;  %v2599_v49 = vmax.f32 %v2463_v44, %v2471_v56  ;;  %v2477_v22 = vmax.f32 %v2285_v53, 0.0  ;;  %v2464_v47 = vmax.f32 %v2272_v8, 0.0  ;;  %v2470_v55 = vmax.f32 %v2278_v58, 0.0 }
 0x1f1   :  { %v7760_v16 = vpop.f32.mrf.mxu1  ;;  %v2078_v5 = vmax.f32 %v7674_v37, %v7676_v26  ;;  %v2085_v56 = vmax.f32 %v7735_v52, %v7737_v6  ;;  %v2274_v62 = vadd.f32 %v6871_v25, %v2070_v4  ;;  %v2469_v19 = vmax.f32 %v2277_v61, 0.0 }
 0x1f2   :  { %v7765_v45 = vpop.f32.mrf.mxu0  ;;  %v7822_v20 = vpack.c.bf16 %v2601_v14, %v2599_v49  ;;  %v2475_v33 = vmax.f32 %v2283_v42, 0.0  ;;  %v2462_v52 = vmax.f32 %v2270_v9, 0.0  ;;  %v2600_v37 = vmax.f32 %v2464_v47, %v2472_v23 }
 0x1f3   :  { %v7767_v0 = vpop.f32.mrf.mxu1  ;;  %v2284_v26 = vadd.f32 %v6871_v25, %v2080_v24  ;;  %v2083_v6 = vmax.f32 %v7722_v31, %v7724_v48  ;;  %v2467_v44 = vmax.f32 %v2275_v38, 0.0  ;;  %v2276_v14 = vadd.f32 %v6871_v25, %v2072_v36 }
 0x1f4   :  { %v7773_v35 = vpop.f32.mrf.mxu0  ;;  %v2605_v53 = vmax.f32 %v2469_v19, %v2477_v22  ;;  %v2282_v8 = vadd.f32 %v6871_v25, %v2078_v5  ;;  %v2289_v58 = vadd.f32 %v6878_v28, %v2085_v56  ;;  %v2466_v49 = vmax.f32 %v2274_v62, 0.0 }
 0x1f5   :  { %v7775_v32 = vpop.f32.mrf.mxu1  ;;  %v2603_v42 = vmax.f32 %v2467_v44, %v2475_v33  ;;  %v2476_v9 = vmax.f32 %v2284_v26, 0.0  ;;  %v2287_v38 = vadd.f32 %v6878_v28, %v2083_v6 }
 0x1f6   :  { %v7786_v27 = vpop.f32.mrf.mxu0  ;;  %3037 = vmatmul.mubr.bf16.gmra.mxu0 %v7550_v17  ;;  %v2474_v47 = vmax.f32 %v2282_v8, 0.0  ;;  %v2481_v5 = vmax.f32 %v2289_v58, 0.0 }
 0x1f7   :  { %v7788_v2 = vpop.f32.mrf.mxu1  ;;  %3356 = vmatmul.mubr.bf16.gmra.mxu1 %v7347_v12  ;;  %5538 = vmatprep.mubr.msk.bf16.mxu0 %vm2855_vm2, %v7777_v41  ;;  %v7856_v36 = vpack.c.bf16 %v2605_v53, %v2603_v42 }
 0x1f8   :  { %5578 = vmatprep.mubr.msk.bf16.mxu1 %vm2855_vm2, %v7421_v59  ;;  %v1192_v63 = vpop.f32.mrf.mxu0  ;;  %v2090_v56 = vmax.f32 %v7786_v27, %v7788_v2  ;;  %v9096_v27 = vld [vmem:[#allocation14_spill] sm:$0xff]  ;;  %v9097_v2 = vld [vmem:[#allocation13_spill] sm:$0xff]  ;;  %v2602_v44 = vmax.f32 %v2466_v49, %v2474_v47  ;;  %v2088_v47 = vmax.f32 %v7765_v45, %v7767_v0  ;;  %v2086_v0 = vmax.f32 %v7744_v1, %v7746_v54 }
 0x1f9   :  { %v1817_v30 = vpop.f32.mrf.mxu1 }
 0x1fa   :  { %v7808_v10 = vpop.f32.mrf.mxu0  ;;  %v2091_v60 = vmax.f32 %v1192_v63, %v1817_v30  ;;  %v2598_v30 = vmax.f32 %v2462_v52, %v2470_v55  ;;  %v2084_v55 = vmax.f32 %v7729_v50, %v7731_v39  ;;  %v2479_v52 = vmax.f32 %v2287_v38, 0.0 }
 0x1fb   :  { %v7810_v34 = vpop.f32.mrf.mxu1  ;;  %v2294_v53 = vadd.f32 %v6871_v25, %v2090_v56 }
 0x1fc   :  { %v1196_v51 = vpop.f32.mrf.mxu0  ;;  %v2295_v31 = vadd.f32 %v6878_v28, %v2091_v60  ;;  %v7851_v48 = vpack.c.bf16 %v2600_v37, %v2598_v30  ;;  %v2092_v23 = vmax.f32 %v7808_v10, %v7810_v34  ;;  %v2089_v10 = vmax.f32 %v7773_v35, %v7775_v32 }
 0x1fd   :  { %v1821_v57 = vpop.f32.mrf.mxu1  ;;  %v2082_v60 = vmax.f32 %v9097_v2, %v9096_v27  ;;  %v2087_v32 = vmax.f32 %v7758_v3, %v7760_v16 }
 0x1fe   :  { %v2093_v29 = vmax.f32 %v1196_v51, %v1821_v57  ;;  %v7828_v40 = vpop.f32.mrf.mxu0  ;;  %3047 = vmatmul.mubr.bf16.gmra.mxu0 %v7601_v15  ;;  %v2468_v57 = vmax.f32 %v2276_v14, 0.0  ;;  %v2487_v34 = vmax.f32 %v2295_v31, 0.0  ;;  %v2296_v37 = vadd.f32 %v6871_v25, %v2092_v23 }
 0x1ff   :  { %v7830_v21 = vpop.f32.mrf.mxu1  ;;  %3366 = vmatmul.mubr.bf16.gmra.mxu1 %v7409_v13  ;;  %5539 = vmatprep.mubr.msk.bf16.mxu0 %vm2855_vm2, %v7822_v20  ;;  %v2288_v14 = vadd.f32 %v6871_v25, %v2084_v55  ;;  %v2293_v8 = vadd.f32 %v6878_v28, %v2089_v10  ;;  %v2286_v49 = vadd.f32 %v6871_v25, %v2082_v60  ;;  %v2486_v55 = vmax.f32 %v2294_v53, 0.0 }
 0x200   :  { %5579 = vmatprep.mubr.msk.bf16.mxu1 %vm2855_vm2, %v7740_v18  ;;  %v1202_v46 = vpop.f32.mrf.mxu0  ;;  %v2297_v63 = vadd.f32 %v6878_v28, %v2093_v29  ;;  %v2604_v39 = vmax.f32 %v2468_v57, %v2476_v9  ;;  %v2607_v58 = vmax.f32 %v2479_v52, %v2487_v34  ;;  %v2488_v31 = vmax.f32 %v2296_v37, 0.0 }
 0x201   :  { %v1827_v7 = vpop.f32.mrf.mxu1  ;;  %v2485_v56 = vmax.f32 %v2293_v8, 0.0  ;;  %v2478_v45 = vmax.f32 %v2286_v49, 0.0  ;;  %v2292_v52 = vadd.f32 %v6871_v25, %v2088_v47 }
 0x202   :  { %v7846_v4 = vpop.f32.mrf.mxu0  ;;  %v2489_v22 = vmax.f32 %v2297_v63, 0.0  ;;  %v2095_v33 = vmax.f32 %v1202_v46, %v1827_v7  ;;  %v7898_v42 = vpack.c.bf16 %v2604_v39, %v2602_v44  ;;  %v2290_v44 = vadd.f32 %v6871_v25, %v2086_v0 }
 0x203   :  { %v7848_v61 = vpop.f32.mrf.mxu1  ;;  %v2606_v37 = vmax.f32 %v2478_v45, %v2486_v55 }
 0x204   :  { %v1206_v24 = vpop.f32.mrf.mxu0  ;;  %v2609_v6 = vmax.f32 %v2481_v5, %v2489_v22  ;;  %v2299_v3 = vadd.f32 %v6878_v28, %v2095_v33  ;;  %v2096_v9 = vmax.f32 %v7846_v4, %v7848_v61  ;;  %v2094_v4 = vmax.f32 %v7828_v40, %v7830_v21 }
 0x205   :  { %v1831_v51 = vpop.f32.mrf.mxu1  ;;  %v2482_v55 = vmax.f32 %v2290_v44, 0.0 }
 0x206   :  { %v2097_v29 = vmax.f32 %v1206_v24, %v1831_v51  ;;  %v7862_v62 = vpop.f32.mrf.mxu0  ;;  %3057 = vmatmul.mubr.bf16.gmra.mxu0 %v7851_v48  ;;  %v2291_v24 = vadd.f32 %v6878_v28, %v2087_v32  ;;  %v7910_v22 = vpack.c.bf16 %v2609_v6, %v2607_v58  ;;  %v2491_v10 = vmax.f32 %v2299_v3, 0.0 }
 0x207   :  { %v7864_v19 = vpop.f32.mrf.mxu1  ;;  %3376 = vmatmul.mubr.bf16.gmra.mxu1 %v7550_v17  ;;  %5540 = vmatprep.mubr.msk.bf16.mxu0 %vm2855_vm2, %v7856_v36  ;;  %v2300_v21 = vadd.f32 %v6871_v25, %v2096_v9  ;;  %v2298_v32 = vadd.f32 %v6871_v25, %v2094_v4 }
 0x208   :  { %v2098_v50 = vmax.f32 %v7862_v62, %v7864_v19  ;;  %5580 = vmatprep.mubr.msk.bf16.mxu1 %vm2855_vm2, %v7777_v41  ;;  %v7879_v26 = vpop.f32.mrf.mxu0  ;;  %v2301_v46 = vadd.f32 %v6878_v28, %v2097_v29  ;;  %v2480_v29 = vmax.f32 %v2288_v14, 0.0  ;;  %v2483_v27 = vmax.f32 %v2291_v24, 0.0 }
 0x209   :  { %v7881_v35 = vpop.f32.mrf.mxu1  ;;  %v2492_v53 = vmax.f32 %v2300_v21, 0.0  ;;  %v2490_v9 = vmax.f32 %v2298_v32, 0.0 }
 0x20a   :  { %v2099_v7 = vmax.f32 %v7879_v26, %v7881_v35  ;;  %v7890_v63 = vpop.f32.mrf.mxu0  ;;  %v2493_v51 = vmax.f32 %v2301_v46, 0.0  ;;  %v2608_v40 = vmax.f32 %v2480_v29, %v2488_v31  ;;  %v2611_v54 = vmax.f32 %v2483_v27, %v2491_v10 }
 0x20b   :  { %v7892_v30 = vpop.f32.mrf.mxu1  ;;  %v2484_v31 = vmax.f32 %v2292_v52, 0.0  ;;  %v2302_v29 = vadd.f32 %v6871_v25, %v2098_v50  ;;  %v2610_v50 = vmax.f32 %v2482_v55, %v2490_v9  ;;  %v9099_v9 = vld [vmem:[#allocation7_spill] sm:$0xff] }
 0x20c   :  { %v2100_v16 = vmax.f32 %v7890_v63, %v7892_v30  ;;  %v7903_v38 = vpop.f32.mrf.mxu0  ;;  %v2613_v2 = vmax.f32 %v2485_v56, %v2493_v51  ;;  %v7946_v14 = vpack.c.bf16 %v2608_v40, %v2606_v37 }
 0x20d   :  { %v7905_v23 = vpop.f32.mrf.mxu1  ;;  %v2612_v4 = vmax.f32 %v2484_v31, %v2492_v53  ;;  %v2494_v40 = vmax.f32 %v2302_v29, 0.0  ;;  %v9098_v31 = vld [vmem:[#allocation3_spill] sm:$0xff] }
 0x20e   :  { %v2101_v57 = vmax.f32 %v7903_v38, %v7905_v23  ;;  %v7916_v61 = vpop.f32.mrf.mxu0  ;;  %3067 = vmatmul.mubr.bf16.gmra.mxu0 %v7898_v42  ;;  %v7954_v49 = vpack.c.bf16 %v2613_v2, %v2611_v54  ;;  %v2304_v10 = vadd.f32 %v6871_v25, %v2100_v16 }
 0x20f   :  { %v7918_v5 = vpop.f32.mrf.mxu1  ;;  %3386 = vmatmul.mubr.bf16.gmra.mxu1 %v7601_v15  ;;  %5541 = vmatprep.mubr.msk.bf16.mxu0 %vm2855_vm2, %v7910_v22  ;;  %v7976_v35 = vpack.c.bf16 %v2612_v4, %v2610_v50 }
 0x210   :  { %v2102_v34 = vmax.f32 %v7916_v61, %v7918_v5  ;;  %5581 = vmatprep.mubr.msk.bf16.mxu1 %vm2855_vm2, %v7822_v20  ;;  %v7931_v33 = vpop.f32.mrf.mxu0  ;;  %v2303_v61 = vadd.f32 %v6878_v28, %v2099_v7  ;;  %v2496_v37 = vmax.f32 %v2304_v10, 0.0 }
 0x211   :  { %v7933_v39 = vpop.f32.mrf.mxu1 }
 0x212   :  { %v2103_v60 = vmax.f32 %v7931_v33, %v7933_v39  ;;  %v7939_v6 = vpop.f32.mrf.mxu0  ;;  %v2495_v7 = vmax.f32 %v2303_v61, 0.0  ;;  %v2305_v39 = vadd.f32 %v6878_v28, %v2101_v57  ;;  %v2306_v32 = vadd.f32 %v6871_v25, %v2102_v34 }
 0x213   :  { %v7941_v1 = vpop.f32.mrf.mxu1 }
 0x214   :  { %v2104_v46 = vmax.f32 %v7939_v6, %v7941_v1  ;;  %v7948_v8 = vpop.f32.mrf.mxu0  ;;  %v2307_v34 = vadd.f32 %v6878_v28, %v2103_v60  ;;  %v6324_v6 = vld [vmem:[%s9051_s4 + $0x364] ss:$8 sps:$4 sm:$0xff]  }
 0x215   :  { %v7950_v58 = vpop.f32.mrf.mxu1 }
 0x216   :  { %v2105_v3 = vmax.f32 %v7948_v8, %v7950_v58  ;;  %v1230_v24 = vpop.f32.mrf.mxu0  ;;  %3077 = vmatmul.mubr.bf16.gmra.mxu0 %v7946_v14  ;;  %v2308_v60 = vadd.f32 %v6871_v25, %v2104_v46 }
 0x217   :  { %v1855_v51 = vpop.f32.mrf.mxu1  ;;  %3396 = vmatmul.mubr.bf16.gmra.mxu1 %v7851_v48  ;;  %5542 = vmatprep.mubr.msk.bf16.mxu0 %vm2855_vm2, %v7954_v49 }
 0x218   :  { %v2106_v47 = vmax.f32 %v1230_v24, %v1855_v51  ;;  %5582 = vmatprep.mubr.msk.bf16.mxu1 %vm2855_vm2, %v7856_v36  ;;  %v1232_v5 = vpop.f32.mrf.mxu0  ;;  %v2497_v24 = vmax.f32 %v2305_v39, 0.0 }
 0x219   :  { %v1857_v56 = vpop.f32.mrf.mxu1 }
 0x21a   :  { %v2310_v62 = vadd.f32 %v6871_v25, %v2106_v47  ;;  %v2107_v19 = vmax.f32 %v1232_v5, %v1857_v56  ;;  %v1234_v45 = vpop.f32.mrf.mxu0  ;;  %v2498_v5 = vmax.f32 %v2306_v32, 0.0  ;;  %v9103_v32 = vld [vmem:[#allocation9_spill] sm:$0xff] }
 0x21b   :  { %v1859_v0 = vpop.f32.mrf.mxu1 }
 0x21c   :  { %v2502_v21 = vmax.f32 %v2310_v62, 0.0  ;;  %v2311_v33 = vadd.f32 %v6878_v28, %v2107_v19  ;;  %v2108_v26 = vmax.f32 %v1234_v45, %v1859_v0  ;;  %v1236_v27 = vpop.f32.mrf.mxu0  ;;  %v2499_v0 = vmax.f32 %v2307_v34, 0.0  ;;  %v6327_v34 = vld [vmem:[%s9051_s4 + $0x354] ss:$8 sps:$4 sm:$0xff]  }
 0x21d   :  { %v1861_v2 = vpop.f32.mrf.mxu1 }
 0x21e   :  { %v2614_v63 = vmax.f32 %v2494_v40, %v2502_v21  ;;  %v2503_v30 = vmax.f32 %v2311_v33, 0.0  ;;  %v2312_v16 = vadd.f32 %v6871_v25, %v2108_v26  ;;  %v2109_v52 = vmax.f32 %v1236_v27, %v1861_v2  ;;  %v1240_v54 = vpop.f32.mrf.mxu0  ;;  %3087 = vmatmul.mubr.bf16.gmra.mxu0 %v7976_v35 }
 0x21f   :  { %v1865_v44 = vpop.f32.mrf.mxu1  ;;  %3406 = vmatmul.mubr.bf16.gmra.mxu1 %v7898_v42  ;;  %5631 = vmatprep.mubr.msk.bf16.mxu0 %vm2855_vm2, %v9098_v31  ;;  %v2309_v40 = vadd.f32 %v6878_v28, %v2105_v3  ;;  %v9100_v3 = vld [vmem:[#allocation2_spill] sm:$0xff] }
 0x220   :  { %v2615_v53 = vmax.f32 %v2495_v7, %v2503_v30  ;;  %v2504_v38 = vmax.f32 %v2312_v16, 0.0  ;;  %v2313_v23 = vadd.f32 %v6878_v28, %v2109_v52  ;;  %v2110_v57 = vmax.f32 %v1240_v54, %v1865_v44  ;;  %5695 = vmatprep.mubr.msk.bf16.mxu1 %vm2855_vm2, %v9099_v9  ;;  %v1242_v51 = vpop.f32.mrf.mxu0  ;;  %v6319_v7 = vld [vmem:[%s9051_s4 + $0x370] ss:$8 sps:$4 sm:$0xff]  }
 0x221   :  { %v1867_v29 = vpop.f32.mrf.mxu1  ;;  %v2500_v54 = vmax.f32 %v2308_v60, 0.0  ;;  %v9104_v60 = vld [vmem:[#allocation4_spill] sm:$0xff] }
 0x222   :  { %v2616_v47 = vmax.f32 %v2496_v37, %v2504_v38  ;;  %v2505_v55 = vmax.f32 %v2313_v23, 0.0  ;;  %v2314_v4 = vadd.f32 %v6871_v25, %v2110_v57  ;;  %v2111_v61 = vmax.f32 %v1242_v51, %v1867_v29  ;;  %v1244_v56 = vpop.f32.mrf.mxu0  ;;  %v9102_v37 = vld [vmem:[#allocation5_spill] sm:$0xff]  ;;  %v6322_v23 = vld [vmem:[%s9051_s4 + $0x360] ss:$8 sps:$4 sm:$0xff]  }
 0x223   :  { %v1869_v62 = vpop.f32.mrf.mxu1  ;;  %v2501_v57 = vmax.f32 %v2309_v40, 0.0  ;;  %v9105_v40 = vld [vmem:[#allocation8_spill] sm:$0xff] }
 0x224   :  { %v7993_v19 = vpack.c.bf16 %v2616_v47, %v2614_v63  ;;  %v2617_v50 = vmax.f32 %v2497_v24, %v2505_v55  ;;  %v2506_v10 = vmax.f32 %v2314_v4, 0.0  ;;  %v2315_v45 = vadd.f32 %v6878_v28, %v2111_v61  ;;  %v1246_v33 = vpop.f32.mrf.mxu0  ;;  %v9101_v63 = vld [vmem:[#allocation6_spill] sm:$0xff] }
 0x225   :  { %v2112_v21 = vmax.f32 %v1244_v56, %v1869_v62  ;;  %v1871_v26 = vpop.f32.mrf.mxu1  ;;  %v6325_v62 = vld [vmem:[%s9051_s4 + $0x350] ss:$8 sps:$4 sm:$0xff]  }
 0x226   :  { %v2618_v39 = vmax.f32 %v2498_v5, %v2506_v10  ;;  %v2507_v27 = vmax.f32 %v2315_v45, 0.0  ;;  %v2113_v2 = vmax.f32 %v1246_v33, %v1871_v26  ;;  %v8010_v1 = vpack.c.bf16 %v2617_v50, %v2615_v53  ;;  %v1250_v8 = vpop.f32.mrf.mxu0  ;;  %3600 = vmatmul.mubr.bf16.vlgmr.msra.gmra.mxu0 %v9100_v3  ;;  %v6330_v50 = vld [vmem:[%s9051_s4 + $0x344] ss:$8 sps:$4 sm:$0xff]   ;;  %v6331_v3 = vld [vmem:[%s9051_s4 + $0x330] ss:$8 sps:$4 sm:$0xff]  }
 0x227   :  { %v2316_v46 = vadd.f32 %v6871_v25, %v2112_v21  ;;  %v1875_v58 = vpop.f32.mrf.mxu1  ;;  %4008 = vmatmul.mubr.bf16.vlgmr.msra.gmra.mxu1 %v9101_v63  ;;  %5632 = vmatprep.mubr.msk.bf16.mxu0 %vm2855_vm2, %v9102_v37  ;;  %v9106_v33 = vld [vmem:[#allocation11_spill] sm:$0xff] }
 0x228   :  { %v2619_v30 = vmax.f32 %v2499_v0, %v2507_v27  ;;  %v2317_v16 = vadd.f32 %v6878_v28, %v2113_v2  ;;  %v2114_v52 = vmax.f32 %v1250_v8, %v1875_v58  ;;  %5696 = vmatprep.mubr.msk.bf16.mxu1 %vm2855_vm2, %v9103_v32  ;;  %4384 = vmatpush1.bf16.msra.mxu0 %v6319_v7  ;;  %v1252_v53 = vpop.f32.mrf.mxu0 }
 0x229   :  { %v2508_v44 = vmax.f32 %v2316_v46, 0.0  ;;  %v1877_v38 = vpop.f32.mrf.mxu1  ;;  %4385 = vmatprep.subr.bf16.mxu0 %v6324_v6 }
 0x22a   :  { %v2509_v31 = vmax.f32 %v2317_v16, 0.0  ;;  %v2115_v24 = vmax.f32 %v1252_v53, %v1877_v38  ;;  %v1254_v29 = vpop.f32.mrf.mxu0  ;;  %v9108_v38 = vld [vmem:[#allocation12_spill] sm:$0xff] }
 0x22b   :  { %v2620_v51 = vmax.f32 %v2500_v54, %v2508_v44  ;;  %v1879_v47 = vpop.f32.mrf.mxu1  ;;  %v9107_v54 = vld [vmem:[#allocation10_spill] sm:$0xff]  ;;  %v2318_v44 = vadd.f32 %v6871_v25, %v2114_v52 }
 0x22c   :  { %v2621_v55 = vmax.f32 %v2501_v57, %v2509_v31  ;;  %v2116_v4 = vmax.f32 %v1254_v29, %v1879_v47  ;;  %v1256_v5 = vpop.f32.mrf.mxu0  ;;  %4386 = vmatpush1.bf16.msra.mxu0 %v6322_v23  ;;  %v2319_v23 = vadd.f32 %v6878_v28, %v2115_v24 }
 0x22d   :  { %v8026_v61 = vpack.c.bf16 %v2620_v51, %v2618_v39  ;;  %v1881_v56 = vpop.f32.mrf.mxu1  ;;  %4387 = vmatprep.subr.bf16.mxu0 %v6327_v34  ;;  %v6328_v39 = vld [vmem:[%s9051_s4 + $0x340] ss:$8 sps:$4 sm:$0xff]  }
 0x22e   :  { %v8034_v10 = vpack.c.bf16 %v2621_v55, %v2619_v30  ;;  %v1260_v45 = vpop.f32.mrf.mxu0  ;;  %3610 = vmatmul.mubr.bf16.gmra.mxu0 %v9104_v60  ;;  %v6336_v30 = vld [vmem:[%s9051_s4 + $0x324] ss:$8 sps:$4 sm:$0xff]   ;;  %v2117_v57 = vmax.f32 %v1256_v5, %v1881_v56  ;;  %v2320_v29 = vadd.f32 %v6871_v25, %v2116_v4  ;;  %v2510_v55 = vmax.f32 %v2318_v44, 0.0 }
 0x22f   :  { %v1885_v0 = vpop.f32.mrf.mxu1  ;;  %4018 = vmatmul.mubr.bf16.gmra.mxu1 %v9105_v40  ;;  %5633 = vmatprep.mubr.msk.bf16.mxu0 %vm2855_vm2, %v9099_v9  ;;  %v6333_v9 = vld [vmem:[%s9051_s4 + $0x334] ss:$8 sps:$4 sm:$0xff]  }
 0x230   :  { %v2118_v21 = vmax.f32 %v1260_v45, %v1885_v0  ;;  %5697 = vmatprep.mubr.msk.bf16.mxu1 %vm2855_vm2, %v9106_v33  ;;  %v8042_v26 = vpop.f32.mrf.mxu0  ;;  %4388 = vmatpush1.bf16.msra.mxu0 %v6325_v62  ;;  %v2321_v45 = vadd.f32 %v6878_v28, %v2117_v57 }
 0x231   :  { %v8044_v7 = vpop.f32.mrf.mxu1  ;;  %4389 = vmatprep.subr.bf16.mxu0 %v6330_v50  ;;  %v2511_v50 = vmax.f32 %v2319_v23, 0.0 }
 0x232   :  { %v2119_v27 = vmax.f32 %v8042_v26, %v8044_v7  ;;  %v8054_v2 = vpop.f32.mrf.mxu0  ;;  %v6337_v26 = vld [vmem:[%s9051_s4 + $0x310] ss:$8 sps:$4 sm:$0xff]  }
 0x233   :  { %v8056_v6 = vpop.f32.mrf.mxu1 }
 0x234   :  { %v2120_v46 = vmax.f32 %v8054_v2, %v8056_v6  ;;  %v8060_v8 = vpop.f32.mrf.mxu0  ;;  %4390 = vmatpush1.bf16.msra.mxu0 %v6328_v39  ;;  %v6348_v2 = vld [vmem:[%s9051_s4 + $0x3a4] ss:$8 sps:$4 sm:$0xff]  }
 0x235   :  { %v8062_v58 = vpop.f32.mrf.mxu1  ;;  %4391 = vmatprep.subr.bf16.mxu0 %v6333_v9 }
 0x236   :  { %v1270_v16 = vpop.f32.mrf.mxu0  ;;  %3620 = vmatmul.mubr.bf16.gmra.mxu0 %v9101_v63  ;;  %v6334_v63 = vld [vmem:[%s9051_s4 + $0x320] ss:$8 sps:$4 sm:$0xff]  }
 0x237   :  { %v1895_v37 = vpop.f32.mrf.mxu1  ;;  %4028 = vmatmul.mubr.bf16.gmra.mxu1 %v9107_v54  ;;  %5634 = vmatprep.mubr.msk.bf16.mxu0 %vm2855_vm2, %v9103_v32  ;;  %v6339_v32 = vld [vmem:[%s9051_s4 + $0x314] ss:$8 sps:$4 sm:$0xff]  }
 0x238   :  { %v2122_v53 = vmax.f32 %v1270_v16, %v1895_v37  ;;  %5698 = vmatprep.mubr.msk.bf16.mxu1 %vm2855_vm2, %v9108_v38  ;;  %v1272_v31 = vpop.f32.mrf.mxu0  ;;  %4392 = vmatpush1.bf16.msra.mxu0 %v6331_v3  ;;  %v6342_v3 = vld [vmem:[%s9051_s4 + $0x304] ss:$8 sps:$4 sm:$0xff]   ;;  %v2322_v16 = vadd.f32 %v6871_v25, %v2118_v21  ;;  %v2323_v21 = vadd.f32 %v6878_v28, %v2119_v27  ;;  %v6345_v27 = vld [vmem:[%s9051_s4 + $0x3b4] ss:$8 sps:$4 sm:$0xff]  }
 0x239   :  { %v1897_v34 = vpop.f32.mrf.mxu1  ;;  %4393 = vmatprep.subr.bf16.mxu0 %v6336_v30  ;;  %v2512_v30 = vmax.f32 %v2320_v29, 0.0 }
 0x23a   :  { %v2326_v51 = vadd.f32 %v6871_v25, %v2122_v53  ;;  %v2123_v52 = vmax.f32 %v1272_v31, %v1897_v34  ;;  %v1274_v47 = vpop.f32.mrf.mxu0  ;;  %v2513_v34 = vmax.f32 %v2321_v45, 0.0  ;;  %v2515_v45 = vmax.f32 %v2323_v21, 0.0 }
 0x23b   :  { %v1899_v24 = vpop.f32.mrf.mxu1 }
 0x23c   :  { %v2518_v5 = vmax.f32 %v2326_v51, 0.0  ;;  %v2327_v56 = vadd.f32 %v6878_v28, %v2123_v52  ;;  %v2124_v62 = vmax.f32 %v1274_v47, %v1899_v24  ;;  %v1276_v0 = vpop.f32.mrf.mxu0  ;;  %4394 = vmatpush1.bf16.msra.mxu0 %v6334_v63  ;;  %v2121_v63 = vmax.f32 %v8060_v8, %v8062_v58  ;;  %v6340_v52 = vld [vmem:[%s9051_s4 + $0x300] ss:$8 sps:$4 sm:$0xff]  }
 0x23d   :  { %v1901_v60 = vpop.f32.mrf.mxu1  ;;  %4395 = vmatprep.subr.bf16.mxu0 %v6339_v32 }
 0x23e   :  { %v2622_v7 = vmax.f32 %v2510_v55, %v2518_v5  ;;  %v2519_v39 = vmax.f32 %v2327_v56, 0.0  ;;  %v2328_v4 = vadd.f32 %v6871_v25, %v2124_v62  ;;  %v2125_v9 = vmax.f32 %v1276_v0, %v1901_v60  ;;  %v1280_v37 = vpop.f32.mrf.mxu0  ;;  %3630 = vmatmul.mubr.bf16.gmra.mxu0 %v9105_v40 }
 0x23f   :  { %v1905_v44 = vpop.f32.mrf.mxu1  ;;  %4038 = vmatmul.mubr.bf16.gmra.mxu1 %v7296_v43  ;;  %5635 = vmatprep.mubr.msk.bf16.mxu0 %vm2855_vm2, %v9106_v33  ;;  %v2514_v55 = vmax.f32 %v2322_v16, 0.0  ;;  %v2324_v0 = vadd.f32 %v6871_v25, %v2120_v46  ;;  %v2325_v60 = vadd.f32 %v6878_v28, %v2121_v63  ;;  %v6346_v63 = vld [vmem:[%s9051_s4 + $0x3a0] ss:$8 sps:$4 sm:$0xff]  }
 0x240   :  { %v2623_v53 = vmax.f32 %v2511_v50, %v2519_v39  ;;  %v2520_v23 = vmax.f32 %v2328_v4, 0.0  ;;  %v2329_v57 = vadd.f32 %v6878_v28, %v2125_v9  ;;  %v2126_v31 = vmax.f32 %v1280_v37, %v1905_v44  ;;  %5699 = vmatprep.mubr.msk.bf16.mxu1 %vm2855_vm2, %v7365_v11  ;;  %v1282_v40 = vpop.f32.mrf.mxu0  ;;  %4396 = vmatpush1.bf16.msra.mxu0 %v6337_v26 }
 0x241   :  { %v1907_v51 = vpop.f32.mrf.mxu1  ;;  %4397 = vmatprep.subr.bf16.mxu0 %v6342_v3 }
 0x242   :  { %v2624_v32 = vmax.f32 %v2512_v30, %v2520_v23  ;;  %v2521_v29 = vmax.f32 %v2329_v57, 0.0  ;;  %v2330_v47 = vadd.f32 %v6871_v25, %v2126_v31  ;;  %v2127_v24 = vmax.f32 %v1282_v40, %v1907_v51  ;;  %v1284_v5 = vpop.f32.mrf.mxu0 }
 0x243   :  { %v1909_v8 = vpop.f32.mrf.mxu1  ;;  %v2517_v40 = vmax.f32 %v2325_v60, 0.0 }
 0x244   :  { %v8113_v58 = vpack.c.bf16 %v2624_v32, %v2622_v7  ;;  %v2625_v56 = vmax.f32 %v2513_v34, %v2521_v29  ;;  %v2522_v62 = vmax.f32 %v2330_v47, 0.0  ;;  %v2331_v50 = vadd.f32 %v6878_v28, %v2127_v24  ;;  %v1286_v39 = vpop.f32.mrf.mxu0  ;;  %4398 = vmatpush1.bf16.msra.mxu0 %v6340_v52  ;;  %v6343_v7 = vld [vmem:[%s9051_s4 + $0x3b0] ss:$8 sps:$4 sm:$0xff]   ;;  %v6351_v32 = vld [vmem:[%s9051_s4 + $0x394] ss:$8 sps:$4 sm:$0xff]  }
 0x245   :  { %v2128_v26 = vmax.f32 %v1284_v5, %v1909_v8  ;;  %v1911_v4 = vpop.f32.mrf.mxu1  ;;  %4407 = vmatprep.subr.bf16.mxu0 %v6345_v27 }
 0x246   :  { %v2626_v9 = vmax.f32 %v2514_v55, %v2522_v62  ;;  %v2523_v3 = vmax.f32 %v2331_v50, 0.0  ;;  %v2129_v30 = vmax.f32 %v1286_v39, %v1911_v4  ;;  %v8127_v6 = vpack.c.bf16 %v2625_v56, %v2623_v53  ;;  %v1290_v16 = vpop.f32.mrf.mxu0  ;;  %3640 = vmatmul.mubr.bf16.gmra.mxu0 %v9107_v54  ;;  %v6349_v62 = vld [vmem:[%s9051_s4 + $0x390] ss:$8 sps:$4 sm:$0xff]  }
 0x247   :  { %v2332_v46 = vadd.f32 %v6871_v25, %v2128_v26  ;;  %v1915_v37 = vpop.f32.mrf.mxu1  ;;  %4048 = vmatmul.mubr.bf16.gmra.mxu1 %v7347_v12  ;;  %5636 = vmatprep.mubr.msk.bf16.mxu0 %vm2855_vm2, %v9108_v38  ;;  %v2516_v53 = vmax.f32 %v2324_v0, 0.0  ;;  %v6354_v0 = vld [vmem:[%s9051_s4 + $0x384] ss:$8 sps:$4 sm:$0xff]  }
 0x248   :  { %v2627_v44 = vmax.f32 %v2515_v45, %v2523_v3  ;;  %v2333_v23 = vadd.f32 %v6878_v28, %v2129_v30  ;;  %v2130_v57 = vmax.f32 %v1290_v16, %v1915_v37  ;;  %5700 = vmatprep.mubr.msk.bf16.mxu1 %vm2855_vm2, %v7421_v59  ;;  %v1292_v34 = vpop.f32.mrf.mxu0  ;;  %4408 = vmatpush2.bf16.msra.mxu0 %v6343_v7 }
 0x249   :  { %v2524_v31 = vmax.f32 %v2332_v46, 0.0  ;;  %v1917_v21 = vpop.f32.mrf.mxu1  ;;  %4409 = vmatprep.subr.bf16.mxu0 %v6348_v2 }
 0x24a   :  { %v2525_v51 = vmax.f32 %v2333_v23, 0.0  ;;  %v2131_v52 = vmax.f32 %v1292_v34, %v1917_v21  ;;  %v1294_v47 = vpop.f32.mrf.mxu0 }
 0x24b   :  { %v2628_v29 = vmax.f32 %v2516_v53, %v2524_v31  ;;  %v1919_v24 = vpop.f32.mrf.mxu1  ;;  %v2334_v31 = vadd.f32 %v6871_v25, %v2130_v57 }
 0x24c   :  { %v2629_v27 = vmax.f32 %v2517_v40, %v2525_v51  ;;  %v2132_v55 = vmax.f32 %v1294_v47, %v1919_v24  ;;  %v1296_v8 = vpop.f32.mrf.mxu0  ;;  %4410 = vmatpush2.bf16.msra.mxu0 %v6346_v63  ;;  %v2335_v21 = vadd.f32 %v6878_v28, %v2131_v52 }
 0x24d   :  { %v8143_v5 = vpack.c.bf16 %v2628_v29, %v2626_v9  ;;  %v1921_v56 = vpop.f32.mrf.mxu1  ;;  %4411 = vmatprep.subr.bf16.mxu0 %v6351_v32  ;;  %v6352_v9 = vld [vmem:[%s9051_s4 + $0x380] ss:$8 sps:$4 sm:$0xff]  }
 0x24e   :  { %v2133_v50 = vmax.f32 %v1296_v8, %v1921_v56  ;;  %v8148_v45 = vpack.c.bf16 %v2629_v27, %v2627_v44  ;;  %v1300_v60 = vpop.f32.mrf.mxu0  ;;  %3650 = vmatmul.mubr.bf16.gmra.mxu0 %v7296_v43  ;;  %v2336_v29 = vadd.f32 %v6871_v25, %v2132_v55  ;;  %v2526_v27 = vmax.f32 %v2334_v31, 0.0 }
 0x24f   :  { %v1925_v26 = vpop.f32.mrf.mxu1  ;;  %4058 = vmatmul.mubr.bf16.gmra.mxu1 %v7409_v13  ;;  %5637 = vmatprep.mubr.msk.bf16.mxu0 %vm2855_vm2, %v7365_v11 }
 0x250   :  { %v2134_v39 = vmax.f32 %v1300_v60, %v1925_v26  ;;  %5701 = vmatprep.mubr.msk.bf16.mxu1 %vm2855_vm2, %v7740_v18  ;;  %v1302_v4 = vpop.f32.mrf.mxu0  ;;  %4412 = vmatpush2.bf16.msra.mxu0 %v6349_v62  ;;  %v2527_v62 = vmax.f32 %v2335_v21, 0.0 }
 0x251   :  { %v1927_v7 = vpop.f32.mrf.mxu1  ;;  %4413 = vmatprep.subr.bf16.mxu0 %v6354_v0  ;;  %v2337_v0 = vadd.f32 %v6878_v28, %v2133_v50 }
 0x252   :  { %v2135_v3 = vmax.f32 %v1302_v4, %v1927_v7  ;;  %v8162_v30 = vpop.f32.mrf.mxu0  ;;  %v2338_v55 = vadd.f32 %v6871_v25, %v2134_v39 }
 0x253   :  { %v8164_v2 = vpop.f32.mrf.mxu1  ;;  %v2529_v31 = vmax.f32 %v2337_v0, 0.0 }
 0x254   :  { %v2136_v46 = vmax.f32 %v8162_v30, %v8164_v2  ;;  %v1306_v16 = vpop.f32.mrf.mxu0  ;;  %4414 = vmatpush2.bf16.msra.mxu0 %v6352_v9  ;;  %v2528_v30 = vmax.f32 %v2336_v29, 0.0  ;;  %v2339_v39 = vadd.f32 %v6878_v28, %v2135_v3  ;;  %v2530_v29 = vmax.f32 %v2338_v55, 0.0 }
 0x255   :  { %v1931_v37 = vpop.f32.mrf.mxu1 }
 0x256   :  { %v2137_v44 = vmax.f32 %v1306_v16, %v1931_v37  ;;  %v1310_v23 = vpop.f32.mrf.mxu0  ;;  %3660 = vmatmul.mubr.bf16.gmra.mxu0 %v7347_v12  ;;  %v2531_v3 = vmax.f32 %v2339_v39, 0.0 }
 0x257   :  { %v1935_v53 = vpop.f32.mrf.mxu1  ;;  %4068 = vmatmul.mubr.bf16.gmra.mxu1 %v7550_v17  ;;  %5638 = vmatprep.mubr.msk.bf16.mxu0 %vm2855_vm2, %v7421_v59 }
 0x258   :  { %v2138_v34 = vmax.f32 %v1310_v23, %v1935_v53  ;;  %5702 = vmatprep.mubr.msk.bf16.mxu1 %vm2855_vm2, %v7777_v41  ;;  %v1312_v63 = vpop.f32.mrf.mxu0  ;;  %v2341_v0 = vadd.f32 %v6878_v28, %v2137_v44 }
 0x259   :  { %v1937_v40 = vpop.f32.mrf.mxu1 }
 0x25a   :  { %v2342_v51 = vadd.f32 %v6871_v25, %v2138_v34  ;;  %v2139_v32 = vmax.f32 %v1312_v63, %v1937_v40  ;;  %v1314_v47 = vpop.f32.mrf.mxu0 }
 0x25b   :  { %v1939_v24 = vpop.f32.mrf.mxu1 }
 0x25c   :  { %v2534_v57 = vmax.f32 %v2342_v51, 0.0  ;;  %v2343_v8 = vadd.f32 %v6878_v28, %v2139_v32  ;;  %v2140_v56 = vmax.f32 %v1314_v47, %v1939_v24  ;;  %v1316_v60 = vpop.f32.mrf.mxu0 }
 0x25d   :  { %v1941_v26 = vpop.f32.mrf.mxu1 }
 0x25e   :  { %v8180_v52 = vmax.f32 %v2526_v27, %v2534_v57  ;;  %v2535_v4 = vmax.f32 %v2343_v8, 0.0  ;;  %v2344_v7 = vadd.f32 %v6871_v25, %v2140_v56  ;;  %v2141_v9 = vmax.f32 %v1316_v60, %v1941_v26  ;;  %v1320_v2 = vpop.f32.mrf.mxu0  ;;  %3670 = vmatmul.mubr.bf16.gmra.mxu0 %v7409_v13 }
 0x25f   :  { %v1945_v16 = vpop.f32.mrf.mxu1  ;;  %4078 = vmatmul.mubr.bf16.gmra.mxu1 %v7601_v15  ;;  %5639 = vmatprep.mubr.msk.bf16.mxu0 %vm2855_vm2, %v7740_v18 }
 0x260   :  { %9109 = vst [vmem:[#allocation14_spill] sm:$0xff] %v8180_v52  ;;  %v8186_v37 = vmax.f32 %v2527_v62, %v2535_v4  ;;  %v2536_v50 = vmax.f32 %v2344_v7, 0.0  ;;  %v2345_v23 = vadd.f32 %v6878_v28, %v2141_v9  ;;  %v2142_v53 = vmax.f32 %v1320_v2, %v1945_v16  ;;  %5703 = vmatprep.mubr.msk.bf16.mxu1 %vm2855_vm2, %v7822_v20  ;;  %v1322_v34 = vpop.f32.mrf.mxu0 }
 0x261   :  { %v1947_v21 = vpop.f32.mrf.mxu1  ;;  %v2340_v62 = vadd.f32 %v6871_v25, %v2136_v46 }
 0x262   :  { %9110 = vst [vmem:[#allocation13_spill] sm:$0xff] %v8186_v37  ;;  %v8194_v63 = vmax.f32 %v2528_v30, %v2536_v50  ;;  %v2537_v40 = vmax.f32 %v2345_v23, 0.0  ;;  %v2346_v51 = vadd.f32 %v6871_v25, %v2142_v53  ;;  %v2143_v32 = vmax.f32 %v1322_v34, %v1947_v21  ;;  %v1324_v47 = vpop.f32.mrf.mxu0 }
 0x263   :  { %v1949_v24 = vpop.f32.mrf.mxu1  ;;  %v2532_v53 = vmax.f32 %v2340_v62, 0.0  ;;  %v2533_v34 = vmax.f32 %v2341_v0, 0.0 }
 0x264   :  { %9111 = vst [vmem:[#allocation3_spill] sm:$0xff] %v8194_v63  ;;  %v8199_v57 = vmax.f32 %v2529_v31, %v2537_v40  ;;  %v2538_v8 = vmax.f32 %v2346_v51, 0.0  ;;  %v2347_v56 = vadd.f32 %v6878_v28, %v2143_v32  ;;  %v2144_v60 = vmax.f32 %v1324_v47, %v1949_v24  ;;  %v1326_v26 = vpop.f32.mrf.mxu0 }
 0x265   :  { %v1951_v4 = vpop.f32.mrf.mxu1 }
 0x266   :  { %v8204_v7 = vmax.f32 %v2530_v29, %v2538_v8  ;;  %v2539_v9 = vmax.f32 %v2347_v56, 0.0  ;;  %v2145_v30 = vmax.f32 %v1326_v26, %v1951_v4  ;;  %v2348_v2 = vadd.f32 %v6871_v25, %v2144_v60  ;;  %v2938_v16 = vpop.f32.mrf.mxu0  ;;  %3680 = vmatmul.mubr.bf16.gmra.mxu0 %v7550_v17 }
 0x267   :  { %v3257_v50 = vpop.f32.mrf.mxu1  ;;  %4088 = vmatmul.mubr.bf16.gmra.mxu1 %v7851_v48  ;;  %5640 = vmatprep.mubr.msk.bf16.mxu0 %vm2855_vm2, %v7777_v41 }
 0x268   :  { %9112 = vst [vmem:[#allocation7_spill] sm:$0xff] %v8204_v7  ;;  %v8211_v46 = vmax.f32 %v2531_v3, %v2539_v9  ;;  %v2349_v44 = vadd.f32 %v6878_v28, %v2145_v30  ;;  %v8214_v23 = vadd.f32 %v3257_v50, %v2938_v16  ;;  %5704 = vmatprep.mubr.msk.bf16.mxu1 %vm2855_vm2, %v7856_v36  ;;  %v2540_v25 = vmax.f32 %v2348_v2, 0.0  ;;  %v2940_v31 = vpop.f32.mrf.mxu0 }
 0x269   :  { %v3259_v39 = vpop.f32.mrf.mxu1 }
 0x26a   :  { %9113 = vst [vmem:[#allocation2_spill] sm:$0xff] %v8211_v46  ;;  %v2541_v21 = vmax.f32 %v2349_v44, 0.0  ;;  %v8220_v40 = vadd.f32 %v3259_v39, %v2940_v31  ;;  %v8222_v51 = vmax.f32 %v2532_v53, %v2540_v25  ;;  %v2942_v32 = vpop.f32.mrf.mxu0 }
 0x26b   :  { %v3261_v28 = vpop.f32.mrf.mxu1 }
 0x26c   :  { %9114 = vst [vmem:[#allocation6_spill] sm:$0xff] %v8222_v51  ;;  %v8224_v29 = vmax.f32 %v2533_v34, %v2541_v21  ;;  %v8226_v47 = vadd.f32 %v3261_v28, %v2942_v32  ;;  %v2944_v8 = vpop.f32.mrf.mxu0 }
 0x26d   :  { %v3263_v56 = vpop.f32.mrf.mxu1 }
 0x26e   :  { %9115 = vst [vmem:[#allocation5_spill] sm:$0xff] %v8224_v29  ;;  %v8230_v3 = vadd.f32 %v3263_v56, %v2944_v8  ;;  %v2948_v0 = vpop.f32.mrf.mxu0  ;;  %3690 = vmatmul.mubr.bf16.gmra.mxu0 %v7601_v15 }
 0x26f   :  { %v3267_v60 = vpop.f32.mrf.mxu1  ;;  %4098 = vmatmul.mubr.bf16.gmra.mxu1 %v7898_v42  ;;  %5641 = vmatprep.mubr.msk.bf16.mxu0 %vm2855_vm2, %v7822_v20 }
 0x270   :  { %v8236_v26 = vadd.f32 %v3267_v60, %v2948_v0  ;;  %5705 = vmatprep.mubr.msk.bf16.mxu1 %vm2855_vm2, %v7910_v22  ;;  %v2950_v4 = vpop.f32.mrf.mxu0 }
 0x271   :  { %v3269_v9 = vpop.f32.mrf.mxu1 }
 0x272   :  { %v8242_v30 = vadd.f32 %v3269_v9, %v2950_v4  ;;  %v2952_v2 = vpop.f32.mrf.mxu0 }
 0x273   :  { %v3271_v16 = vpop.f32.mrf.mxu1 }
 0x274   :  { %v8244_v50 = vadd.f32 %v3271_v16, %v2952_v2  ;;  %v2954_v44 = vpop.f32.mrf.mxu0 }
 0x275   :  { %v3273_v53 = vpop.f32.mrf.mxu1 }
 0x276   :  { %v8246_v25 = vadd.f32 %v3273_v53, %v2954_v44  ;;  %v2958_v31 = vpop.f32.mrf.mxu0  ;;  %3700 = vmatmul.mubr.bf16.gmra.mxu0 %v7851_v48 }
 0x277   :  { %v3277_v39 = vpop.f32.mrf.mxu1  ;;  %4108 = vmatmul.mubr.bf16.gmra.mxu1 %v7946_v14  ;;  %5642 = vmatprep.mubr.msk.bf16.mxu0 %vm2855_vm2, %v7856_v36 }
 0x278   :  { %v8250_v34 = vadd.f32 %v3277_v39, %v2958_v31  ;;  %5706 = vmatprep.mubr.msk.bf16.mxu1 %vm2855_vm2, %v7954_v49  ;;  %v2960_v21 = vpop.f32.mrf.mxu0 }
 0x279   :  { %v3279_v32 = vpop.f32.mrf.mxu1 }
 0x27a   :  { %v8256_v28 = vadd.f32 %v3279_v32, %v2960_v21  ;;  %v2962_v8 = vpop.f32.mrf.mxu0 }
 0x27b   :  { %v3281_v56 = vpop.f32.mrf.mxu1 }
 0x27c   :  { %v8258_v0 = vadd.f32 %v3281_v56, %v2962_v8  ;;  %v2964_v60 = vpop.f32.mrf.mxu0 }
 0x27d   :  { %v3283_v4 = vpop.f32.mrf.mxu1 }
 0x27e   :  { %v8260_v9 = vadd.f32 %v3283_v4, %v2964_v60  ;;  %v2968_v2 = vpop.f32.mrf.mxu0  ;;  %3710 = vmatmul.mubr.bf16.gmra.mxu0 %v7898_v42 }
 0x27f   :  { %v3287_v16 = vpop.f32.mrf.mxu1  ;;  %4118 = vmatmul.mubr.bf16.gmra.mxu1 %v7976_v35  ;;  %5643 = vmatprep.mubr.msk.bf16.mxu0 %vm2855_vm2, %v7910_v22 }
 0x280   :  { %v8264_v44 = vadd.f32 %v3287_v16, %v2968_v2  ;;  %5707 = vmatprep.mubr.msk.bf16.mxu1 %vm2855_vm2, %v8010_v1  ;;  %v2970_v53 = vpop.f32.mrf.mxu0 }
 0x281   :  { %v3289_v31 = vpop.f32.mrf.mxu1 }
 0x282   :  { %v8270_v39 = vadd.f32 %v3289_v31, %v2970_v53  ;;  %v2972_v21 = vpop.f32.mrf.mxu0 }
 0x283   :  { %v3291_v32 = vpop.f32.mrf.mxu1 }
 0x284   :  { %v8272_v8 = vadd.f32 %v3291_v32, %v2972_v21  ;;  %v2974_v56 = vpop.f32.mrf.mxu0 }
 0x285   :  { %v3293_v60 = vpop.f32.mrf.mxu1 }
 0x286   :  { %v8274_v4 = vadd.f32 %v3293_v60, %v2974_v56  ;;  %v2978_v2 = vpop.f32.mrf.mxu0  ;;  %3720 = vmatmul.mubr.bf16.gmra.mxu0 %v7946_v14 }
 0x287   :  { %v3297_v16 = vpop.f32.mrf.mxu1  ;;  %4128 = vmatmul.mubr.bf16.gmra.mxu1 %v7993_v19  ;;  %5644 = vmatprep.mubr.msk.bf16.mxu0 %vm2855_vm2, %v7954_v49 }
 0x288   :  { %v8278_v24 = vadd.f32 %v3297_v16, %v2978_v2  ;;  %5708 = vmatprep.mubr.msk.bf16.mxu1 %vm2855_vm2, %v8034_v10  ;;  %v2980_v53 = vpop.f32.mrf.mxu0 }
 0x289   :  { %v3299_v31 = vpop.f32.mrf.mxu1 }
 0x28a   :  { %v8284_v21 = vadd.f32 %v3299_v31, %v2980_v53  ;;  %v2982_v32 = vpop.f32.mrf.mxu0 }
 0x28b   :  { %v3301_v56 = vpop.f32.mrf.mxu1 }
 0x28c   :  { %v8286_v60 = vadd.f32 %v3301_v56, %v2982_v32  ;;  %v8288_v62 = vpop.f32.mrf.mxu0 }
 0x28d   :  { %v8290_v27 = vpop.f32.mrf.mxu1 }
 0x28e   :  { %v2988_v2 = vpop.f32.mrf.mxu0  ;;  %3730 = vmatmul.mubr.bf16.gmra.mxu0 %v7976_v35 }
 0x28f   :  { %v3307_v16 = vpop.f32.mrf.mxu1  ;;  %4138 = vmatmul.mubr.bf16.gmra.mxu1 %v8026_v61  ;;  %5645 = vmatprep.mubr.msk.bf16.mxu0 %vm2855_vm2, %v8010_v1 }
 0x290   :  { %v8294_v55 = vadd.f32 %v3307_v16, %v2988_v2  ;;  %5709 = vmatprep.mubr.msk.bf16.mxu1 %vm2855_vm2, %v8127_v6  ;;  %v2990_v53 = vpop.f32.mrf.mxu0 }
 0x291   :  { %v3309_v31 = vpop.f32.mrf.mxu1 }
 0x292   :  { %v8300_v32 = vadd.f32 %v3309_v31, %v2990_v53  ;;  %v2992_v56 = vpop.f32.mrf.mxu0 }
 0x293   :  { %v3311_v7 = vpop.f32.mrf.mxu1 }
 0x294   :  { %9116 = vst [vmem:[#allocation9_spill] sm:$0xff] %v8300_v32  ;;  %v8302_v51 = vadd.f32 %v3311_v7, %v2992_v56  ;;  %v8304_v46 = vpop.f32.mrf.mxu0 }
 0x295   :  { %9118 = vst [vmem:[#allocation8_spill] sm:$0xff] %v8304_v46  ;;  %v8306_v29 = vpop.f32.mrf.mxu1 }
 0x296   :  { %9117 = vst [vmem:[#allocation4_spill] sm:$0xff] %v8302_v51  ;;  %9119 = vst [vmem:[#allocation11_spill] sm:$0xff] %v8306_v29  ;;  %v2998_v2 = vpop.f32.mrf.mxu0  ;;  %3740 = vmatmul.mubr.bf16.gmra.mxu0 %v7993_v19 }
 0x297   :  { %v3317_v16 = vpop.f32.mrf.mxu1  ;;  %4148 = vmatmul.mubr.bf16.gmra.mxu1 %v8113_v58  ;;  %5646 = vmatprep.mubr.msk.bf16.mxu0 %vm2855_vm2, %v8034_v10 }
 0x298   :  { %v8310_v52 = vadd.f32 %v3317_v16, %v2998_v2  ;;  %5710 = vmatprep.mubr.msk.bf16.mxu1 %vm2855_vm2, %v8148_v45  ;;  %v3000_v7 = vpop.f32.mrf.mxu0 }
 0x299   :  { %v3319_v53 = vpop.f32.mrf.mxu1 }
 0x29a   :  { %9120 = vst [vmem:[#allocation10_spill] sm:$0xff] %v8310_v52  ;;  %v8316_v31 = vadd.f32 %v3319_v53, %v3000_v7  ;;  %v3002_v56 = vpop.f32.mrf.mxu0 }
 0x29b   :  { %v3321_v63 = vpop.f32.mrf.mxu1 }
 0x29c   :  { %9121 = vst [vmem:[#allocation12_spill] sm:$0xff] %v8316_v31  ;;  %v8318_v51 = vadd.f32 %v3321_v63, %v3002_v56  ;;  %v8320_v29 = vpop.f32.mrf.mxu0 }
 0x29d   :  { %9123 = vst [vmem:[#allocation16_spill] sm:$0xff] %v8320_v29  ;;  %v8322_v46 = vpop.f32.mrf.mxu1 }
 0x29e   :  { %9122 = vst [vmem:[#allocation15_spill] sm:$0xff] %v8318_v51  ;;  %9124 = vst [vmem:[#allocation17_spill] sm:$0xff] %v8322_v46  ;;  %v3008_v2 = vpop.f32.mrf.mxu0  ;;  %3750 = vmatmul.mubr.bf16.gmra.mxu0 %v8026_v61 }
 0x29f   :  { %v3327_v16 = vpop.f32.mrf.mxu1  ;;  %4158 = vmatmul.mubr.bf16.gmra.mxu1 %v8143_v5  ;;  %5759 = vmatprep.mubr.msk.bf16.mxu0 %vm2855_vm2, %v9106_v33 }
 0x2a0   :  { %v8326_v52 = vadd.f32 %v3327_v16, %v3008_v2  ;;  %v3010_v7 = vpop.f32.mrf.mxu0 }
 0x2a1   :  { %v3329_v53 = vpop.f32.mrf.mxu1 }
 0x2a2   :  { %9125 = vst [vmem:[#allocation18_spill] sm:$0xff] %v8326_v52  ;;  %v8330_v31 = vadd.f32 %v3329_v53, %v3010_v7  ;;  %v3012_v63 = vpop.f32.mrf.mxu0 }
 0x2a3   :  { %v3331_v56 = vpop.f32.mrf.mxu1 }
 0x2a4   :  { %9126 = vst [vmem:[#allocation19_spill] sm:$0xff] %v8330_v31  ;;  %v8332_v51 = vadd.f32 %v3331_v56, %v3012_v63  ;;  %v8334_v46 = vpop.f32.mrf.mxu0 }
 0x2a5   :  { %9128 = vst [vmem:[#allocation21_spill] sm:$0xff] %v8334_v46  ;;  %v8336_v29 = vpop.f32.mrf.mxu1 }
 0x2a6   :  { %9127 = vst [vmem:[#allocation20_spill] sm:$0xff] %v8332_v51  ;;  %9129 = vst [vmem:[#allocation22_spill] sm:$0xff] %v8336_v29  ;;  %v3018_v32 = vpop.f32.mrf.mxu0  ;;  %4416 = vmatmul.mubr.bf16.vlgmr.msra.gmra.mxu0 %v9107_v54 }
 0x2a7   :  { %v3337_v37 = vpop.f32.mrf.mxu1  ;;  %5760 = vmatprep.mubr.msk.bf16.mxu0 %vm2855_vm2, %v9108_v38 }
 0x2a8   :  { %v8339_v2 = vadd.f32 %v3337_v37, %v3018_v32  ;;  %v3020_v33 = vpop.f32.mrf.mxu0 }
 0x2a9   :  { %v3339_v16 = vpop.f32.mrf.mxu1 }
 0x2aa   :  { %v8343_v7 = vadd.f32 %v3339_v16, %v3020_v33  ;;  %v3022_v53 = vpop.f32.mrf.mxu0 }
 0x2ab   :  { %v3341_v63 = vpop.f32.mrf.mxu1 }
 0x2ac   :  { %v8345_v56 = vadd.f32 %v3341_v63, %v3022_v53  ;;  %v3024_v51 = vpop.f32.mrf.mxu0 }
 0x2ad   :  { %v3343_v46 = vpop.f32.mrf.mxu1 }
 0x2ae   :  { %v8347_v29 = vadd.f32 %v3343_v46, %v3024_v51  ;;  %v3028_v31 = vpop.f32.mrf.mxu0  ;;  %4426 = vmatmul.mubr.bf16.gmra.mxu0 %v7296_v43  ;;  %v6355_v51 = vld [vmem:[%s9053_s6 + $0x78] sm:$0xff]  }
 0x2af   :  { %v3347_v52 = vpop.f32.mrf.mxu1  ;;  %5761 = vmatprep.mubr.msk.bf16.mxu0 %vm2855_vm2, %v7365_v11  ;;  %5897 = vmatprep.subr.bf16.mxu1 %v6355_v51 }
 0x2b0   :  { %v8350_v54 = vadd.f32 %v3347_v52, %v3028_v31  ;;  %v3030_v38 = vpop.f32.mrf.mxu0  ;;  %5898 = vmatpush3.bf16.msra.mxu1 %v6355_v51 }
 0x2b1   :  { %v3349_v37 = vpop.f32.mrf.mxu1 }
 0x2b2   :  { %9130 = vst [vmem:[#allocation23_spill] sm:$0xff] %v8350_v54  ;;  %v8354_v32 = vadd.f32 %v3349_v37, %v3030_v38  ;;  %v3032_v33 = vpop.f32.mrf.mxu0 }
 0x2b3   :  { %v3351_v16 = vpop.f32.mrf.mxu1 }
 0x2b4   :  { %9131 = vst [vmem:[#allocation24_spill] sm:$0xff] %v8354_v32  ;;  %v8356_v53 = vadd.f32 %v3351_v16, %v3032_v33  ;;  %v3034_v63 = vpop.f32.mrf.mxu0 }
 0x2b5   :  { %v3353_v46 = vpop.f32.mrf.mxu1 }
 0x2b6   :  { %9132 = vst [vmem:[#allocation25_spill] sm:$0xff] %v8356_v53  ;;  %v8361_v43 = vadd.f32 %v3353_v46, %v3034_v63  ;;  %v3038_v52 = vpop.f32.mrf.mxu0  ;;  %4436 = vmatmul.mubr.bf16.gmra.mxu0 %v7347_v12 }
 0x2b7   :  { %v3357_v31 = vpop.f32.mrf.mxu1  ;;  %5762 = vmatprep.mubr.msk.bf16.mxu0 %vm2855_vm2, %v7421_v59 }
 0x2b8   :  { %9133 = vst [vmem:[#allocation26_spill] sm:$0xff] %v8361_v43  ;;  %v8364_v11 = vadd.f32 %v3357_v31, %v3038_v52  ;;  %v3040_v38 = vpop.f32.mrf.mxu0 }
 0x2b9   :  { %v3359_v37 = vpop.f32.mrf.mxu1 }
 0x2ba   :  { %v8368_v33 = vadd.f32 %v3359_v37, %v3040_v38  ;;  %v3042_v16 = vpop.f32.mrf.mxu0 }
 0x2bb   :  { %v3361_v53 = vpop.f32.mrf.mxu1 }
 0x2bc   :  { %v8370_v32 = vadd.f32 %v3361_v53, %v3042_v16  ;;  %v3044_v63 = vpop.f32.mrf.mxu0  ;;  %v6356_v16 = vld [vmem:[%s9053_s6 + $0x70] sm:$0xff]  }
 0x2bd   :  { %v3363_v46 = vpop.f32.mrf.mxu1  ;;  %5899 = vmatprep.subr.bf16.mxu1 %v6356_v16 }
 0x2be   :  { %v8372_v43 = vadd.f32 %v3363_v46, %v3044_v63  ;;  %v3048_v12 = vpop.f32.mrf.mxu0  ;;  %4446 = vmatmul.mubr.bf16.gmra.mxu0 %v7409_v13  ;;  %5900 = vmatpush3.bf16.msra.mxu1 %v6356_v16 }
 0x2bf   :  { %v3367_v54 = vpop.f32.mrf.mxu1  ;;  %5763 = vmatprep.mubr.msk.bf16.mxu0 %vm2855_vm2, %v7740_v18 }
 0x2c0   :  { %v8375_v52 = vadd.f32 %v3367_v54, %v3048_v12  ;;  %v3050_v59 = vpop.f32.mrf.mxu0 }
 0x2c1   :  { %v3369_v51 = vpop.f32.mrf.mxu1 }
 0x2c2   :  { %9134 = vst [vmem:[#allocation27_spill] sm:$0xff] %v8375_v52  ;;  %v8379_v31 = vadd.f32 %v3369_v51, %v3050_v59  ;;  %v3052_v38 = vpop.f32.mrf.mxu0 }
 0x2c3   :  { %v3371_v53 = vpop.f32.mrf.mxu1 }
 0x2c4   :  { %9135 = vst [vmem:[#allocation28_spill] sm:$0xff] %v8379_v31  ;;  %v8381_v37 = vadd.f32 %v3371_v53, %v3052_v38  ;;  %v3054_v63 = vpop.f32.mrf.mxu0 }
 0x2c5   :  { %v3373_v46 = vpop.f32.mrf.mxu1 }
 0x2c6   :  { %9136 = vst [vmem:[#allocation29_spill] sm:$0xff] %v8381_v37  ;;  %v8386_v13 = vadd.f32 %v3373_v46, %v3054_v63  ;;  %v3058_v54 = vpop.f32.mrf.mxu0  ;;  %4456 = vmatmul.mubr.bf16.gmra.mxu0 %v7550_v17 }
 0x2c7   :  { %v3377_v12 = vpop.f32.mrf.mxu1  ;;  %5764 = vmatprep.mubr.msk.bf16.mxu0 %vm2855_vm2, %v7777_v41 }
 0x2c8   :  { %9137 = vst [vmem:[#allocation30_spill] sm:$0xff] %v8386_v13  ;;  %v8389_v18 = vadd.f32 %v3377_v12, %v3058_v54  ;;  %v3060_v59 = vpop.f32.mrf.mxu0 }
 0x2c9   :  { %v3379_v51 = vpop.f32.mrf.mxu1 }
 0x2ca   :  { %v8393_v38 = vadd.f32 %v3379_v51, %v3060_v59  ;;  %v3062_v53 = vpop.f32.mrf.mxu0 }
 0x2cb   :  { %v3381_v37 = vpop.f32.mrf.mxu1 }
 0x2cc   :  { %v8395_v31 = vadd.f32 %v3381_v37, %v3062_v53  ;;  %v3064_v63 = vpop.f32.mrf.mxu0  ;;  %v6357_v53 = vld [vmem:[%s9053_s6 + $0x68] sm:$0xff]  }
 0x2cd   :  { %v3383_v46 = vpop.f32.mrf.mxu1  ;;  %5901 = vmatprep.subr.bf16.mxu1 %v6357_v53 }
 0x2ce   :  { %v8397_v13 = vadd.f32 %v3383_v46, %v3064_v63  ;;  %v3068_v52 = vpop.f32.mrf.mxu0  ;;  %4466 = vmatmul.mubr.bf16.gmra.mxu0 %v7601_v15  ;;  %5902 = vmatpush3.bf16.msra.mxu1 %v6357_v53 }
 0x2cf   :  { %v3387_v17 = vpop.f32.mrf.mxu1  ;;  %5765 = vmatprep.mubr.msk.bf16.mxu0 %vm2855_vm2, %v7822_v20 }
 0x2d0   :  { %v8400_v16 = vadd.f32 %v3387_v17, %v3068_v52  ;;  %v3070_v41 = vpop.f32.mrf.mxu0 }
 0x2d1   :  { %v3389_v54 = vpop.f32.mrf.mxu1 }
 0x2d2   :  { %9138 = vst [vmem:[#allocation31_spill] sm:$0xff] %v8400_v16  ;;  %v8404_v12 = vadd.f32 %v3389_v54, %v3070_v41  ;;  %v3072_v59 = vpop.f32.mrf.mxu0 }
 0x2d3   :  { %v3391_v37 = vpop.f32.mrf.mxu1 }
 0x2d4   :  { %9139 = vst [vmem:[#allocation32_spill] sm:$0xff] %v8404_v12  ;;  %v8406_v51 = vadd.f32 %v3391_v37, %v3072_v59  ;;  %v3074_v63 = vpop.f32.mrf.mxu0 }
 0x2d5   :  { %v3393_v46 = vpop.f32.mrf.mxu1 }
 0x2d6   :  { %9140 = vst [vmem:[#allocation33_spill] sm:$0xff] %v8406_v51  ;;  %v8411_v15 = vadd.f32 %v3393_v46, %v3074_v63  ;;  %v3078_v52 = vpop.f32.mrf.mxu0  ;;  %4476 = vmatmul.mubr.bf16.gmra.mxu0 %v7851_v48 }
 0x2d7   :  { %v3397_v17 = vpop.f32.mrf.mxu1  ;;  %5766 = vmatprep.mubr.msk.bf16.mxu0 %vm2855_vm2, %v7856_v36 }
 0x2d8   :  { %9141 = vst [vmem:[#allocation34_spill] sm:$0xff] %v8411_v15  ;;  %v8414_v20 = vadd.f32 %v3397_v17, %v3078_v52  ;;  %v3080_v41 = vpop.f32.mrf.mxu0 }
 0x2d9   :  { %v3399_v54 = vpop.f32.mrf.mxu1 }
 0x2da   :  { %v8418_v59 = vadd.f32 %v3399_v54, %v3080_v41  ;;  %v3082_v37 = vpop.f32.mrf.mxu0 }
 0x2db   :  { %v3401_v51 = vpop.f32.mrf.mxu1 }
 0x2dc   :  { %v8420_v12 = vadd.f32 %v3401_v51, %v3082_v37  ;;  %v3084_v63 = vpop.f32.mrf.mxu0  ;;  %v6358_v37 = vld [vmem:[%s9053_s6 + $0x60] sm:$0xff]  }
 0x2dd   :  { %v3403_v46 = vpop.f32.mrf.mxu1  ;;  %5903 = vmatprep.subr.bf16.mxu1 %v6358_v37 }
 0x2de   :  { %v8422_v15 = vadd.f32 %v3403_v46, %v3084_v63  ;;  %v3088_v16 = vpop.f32.mrf.mxu0  ;;  %4486 = vmatmul.mubr.bf16.gmra.mxu0 %v7898_v42  ;;  %5904 = vmatpush3.bf16.msra.mxu1 %v6358_v37 }
 0x2df   :  { %v3407_v48 = vpop.f32.mrf.mxu1  ;;  %5767 = vmatprep.mubr.msk.bf16.mxu0 %vm2855_vm2, %v7910_v22 }
 0x2e0   :  { %v8425_v53 = vadd.f32 %v3407_v48, %v3088_v16  ;;  %v3090_v36 = vpop.f32.mrf.mxu0 }
 0x2e1   :  { %v3409_v52 = vpop.f32.mrf.mxu1 }
 0x2e2   :  { %v8429_v17 = vadd.f32 %v3409_v52, %v3090_v36  ;;  %v3092_v41 = vpop.f32.mrf.mxu0 }
 0x2e3   :  { %v3411_v51 = vpop.f32.mrf.mxu1 }
 0x2e4   :  { %v8431_v54 = vadd.f32 %v3411_v51, %v3092_v41  ;;  %v3094_v63 = vpop.f32.mrf.mxu0 }
 0x2e5   :  { %v3413_v46 = vpop.f32.mrf.mxu1 }
 0x2e6   :  { %v8436_v42 = vadd.f32 %v3413_v46, %v3094_v63  ;;  %v3601_v16 = vpop.f32.mrf.mxu0  ;;  %4496 = vmatmul.mubr.bf16.gmra.mxu0 %v7946_v14 }
 0x2e7   :  { %v8438_v48 = vpop.f32.mrf.mxu1  ;;  %v8442_v22 = vadd.f32 %v3601_v16, %v8214_v23  ;;  %5768 = vmatprep.mubr.msk.bf16.mxu0 %vm2855_vm2, %v7954_v49 }
 0x2e8   :  { %v3603_v36 = vpop.f32.mrf.mxu0 }
 0x2e9   :  { %v8446_v52 = vpop.f32.mrf.mxu1  ;;  %v8449_v41 = vadd.f32 %v3603_v36, %v8220_v40 }
 0x2ea   :  { %9142 = vst [vmem:[#allocation35_spill] sm:$0xff] %v8446_v52  ;;  %v3605_v51 = vpop.f32.mrf.mxu0 }
 0x2eb   :  { %v8451_v63 = vpop.f32.mrf.mxu1  ;;  %v8454_v46 = vadd.f32 %v3605_v51, %v8226_v47 }
 0x2ec   :  { %9143 = vst [vmem:[#allocation36_spill] sm:$0xff] %v8451_v63  ;;  %v3607_v14 = vpop.f32.mrf.mxu0 }
 0x2ed   :  { %9144 = vst [vmem:[#allocation37_spill] sm:$0xff] %v8454_v46  ;;  %v8456_v37 = vpop.f32.mrf.mxu1  ;;  %v8459_v23 = vadd.f32 %v3607_v14, %v8230_v3 }
 0x2ee   :  { %9145 = vst [vmem:[#allocation38_spill] sm:$0xff] %v8456_v37  ;;  %v3611_v16 = vpop.f32.mrf.mxu0  ;;  %4506 = vmatmul.mubr.bf16.gmra.mxu0 %v7976_v35 }
 0x2ef   :  { %9146 = vst [vmem:[#allocation39_spill] sm:$0xff] %v8459_v23  ;;  %v4019_v49 = vpop.f32.mrf.mxu1  ;;  %v3764_v52 = vadd.f32 %v3611_v16, %v8236_v26  ;;  %5769 = vmatprep.mubr.msk.bf16.mxu0 %vm2855_vm2, %v8010_v1 }
 0x2f0   :  { %v3613_v40 = vpop.f32.mrf.mxu0 }
 0x2f1   :  { %v4021_v36 = vpop.f32.mrf.mxu1  ;;  %v8465_v63 = vadd.f32 %v4019_v49, %v3764_v52  ;;  %v3765_v47 = vadd.f32 %v3613_v40, %v8242_v30 }
 0x2f2   :  { %v3615_v51 = vpop.f32.mrf.mxu0 }
 0x2f3   :  { %v4023_v37 = vpop.f32.mrf.mxu1  ;;  %v8468_v46 = vadd.f32 %v4021_v36, %v3765_v47  ;;  %v3766_v3 = vadd.f32 %v3615_v51, %v8244_v50  ;;  %v6359_v50 = vld [vmem:[%s9053_s6 + $0x58] sm:$0xff]  }
 0x2f4   :  { %v3617_v14 = vpop.f32.mrf.mxu0  ;;  %5905 = vmatprep.subr.bf16.mxu1 %v6359_v50 }
 0x2f5   :  { %v4025_v23 = vpop.f32.mrf.mxu1  ;;  %v8471_v35 = vadd.f32 %v4023_v37, %v3766_v3  ;;  %v3767_v26 = vadd.f32 %v3617_v14, %v8246_v25  ;;  %5906 = vmatpush3.bf16.msra.mxu1 %v6359_v50 }
 0x2f6   :  { %v3621_v16 = vpop.f32.mrf.mxu0  ;;  %4516 = vmatmul.mubr.bf16.gmra.mxu0 %v7993_v19 }
 0x2f7   :  { %v8474_v1 = vpop.f32.mrf.mxu1  ;;  %v8477_v52 = vadd.f32 %v4025_v23, %v3767_v26  ;;  %v8480_v30 = vadd.f32 %v3621_v16, %v8250_v34  ;;  %5770 = vmatprep.mubr.msk.bf16.mxu0 %vm2855_vm2, %v8034_v10 }
 0x2f8   :  { %v3623_v37 = vpop.f32.mrf.mxu0 }
 0x2f9   :  { %v8487_v49 = vpop.f32.mrf.mxu1  ;;  %v8490_v25 = vadd.f32 %v3623_v37, %v8256_v28 }
 0x2fa   :  { %v3625_v19 = vpop.f32.mrf.mxu0 }
 0x2fb   :  { %v8492_v23 = vpop.f32.mrf.mxu1  ;;  %v8495_v34 = vadd.f32 %v3625_v19, %v8258_v0 }
 0x2fc   :  { %v3627_v40 = vpop.f32.mrf.mxu0 }
 0x2fd   :  { %v8497_v10 = vpop.f32.mrf.mxu1  ;;  %v8500_v36 = vadd.f32 %v3627_v40, %v8260_v9 }
 0x2fe   :  { %v3631_v47 = vpop.f32.mrf.mxu0  ;;  %4526 = vmatmul.mubr.bf16.gmra.mxu0 %v8026_v61 }
 0x2ff   :  { %v4039_v51 = vpop.f32.mrf.mxu1  ;;  %v3772_v28 = vadd.f32 %v3631_v47, %v8264_v44  ;;  %5771 = vmatprep.mubr.msk.bf16.mxu0 %vm2855_vm2, %v8127_v6 }
 0x300   :  { %v3633_v3 = vpop.f32.mrf.mxu0 }
 0x301   :  { %v4041_v14 = vpop.f32.mrf.mxu1  ;;  %v8506_v26 = vadd.f32 %v4039_v51, %v3772_v28  ;;  %v3773_v0 = vadd.f32 %v3633_v3, %v8270_v39 }
 0x302   :  { %v3635_v16 = vpop.f32.mrf.mxu0 }
 0x303   :  { %v4043_v50 = vpop.f32.mrf.mxu1  ;;  %v8509_v37 = vadd.f32 %v4041_v14, %v3773_v0  ;;  %v3774_v9 = vadd.f32 %v3635_v16, %v8272_v8  ;;  %v9147_v0 = vld [vmem:[#allocation13_spill] sm:$0xff] }
 0x304   :  { %v3637_v19 = vpop.f32.mrf.mxu0  ;;  %v9148_v16 = vpack.c.bf16 %v8199_v57, %v9147_v0  ;;  %v9160_v0 = vld [vmem:[#allocation2_spill] sm:$0xff] }
 0x305   :  { %v8512_v40 = vadd.f32 %v4043_v50, %v3774_v9  ;;  %v3775_v61 = vadd.f32 %v3637_v19, %v8274_v4  ;;  %v4045_v44 = vpop.f32.mrf.mxu1  ;;  %v6360_v4 = vld [vmem:[%s9053_s6 + $0x50] sm:$0xff]   ;;  %v9151_v19 = vld [vmem:[#allocation11_spill] sm:$0xff] }
 0x306   :  { %v3641_v47 = vpop.f32.mrf.mxu0  ;;  %4536 = vmatmul.mubr.bf16.gmra.mxu0 %v8113_v58  ;;  %v3304_v58 = vadd.f32 %v8290_v27, %v8288_v62  ;;  %5907 = vmatprep.subr.bf16.mxu1 %v6360_v4  ;;  %v9149_v62 = vld [vmem:[#allocation9_spill] sm:$0xff]  ;;  %v9150_v9 = vld [vmem:[#allocation8_spill] sm:$0xff] }
 0x307   :  { %v8516_v6 = vadd.f32 %v4045_v44, %v3775_v61  ;;  %v8519_v51 = vadd.f32 %v3641_v47, %v8278_v24  ;;  %5772 = vmatprep.mubr.msk.bf16.mxu0 %vm2855_vm2, %v8148_v45  ;;  %5908 = vmatpush3.bf16.msra.mxu1 %v6360_v4  ;;  %v3314_v61 = vadd.f32 %v9151_v19, %v9150_v9  ;;  %v9152_v44 = vld [vmem:[#allocation4_spill] sm:$0xff]  ;;  %v9154_v4 = vld [vmem:[#allocation3_spill] sm:$0xff] }
 0x308   :  { %v3643_v39 = vpop.f32.mrf.mxu0 }
 0x309   :  { %v8524_v8 = vadd.f32 %v3643_v39, %v8284_v21 }
 0x30a   :  { %v3645_v28 = vpop.f32.mrf.mxu0 }
 0x30b   :  { %v8532_v3 = vadd.f32 %v3645_v28, %v8286_v60  ;;  %v9155_v28 = vld [vmem:[#allocation14_spill] sm:$0xff] }
 0x30c   :  { %v3647_v24 = vpop.f32.mrf.mxu0  ;;  %v9156_v57 = vpack.c.bf16 %v9154_v4, %v9155_v28 }
 0x30d   :  { %v8534_v14 = vadd.f32 %v3647_v24, %v3304_v58  ;;  %v9157_v58 = vld [vmem:[#allocation10_spill] sm:$0xff] }
 0x30e   :  { %v3651_v45 = vpop.f32.mrf.mxu0  ;;  %4546 = vmatmul.mubr.bf16.gmra.mxu0 %v8143_v5 }
 0x30f   :  { %v8538_v21 = vadd.f32 %v3651_v45, %v8294_v55  ;;  %5773 = vmatprep.mubr.msk.bf16.mxu0 %vm2855_vm2, %v9148_v16  ;;  %v9159_v45 = vld [vmem:[#allocation5_spill] sm:$0xff] }
 0x310   :  { %v3653_v27 = vpop.f32.mrf.mxu0  ;;  %v9161_v16 = vpack.c.bf16 %v9159_v45, %v9160_v0  ;;  %v9169_v45 = vld [vmem:[#allocation6_spill] sm:$0xff]  ;;  %v9170_v0 = vld [vmem:[#allocation7_spill] sm:$0xff] }
 0x311   :  { %v8545_v60 = vadd.f32 %v3653_v27, %v9149_v62  ;;  %v6361_v27 = vld [vmem:[%s9053_s6 + $0x48] sm:$0xff]  }
 0x312   :  { %v3655_v50 = vpop.f32.mrf.mxu0  ;;  %5909 = vmatprep.subr.bf16.mxu1 %v6361_v27 }
 0x313   :  { %v8550_v47 = vadd.f32 %v3655_v50, %v9152_v44  ;;  %v9162_v50 = vld [vmem:[#allocation12_spill] sm:$0xff]  ;;  %5910 = vmatpush3.bf16.msra.mxu1 %v6361_v27  ;;  %v9165_v44 = vld [vmem:[#allocation17_spill] sm:$0xff] }
 0x314   :  { %v3657_v5 = vpop.f32.mrf.mxu0 }
 0x315   :  { %v8552_v39 = vadd.f32 %v3657_v5, %v3314_v61  ;;  %v9164_v61 = vld [vmem:[#allocation16_spill] sm:$0xff] }
 0x316   :  { %v3661_v55 = vpop.f32.mrf.mxu0  ;;  %4556 = vmatmul.mubr.bf16.gmra.mxu0 %v9156_v57  ;;  %v3324_v5 = vadd.f32 %v9165_v44, %v9164_v61  ;;  %v9174_v61 = vld [vmem:[#allocation21_spill] sm:$0xff]  ;;  %v9175_v44 = vld [vmem:[#allocation22_spill] sm:$0xff] }
 0x317   :  { %9153 = vst [vmem:[#allocation13_spill] sm:$0xff] %v8552_v39  ;;  %v8558_v24 = vadd.f32 %v3661_v55, %v9157_v58  ;;  %5774 = vmatprep.mubr.msk.bf16.mxu0 %vm2855_vm2, %v9161_v16  ;;  %v9166_v55 = vld [vmem:[#allocation15_spill] sm:$0xff]  ;;  %v9171_v16 = vpack.c.bf16 %v9169_v45, %v9170_v0  ;;  %v6362_v0 = vld [vmem:[%s9053_s6 + $0x40] sm:$0xff]  }
 0x318   :  { %v3663_v62 = vpop.f32.mrf.mxu0  ;;  %5911 = vmatprep.subr.bf16.mxu1 %v6362_v0 }
 0x319   :  { %9158 = vst [vmem:[#allocation9_spill] sm:$0xff] %v8558_v24  ;;  %v8568_v9 = vadd.f32 %v3663_v62, %v9162_v50  ;;  %v9172_v24 = vld [vmem:[#allocation18_spill] sm:$0xff]  ;;  %5912 = vmatpush3.bf16.msra.mxu1 %v6362_v0 }
 0x31a   :  { %v3665_v19 = vpop.f32.mrf.mxu0 }
 0x31b   :  { %9163 = vst [vmem:[#allocation8_spill] sm:$0xff] %v8568_v9  ;;  %v8573_v4 = vadd.f32 %v3665_v19, %v9166_v55  ;;  %v9173_v9 = vld [vmem:[#allocation19_spill] sm:$0xff]  ;;  %v3334_v19 = vadd.f32 %v9175_v44, %v9174_v61  ;;  %v9176_v55 = vld [vmem:[#allocation20_spill] sm:$0xff] }
 0x31c   :  { %v3667_v28 = vpop.f32.mrf.mxu0 }
 0x31d   :  { %9167 = vst [vmem:[#allocation11_spill] sm:$0xff] %v8573_v4  ;;  %v8575_v57 = vadd.f32 %v3667_v28, %v3324_v5 }
 0x31e   :  { %v3671_v58 = vpop.f32.mrf.mxu0  ;;  %4566 = vmatmul.mubr.bf16.gmra.mxu0 %v9171_v16 }
 0x31f   :  { %9168 = vst [vmem:[#allocation4_spill] sm:$0xff] %v8575_v57  ;;  %v8581_v62 = vadd.f32 %v3671_v58, %v9172_v24  ;;  %v8593_v57 = vpop.f32.mrf.mxu1 }
 0x320   :  { %v3673_v50 = vpop.f32.mrf.mxu0 }
 0x321   :  { %v8584_v27 = vadd.f32 %v3673_v50, %v9173_v9  ;;  %v8604_v16 = vpop.f32.mrf.mxu1 }
 0x322   :  { %v3675_v39 = vpop.f32.mrf.mxu0 }
 0x323   :  { %v8589_v4 = vadd.f32 %v3675_v39, %v9176_v55  ;;  %v8612_v44 = vpop.f32.mrf.mxu1 }
 0x324   :  { %v3677_v5 = vpop.f32.mrf.mxu0 }
 0x325   :  { %v8591_v28 = vadd.f32 %v3677_v5, %v3334_v19  ;;  %v9181_v19 = vld [vmem:[#allocation23_spill] sm:$0xff]  ;;  %v8620_v5 = vld [vmem:[%s9053_s6 + $0x38] sm:$0xff]   ;;  %v8626_v0 = vpop.f32.mrf.mxu1 }
 0x326   :  { %v3681_v45 = vpop.f32.mrf.mxu0  ;;  %9183 = vst [vmem:[#allocation12_spill] sm:$0xff] %v8620_v5  ;;  %5917 = vmatprep.subr.bf16.mxu1 %v8620_v5 }
 0x327   :  { %v8596_v24 = vadd.f32 %v3681_v45, %v8339_v2 }
 0x328   :  { %v3683_v58 = vpop.f32.mrf.mxu0 }
 0x329   :  { %9177 = vst [vmem:[#allocation3_spill] sm:$0xff] %v8596_v24  ;;  %v8599_v9 = vadd.f32 %v3683_v58, %v8343_v7  ;;  %v9198_v24 = vld [vmem:[#allocation29_spill] sm:$0xff] }
 0x32a   :  { %v3685_v39 = vpop.f32.mrf.mxu0 }
 0x32b   :  { %9178 = vst [vmem:[#allocation14_spill] sm:$0xff] %v8599_v9  ;;  %v8607_v50 = vadd.f32 %v3685_v39, %v8345_v56  ;;  %v9184_v56 = vld [vmem:[#allocation24_spill] sm:$0xff]  ;;  %v9186_v39 = vld [vmem:[#allocation25_spill] sm:$0xff] }
 0x32c   :  { %v3687_v61 = vpop.f32.mrf.mxu0 }
 0x32d   :  { %9179 = vst [vmem:[#allocation10_spill] sm:$0xff] %v8607_v50  ;;  %v8610_v2 = vadd.f32 %v3687_v61, %v8347_v29 }
 0x32e   :  { %v3691_v7 = vpop.f32.mrf.mxu0 }
 0x32f   :  { %9180 = vst [vmem:[#allocation5_spill] sm:$0xff] %v8610_v2  ;;  %v8615_v55 = vadd.f32 %v3691_v7, %v9181_v19  ;;  %v9188_v7 = vld [vmem:[#allocation26_spill] sm:$0xff] }
 0x330   :  { %v3693_v45 = vpop.f32.mrf.mxu0 }
 0x331   :  { %9182 = vst [vmem:[#allocation2_spill] sm:$0xff] %v8615_v55  ;;  %v8623_v58 = vadd.f32 %v3693_v45, %v9184_v56  ;;  %v8634_v55 = vpop.f32.mrf.mxu1 }
 0x332   :  { %v3695_v29 = vpop.f32.mrf.mxu0 }
 0x333   :  { %9185 = vst [vmem:[#allocation16_spill] sm:$0xff] %v8623_v58  ;;  %v8629_v61 = vadd.f32 %v3695_v29, %v9186_v39  ;;  %v8642_v5 = vpop.f32.mrf.mxu1 }
 0x334   :  { %v3697_v2 = vpop.f32.mrf.mxu0 }
 0x335   :  { %9187 = vst [vmem:[#allocation17_spill] sm:$0xff] %v8629_v61  ;;  %v8632_v19 = vadd.f32 %v3697_v2, %v9188_v7  ;;  %v8650_v7 = vpop.f32.mrf.mxu1  ;;  %v9194_v61 = vld [vmem:[#allocation27_spill] sm:$0xff] }
 0x336   :  { %v3701_v50 = vpop.f32.mrf.mxu0 }
 0x337   :  { %9189 = vst [vmem:[#allocation15_spill] sm:$0xff] %v8632_v19  ;;  %v8637_v9 = vadd.f32 %v3701_v50, %v8364_v11 }
 0x338   :  { %v3703_v45 = vpop.f32.mrf.mxu0 }
 0x339   :  { %9190 = vst [vmem:[#allocation6_spill] sm:$0xff] %v8637_v9  ;;  %v8640_v56 = vadd.f32 %v3703_v45, %v8368_v33  ;;  %v9196_v9 = vld [vmem:[#allocation28_spill] sm:$0xff]  ;;  %v8658_v45 = vpop.f32.mrf.mxu1 }
 0x33a   :  { %v3705_v58 = vpop.f32.mrf.mxu0 }
 0x33b   :  { %9191 = vst [vmem:[#allocation7_spill] sm:$0xff] %v8640_v56  ;;  %v8645_v29 = vadd.f32 %v3705_v58, %v8370_v32 }
 0x33c   :  { %v3707_v39 = vpop.f32.mrf.mxu0 }
 0x33d   :  { %9192 = vst [vmem:[#allocation18_spill] sm:$0xff] %v8645_v29  ;;  %v8648_v2 = vadd.f32 %v3707_v39, %v8372_v43  ;;  %v9200_v29 = vld [vmem:[#allocation30_spill] sm:$0xff]  ;;  %v8666_v39 = vpop.f32.mrf.mxu1 }
 0x33e   :  { %v3711_v19 = vpop.f32.mrf.mxu0 }
 0x33f   :  { %9193 = vst [vmem:[#allocation19_spill] sm:$0xff] %v8648_v2  ;;  %v8653_v11 = vadd.f32 %v3711_v19, %v9194_v61 }
 0x340   :  { %v3713_v50 = vpop.f32.mrf.mxu0 }
 0x341   :  { %9195 = vst [vmem:[#allocation21_spill] sm:$0xff] %v8653_v11  ;;  %v8656_v33 = vadd.f32 %v3713_v50, %v9196_v9  ;;  %v8674_v50 = vpop.f32.mrf.mxu1  ;;  %v9210_v11 = vld [vmem:[#allocation33_spill] sm:$0xff] }
 0x342   :  { %v3715_v56 = vpop.f32.mrf.mxu0 }
 0x343   :  { %9197 = vst [vmem:[#allocation22_spill] sm:$0xff] %v8656_v33  ;;  %v8661_v32 = vadd.f32 %v3715_v56, %v9198_v24 }
 0x344   :  { %v3717_v58 = vpop.f32.mrf.mxu0 }
 0x345   :  { %9199 = vst [vmem:[#allocation20_spill] sm:$0xff] %v8661_v32  ;;  %v8664_v43 = vadd.f32 %v3717_v58, %v9200_v29  ;;  %v8682_v58 = vpop.f32.mrf.mxu1  ;;  %v9206_v32 = vld [vmem:[#allocation31_spill] sm:$0xff] }
 0x346   :  { %v3721_v2 = vpop.f32.mrf.mxu0 }
 0x347   :  { %9201 = vst [vmem:[#allocation23_spill] sm:$0xff] %v8664_v43  ;;  %v8669_v61 = vadd.f32 %v3721_v2, %v8389_v18 }
 0x348   :  { %v3723_v19 = vpop.f32.mrf.mxu0 }
 0x349   :  { %9202 = vst [vmem:[#allocation24_spill] sm:$0xff] %v8669_v61  ;;  %v8672_v9 = vadd.f32 %v3723_v19, %v8393_v38  ;;  %v9208_v61 = vld [vmem:[#allocation32_spill] sm:$0xff]  ;;  %v8690_v19 = vpop.f32.mrf.mxu1 }
 0x34a   :  { %v3725_v33 = vpop.f32.mrf.mxu0 }
 0x34b   :  { %9203 = vst [vmem:[#allocation25_spill] sm:$0xff] %v8672_v9  ;;  %v8677_v24 = vadd.f32 %v3725_v33, %v8395_v31 }
 0x34c   :  { %v3727_v56 = vpop.f32.mrf.mxu0 }
 0x34d   :  { %9204 = vst [vmem:[#allocation26_spill] sm:$0xff] %v8677_v24  ;;  %v8680_v29 = vadd.f32 %v3727_v56, %v8397_v13  ;;  %v9212_v24 = vld [vmem:[#allocation34_spill] sm:$0xff]  ;;  %v8698_v56 = vpop.f32.mrf.mxu1 }
 0x34e   :  { %v3731_v43 = vpop.f32.mrf.mxu0 }
 0x34f   :  { %9205 = vst [vmem:[#allocation27_spill] sm:$0xff] %v8680_v29  ;;  %v8685_v18 = vadd.f32 %v3731_v43, %v9206_v32 }
 0x350   :  { %v3733_v2 = vpop.f32.mrf.mxu0 }
 0x351   :  { %9207 = vst [vmem:[#allocation28_spill] sm:$0xff] %v8685_v18  ;;  %v8688_v38 = vadd.f32 %v3733_v2, %v9208_v61  ;;  %v8706_v2 = vpop.f32.mrf.mxu1 }
 0x352   :  { %v3735_v9 = vpop.f32.mrf.mxu0 }
 0x353   :  { %9209 = vst [vmem:[#allocation29_spill] sm:$0xff] %v8688_v38  ;;  %v8693_v31 = vadd.f32 %v3735_v9, %v9210_v11 }
 0x354   :  { %v3737_v33 = vpop.f32.mrf.mxu0 }
 0x355   :  { %9211 = vst [vmem:[#allocation30_spill] sm:$0xff] %v8693_v31  ;;  %v8696_v13 = vadd.f32 %v3737_v33, %v9212_v24  ;;  %v8714_v33 = vpop.f32.mrf.mxu1 }
 0x356   :  { %v3741_v29 = vpop.f32.mrf.mxu0 }
 0x357   :  { %9213 = vst [vmem:[#allocation31_spill] sm:$0xff] %v8696_v13  ;;  %v8701_v32 = vadd.f32 %v3741_v29, %v8414_v20 }
 0x358   :  { %v3743_v43 = vpop.f32.mrf.mxu0 }
 0x359   :  { %9214 = vst [vmem:[#allocation32_spill] sm:$0xff] %v8701_v32  ;;  %v8704_v61 = vadd.f32 %v3743_v43, %v8418_v59  ;;  %v8722_v43 = vpop.f32.mrf.mxu1 }
 0x35a   :  { %v3745_v38 = vpop.f32.mrf.mxu0  ;;  %9220 = vst [vmem:[#allocation43_spill] sm:$0xff] %v8722_v43 }
 0x35b   :  { %9215 = vst [vmem:[#allocation33_spill] sm:$0xff] %v8704_v61  ;;  %v8709_v11 = vadd.f32 %v3745_v38, %v8420_v12 }
 0x35c   :  { %v3747_v9 = vpop.f32.mrf.mxu0 }
 0x35d   :  { %9216 = vst [vmem:[#allocation34_spill] sm:$0xff] %v8709_v11  ;;  %v8712_v24 = vadd.f32 %v3747_v9, %v8422_v15  ;;  %v8730_v9 = vpop.f32.mrf.mxu1 }
 0x35e   :  { %v3751_v13 = vpop.f32.mrf.mxu0  ;;  %9223 = vst [vmem:[#allocation46_spill] sm:$0xff] %v8730_v9 }
 0x35f   :  { %9217 = vst [vmem:[#allocation40_spill] sm:$0xff] %v8712_v24  ;;  %v8717_v20 = vadd.f32 %v3751_v13, %v8425_v53  ;;  %v4168_v53 = vadd.f32 %v8438_v48, %v8442_v22  ;;  %v9224_v13 = vld [vmem:[#allocation35_spill] sm:$0xff]  ;;  %v8736_v11 = vpop.f32.mrf.mxu1 }
 0x360   :  { %v3753_v29 = vpop.f32.mrf.mxu0 }
 0x361   :  { %9218 = vst [vmem:[#allocation41_spill] sm:$0xff] %v8717_v20  ;;  %v8720_v59 = vadd.f32 %v3753_v29, %v8429_v17  ;;  %v4169_v17 = vadd.f32 %v9224_v13, %v8449_v41  ;;  %v8742_v48 = vpop.f32.mrf.mxu1 }
 0x362   :  { %v3755_v61 = vpop.f32.mrf.mxu0 }
 0x363   :  { %9219 = vst [vmem:[#allocation42_spill] sm:$0xff] %v8720_v59  ;;  %v8725_v12 = vadd.f32 %v3755_v61, %v8431_v54  ;;  %v9225_v61 = vld [vmem:[#allocation37_spill] sm:$0xff] }
 0x364   :  { %v3757_v38 = vpop.f32.mrf.mxu0 }
 0x365   :  { %9221 = vst [vmem:[#allocation44_spill] sm:$0xff] %v8725_v12  ;;  %v8728_v15 = vadd.f32 %v3757_v38, %v8436_v42  ;;  %v9226_v12 = vld [vmem:[#allocation36_spill] sm:$0xff]  ;;  %v9227_v42 = vld [vmem:[#allocation39_spill] sm:$0xff]  ;;  %v9228_v38 = vld [vmem:[#allocation38_spill] sm:$0xff] }
 0x366   :  { %v4417_v24 = vpop.f32.mrf.mxu0  ;;  %v4170_v32 = vadd.f32 %v9226_v12, %v9225_v61 }
 0x367   :  { %9222 = vst [vmem:[#allocation45_spill] sm:$0xff] %v8728_v15  ;;  %v4576_v59 = vadd.f32 %v4417_v24, %v4168_v53  ;;  %v4171_v15 = vadd.f32 %v9228_v38, %v9227_v42 }
 0x368   :  { %v4419_v29 = vpop.f32.mrf.mxu0 }
 0x369   :  { %v4577_v20 = vadd.f32 %v4419_v29, %v4169_v17  ;;  %v8746_v17 = vpop.f32.mrf.mxu1 }
 0x36a   :  { %v4421_v54 = vpop.f32.mrf.mxu0 }
 0x36b   :  { %v4640_v31 = vmax.f32 %v4576_v59, %v4577_v20  ;;  %v4578_v9 = vadd.f32 %v4421_v54, %v4170_v32  ;;  %v8750_v32 = vpop.f32.mrf.mxu1  ;;  %v4176_v59 = vadd.f32 %v8474_v1, %v8480_v30  ;;  %v4178_v1 = vadd.f32 %v8492_v23, %v8495_v34 }
 0x36c   :  { %v4423_v18 = vpop.f32.mrf.mxu0  ;;  %v4179_v30 = vadd.f32 %v8497_v10, %v8500_v36 }
 0x36d   :  { %v4579_v43 = vadd.f32 %v4423_v18, %v4171_v15  ;;  %v8761_v54 = vpop.f32.mrf.mxu1 }
 0x36e   :  { %v4427_v22 = vpop.f32.mrf.mxu0 }
 0x36f   :  { %v4641_v41 = vmax.f32 %v4578_v9, %v4579_v43  ;;  %v4580_v24 = vadd.f32 %v4427_v22, %v8465_v63  ;;  %v4177_v63 = vadd.f32 %v8487_v49, %v8490_v25 }
 0x370   :  { %v4429_v53 = vpop.f32.mrf.mxu0 }
 0x371   :  { %v4581_v13 = vadd.f32 %v4429_v53, %v8468_v46  ;;  %v8759_v46 = vld [vmem:[%s9054_s5] ss:$0 sm:$0xff] }
 0x372   :  { %v4431_v29 = vpop.f32.mrf.mxu0 }
 0x373   :  { %v4642_v12 = vmax.f32 %v4580_v24, %v4581_v13  ;;  %v4582_v61 = vadd.f32 %v4431_v29, %v8471_v35  ;;  %v8769_v13 = vpop.f32.mrf.mxu1 }
 0x374   :  { %v4433_v42 = vpop.f32.mrf.mxu0 }
 0x375   :  { %v4583_v20 = vadd.f32 %v4433_v42, %v8477_v52  ;;  %v4679_v52 = vadd.f32 %v8759_v46, %v4640_v31  ;;  %v4680_v42 = vadd.f32 %v8759_v46, %v4641_v41 }
 0x376   :  { %v4437_v18 = vpop.f32.mrf.mxu0 }
 0x377   :  { %v4643_v43 = vmax.f32 %v4582_v61, %v4583_v20  ;;  %v4584_v35 = vadd.f32 %v4437_v18, %v4176_v59  ;;  %v4711_v29 = vmax.f32 %v4679_v52, 0.0  ;;  %v8777_v59 = vpop.f32.mrf.mxu1 }
 0x378   :  { %v4439_v15 = vpop.f32.mrf.mxu0 }
 0x379   :  { %v4585_v9 = vadd.f32 %v4439_v15, %v4177_v63  ;;  %v4681_v63 = vadd.f32 %v8759_v46, %v4642_v12  ;;  %v8789_v12 = vpop.f32.mrf.mxu1 }
 0x37a   :  { %v4441_v38 = vpop.f32.mrf.mxu0 }
 0x37b   :  { %v4644_v49 = vmax.f32 %v4584_v35, %v4585_v9  ;;  %v4586_v24 = vadd.f32 %v4441_v38, %v4178_v1  ;;  %v4712_v35 = vmax.f32 %v4680_v42, 0.0 }
 0x37c   :  { %v4443_v25 = vpop.f32.mrf.mxu0 }
 0x37d   :  { %v4683_v22 = vadd.f32 %v8759_v46, %v4644_v49  ;;  %v4587_v53 = vadd.f32 %v4443_v25, %v4179_v30  ;;  %v4185_v49 = vadd.f32 %v8604_v16, %v8524_v8  ;;  %v4713_v25 = vmax.f32 %v4681_v63, 0.0  ;;  %v8799_v16 = vpop.f32.mrf.mxu1 }
 0x37e   :  { %v4447_v61 = vpop.f32.mrf.mxu0  ;;  %v4186_v8 = vadd.f32 %v8612_v44, %v8532_v3  ;;  %v4188_v3 = vadd.f32 %v8634_v55, %v8538_v21  ;;  %v4189_v44 = vadd.f32 %v8642_v5, %v8545_v60 }
 0x37f   :  { %v4715_v31 = vmax.f32 %v4683_v22, 0.0  ;;  %v4645_v20 = vmax.f32 %v4586_v24, %v4587_v53  ;;  %v4588_v18 = vadd.f32 %v4447_v61, %v8506_v26  ;;  %v4682_v24 = vadd.f32 %v8759_v46, %v4643_v43 }
 0x380   :  { %v4449_v23 = vpop.f32.mrf.mxu0  ;;  %v4187_v43 = vadd.f32 %v8626_v0, %v8534_v14 }
 0x381   :  { %v4684_v34 = vadd.f32 %v8759_v46, %v4645_v20  ;;  %v4589_v10 = vadd.f32 %v4449_v23, %v8509_v37  ;;  %v8775_v36 = vmax.f32 %v4711_v29, %v4715_v31  ;;  %v4184_v37 = vadd.f32 %v8593_v57, %v8519_v51 }
 0x382   :  { %v4451_v15 = vpop.f32.mrf.mxu0  ;;  %v4714_v20 = vmax.f32 %v4682_v24, 0.0 }
 0x383   :  { %v4716_v9 = vmax.f32 %v4684_v34, 0.0  ;;  %v4646_v52 = vmax.f32 %v4588_v18, %v4589_v10  ;;  %v4590_v41 = vadd.f32 %v4451_v15, %v8512_v40 }
 0x384   :  { %v4453_v38 = vpop.f32.mrf.mxu0 }
 0x385   :  { %v4685_v26 = vadd.f32 %v8759_v46, %v4646_v52  ;;  %v4591_v1 = vadd.f32 %v4453_v38, %v8516_v6  ;;  %v8783_v30 = vmax.f32 %v4712_v35, %v4716_v9  ;;  %v8805_v35 = vpop.f32.mrf.mxu1 }
 0x386   :  { %v4457_v22 = vpop.f32.mrf.mxu0 }
 0x387   :  { %v4717_v40 = vmax.f32 %v4685_v26, 0.0  ;;  %v4647_v53 = vmax.f32 %v4590_v41, %v4591_v1  ;;  %v4759_v29 = vpack.c.bf16 %v8783_v30, %v8775_v36  ;;  %v4592_v51 = vadd.f32 %v4457_v22, %v4184_v37  ;;  %v8813_v26 = vpop.f32.mrf.mxu1  ;;  %v9245_v30 = vld [vmem:[#allocation6_spill] sm:$0xff] }
 0x388   :  { %v4459_v6 = vpop.f32.mrf.mxu0  ;;  %v4190_v37 = vadd.f32 %v8650_v7, %v8550_v47 }
 0x389   :  { %v8794_v61 = vmax.f32 %v4713_v25, %v4717_v40  ;;  %v4686_v42 = vadd.f32 %v8759_v46, %v4647_v53  ;;  %v4593_v57 = vadd.f32 %v4459_v6, %v4185_v49  ;;  %v9229_v49 = vld [vmem:[#allocation13_spill] sm:$0xff]  ;;  %v8819_v5 = vpop.f32.mrf.mxu1  ;;  %v9231_v6 = vld [vmem:[#allocation8_spill] sm:$0xff] }
 0x38a   :  { %v4461_v31 = vpop.f32.mrf.mxu0  ;;  %v4191_v25 = vadd.f32 %v8658_v45, %v9229_v49  ;;  %v9230_v40 = vld [vmem:[#allocation9_spill] sm:$0xff] }
 0x38b   :  { %v4718_v18 = vmax.f32 %v4686_v42, 0.0  ;;  %v4648_v23 = vmax.f32 %v4592_v51, %v4593_v57  ;;  %v4594_v63 = vadd.f32 %v4461_v31, %v4186_v8  ;;  %v4192_v53 = vadd.f32 %v8666_v39, %v9230_v40  ;;  %v8825_v7 = vpop.f32.mrf.mxu1  ;;  %v9232_v31 = vld [vmem:[#allocation11_spill] sm:$0xff] }
 0x38c   :  { %v4463_v34 = vpop.f32.mrf.mxu0  ;;  %v4193_v42 = vadd.f32 %v8674_v50, %v9231_v6 }
 0x38d   :  { %v8803_v10 = vmax.f32 %v4714_v20, %v4718_v18  ;;  %v4595_v15 = vadd.f32 %v4463_v34, %v4187_v43  ;;  %v4194_v43 = vadd.f32 %v8682_v58, %v9232_v31  ;;  %v9233_v20 = vld [vmem:[#allocation4_spill] sm:$0xff]  ;;  %v4687_v34 = vadd.f32 %v8759_v46, %v4648_v23 }
 0x38e   :  { %v4467_v9 = vpop.f32.mrf.mxu0  ;;  %v4195_v18 = vadd.f32 %v8690_v19, %v9233_v20 }
 0x38f   :  { %v4760_v14 = vpack.c.bf16 %v8803_v10, %v8794_v61  ;;  %v4649_v0 = vmax.f32 %v4594_v63, %v4595_v15  ;;  %v4596_v41 = vadd.f32 %v4467_v9, %v4188_v3  ;;  %v4196_v3 = vadd.f32 %v8698_v56, %v8581_v62 }
 0x390   :  { %v4469_v52 = vpop.f32.mrf.mxu0  ;;  %v4198_v62 = vadd.f32 %v8714_v33, %v8589_v4  ;;  %v9237_v33 = vld [vmem:[#allocation14_spill] sm:$0xff] }
 0x391   :  { %v4597_v38 = vadd.f32 %v4469_v52, %v4189_v44  ;;  %v4197_v44 = vadd.f32 %v8706_v2, %v8584_v27  ;;  %v8837_v52 = vpop.f32.mrf.mxu1  ;;  %v4688_v19 = vadd.f32 %v8759_v46, %v4649_v0  ;;  %v4201_v31 = vadd.f32 %v8736_v11, %v9237_v33  ;;  %v6365_v33 = vld [vmem:[%s9053_s6 + $0x28] sm:$0xff]  }
 0x392   :  { %v4471_v1 = vpop.f32.mrf.mxu0 }
 0x393   :  { %v4650_v21 = vmax.f32 %v4596_v41, %v4597_v38  ;;  %v4598_v22 = vadd.f32 %v4471_v1, %v4190_v37  ;;  %v4719_v41 = vmax.f32 %v4687_v34, 0.0  ;;  %v8843_v56 = vpop.f32.mrf.mxu1  ;;  %v4720_v0 = vmax.f32 %v4688_v19, 0.0  ;;  %v9239_v19 = vld [vmem:[#allocation5_spill] sm:$0xff] }
 0x394   :  { %v4473_v55 = vpop.f32.mrf.mxu0 }
 0x395   :  { %v4599_v60 = vadd.f32 %v4473_v55, %v4191_v25  ;;  %v4689_v27 = vadd.f32 %v8759_v46, %v4650_v21  ;;  %v8853_v21 = vpop.f32.mrf.mxu1 }
 0x396   :  { %v4477_v24 = vpop.f32.mrf.mxu0 }
 0x397   :  { %v4651_v51 = vmax.f32 %v4598_v22, %v4599_v60  ;;  %v4600_v8 = vadd.f32 %v4477_v24, %v4192_v53  ;;  %v9234_v22 = vld [vmem:[#allocation43_spill] sm:$0xff]  ;;  %v8859_v11 = vpop.f32.mrf.mxu1 }
 0x398   :  { %v4479_v57 = vpop.f32.mrf.mxu0  ;;  %v4199_v60 = vadd.f32 %v9234_v22, %v8591_v28 }
 0x399   :  { %v4601_v47 = vadd.f32 %v4479_v57, %v4193_v42  ;;  %v4690_v28 = vadd.f32 %v8759_v46, %v4651_v51 }
 0x39a   :  { %v4481_v45 = vpop.f32.mrf.mxu0 }
 0x39b   :  { %v4652_v63 = vmax.f32 %v4600_v8, %v4601_v47  ;;  %v4602_v50 = vadd.f32 %v4481_v45, %v4194_v43  ;;  %v9235_v47 = vld [vmem:[#allocation3_spill] sm:$0xff]  ;;  %v9236_v45 = vld [vmem:[#allocation46_spill] sm:$0xff]  ;;  %v4721_v43 = vmax.f32 %v4689_v27, 0.0  ;;  %v4722_v51 = vmax.f32 %v4690_v28, 0.0 }
 0x39c   :  { %v4483_v39 = vpop.f32.mrf.mxu0  ;;  %v4200_v4 = vadd.f32 %v9236_v45, %v9235_v47  ;;  %v9244_v47 = vld [vmem:[#allocation15_spill] sm:$0xff] }
 0x39d   :  { %v4691_v15 = vadd.f32 %v8759_v46, %v4652_v63  ;;  %v4603_v9 = vadd.f32 %v4483_v39, %v4195_v18  ;;  %v4207_v45 = vadd.f32 %v8777_v59, %v9244_v47 }
 0x39e   :  { %v4487_v58 = vpop.f32.mrf.mxu0 }
 0x39f   :  { %v4723_v38 = vmax.f32 %v4691_v15, 0.0  ;;  %v4653_v23 = vmax.f32 %v4602_v50, %v4603_v9  ;;  %v4604_v49 = vadd.f32 %v4487_v58, %v4196_v3 }
 0x3a0   :  { %v4489_v1 = vpop.f32.mrf.mxu0 }
 0x3a1   :  { %v4692_v37 = vadd.f32 %v8759_v46, %v4653_v23  ;;  %v4605_v25 = vadd.f32 %v4489_v1, %v4197_v44  ;;  %v4747_v55 = vmax.f32 %v4719_v41, %v4723_v38  ;;  %v9238_v44 = vld [vmem:[#allocation10_spill] sm:$0xff]  ;;  %v4203_v38 = vadd.f32 %v8746_v17, %v9239_v19  ;;  %v6364_v17 = vld [vmem:[%s9053_s6 + $0x30] sm:$0xff]   ;;  %v6367_v19 = vld [vmem:[%s9053_s6 + $0x18] sm:$0xff]  }
 0x3a2   :  { %v4491_v2 = vpop.f32.mrf.mxu0  ;;  %v4202_v58 = vadd.f32 %v8742_v48, %v9238_v44  ;;  %v9241_v48 = vld [vmem:[#allocation16_spill] sm:$0xff]  ;;  %v9248_v44 = vld [vmem:[#allocation19_spill] sm:$0xff] }
 0x3a3   :  { %v4724_v24 = vmax.f32 %v4692_v37, 0.0  ;;  %v4654_v40 = vmax.f32 %v4604_v49, %v4605_v25  ;;  %v4606_v42 = vadd.f32 %v4491_v2, %v4198_v62  ;;  %v8863_v62 = vpop.f32.mrf.mxu1  ;;  %v9240_v2 = vld [vmem:[#allocation2_spill] sm:$0xff] }
 0x3a4   :  { %v4493_v53 = vpop.f32.mrf.mxu0  ;;  %v4204_v22 = vadd.f32 %v8750_v32, %v9240_v2  ;;  %v9243_v32 = vld [vmem:[#allocation17_spill] sm:$0xff] }
 0x3a5   :  { %v4693_v6 = vadd.f32 %v8759_v46, %v4654_v40  ;;  %v4607_v57 = vadd.f32 %v4493_v53, %v4199_v60  ;;  %v4748_v8 = vmax.f32 %v4720_v0, %v4724_v24  ;;  %v4205_v60 = vadd.f32 %v8761_v54, %v9241_v48 }
 0x3a6   :  { %v4497_v20 = vpop.f32.mrf.mxu0  ;;  %v4206_v54 = vadd.f32 %v8769_v13, %v9243_v32  ;;  %v4208_v13 = vadd.f32 %v8789_v12, %v9245_v30  ;;  %v9252_v32 = vld [vmem:[#allocation23_spill] sm:$0xff] }
 0x3a7   :  { %v4725_v18 = vmax.f32 %v4693_v6, 0.0  ;;  %v4655_v34 = vmax.f32 %v4606_v42, %v4607_v57  ;;  %v4761_v63 = vpack.c.bf16 %v4748_v8, %v4747_v55  ;;  %v4608_v9 = vadd.f32 %v4497_v20, %v4200_v4  ;;  %v8872_v42 = vpop.f32.mrf.mxu1  ;;  %v9242_v57 = vld [vmem:[#allocation12_spill] sm:$0xff] }
 0x3a8   :  { %v4499_v39 = vpop.f32.mrf.mxu0 }
 0x3a9   :  { %v4749_v15 = vmax.f32 %v4721_v43, %v4725_v18  ;;  %v4694_v50 = vadd.f32 %v8759_v46, %v4655_v34  ;;  %v4609_v3 = vadd.f32 %v4499_v39, %v4201_v31  ;;  %5913 = vmatprep.mubr.bf16.mxu1 %v4761_v63  ;;  %v8889_v28 = vpop.f32.mrf.mxu1  ;;  %v6366_v34 = vld [vmem:[%s9053_s6 + $0x20] sm:$0xff]  }
 0x3aa   :  { %v4501_v41 = vpop.f32.mrf.mxu0 }
 0x3ab   :  { %v4726_v23 = vmax.f32 %v4694_v50, 0.0  ;;  %v4656_v1 = vmax.f32 %v4608_v9, %v4609_v3  ;;  %v4610_v25 = vadd.f32 %v4501_v41, %v4202_v58  ;;  %v8900_v50 = vpop.f32.mrf.mxu1  ;;  %v9247_v3 = vld [vmem:[#allocation18_spill] sm:$0xff] }
 0x3ac   :  { %v4503_v37 = vpop.f32.mrf.mxu0  ;;  %v4210_v12 = vadd.f32 %v8805_v35, %v9247_v3  ;;  %v9250_v35 = vld [vmem:[#allocation22_spill] sm:$0xff] }
 0x3ad   :  { %v4750_v49 = vmax.f32 %v4722_v51, %v4726_v23  ;;  %v4611_v55 = vadd.f32 %v4503_v37, %v4203_v38  ;;  %v4695_v58 = vadd.f32 %v8759_v46, %v4656_v1  ;;  %v6370_v3 = vld [vmem:[%s9053_s6] sm:$0xff]  }
 0x3ae   :  { %v4507_v27 = vpop.f32.mrf.mxu0 }
 0x3af   :  { %v4762_v0 = vpack.c.bf16 %v4750_v49, %v4749_v15  ;;  %v4657_v24 = vmax.f32 %v4610_v25, %v4611_v55  ;;  %v4612_v53 = vadd.f32 %v4507_v27, %v4204_v22  ;;  %v9249_v49 = vld [vmem:[#allocation21_spill] sm:$0xff]  ;;  %v4213_v55 = vadd.f32 %v8825_v7, %v9250_v35 }
 0x3b0   :  { %v4509_v40 = vpop.f32.mrf.mxu0  ;;  %v4212_v25 = vadd.f32 %v8819_v5, %v9249_v49  ;;  %v4727_v27 = vmax.f32 %v4695_v58, 0.0  ;;  %v6371_v35 = vld [vmem:[%s9053_s6 + $0xb8] sm:$0xff]  }
 0x3b1   :  { %v4613_v6 = vadd.f32 %v4509_v40, %v4205_v60  ;;  %5914 = vmatmul.mubr.bf16.vlgmr.msra.gmra.mxu1 %v4762_v0  ;;  %v4696_v2 = vadd.f32 %v8759_v46, %v4657_v24  ;;  %v6368_v60 = vld [vmem:[%s9053_s6 + $0x10] sm:$0xff]  }
 0x3b2   :  { %5918 = vmatpush3.bf16.msra.mxu1 %v9242_v57  ;;  %v4511_v8 = vpop.f32.mrf.mxu0  ;;  %5933 = vmatprep.mubr.bf16.mxu1 %v4759_v29  ;;  %v9246_v29 = vld [vmem:[#allocation7_spill] sm:$0xff] }
 0x3b3   :  { %v4658_v4 = vmax.f32 %v4612_v53, %v4613_v6  ;;  %5919 = vmatprep.subr.bf16.mxu1 %v6364_v17  ;;  %v8885_v43 = vadd.f32 %v4511_v8, %v4206_v54  ;;  %v4209_v59 = vadd.f32 %v8799_v16, %v9246_v29  ;;  %v4211_v16 = vadd.f32 %v8813_v26, %v9248_v44  ;;  %v8915_v26 = vpop.f32.mrf.mxu1  ;;  %v9251_v53 = vld [vmem:[#allocation20_spill] sm:$0xff]  ;;  %v9254_v29 = vld [vmem:[#allocation25_spill] sm:$0xff] }
 0x3b4   :  { %v4513_v31 = vpop.f32.mrf.mxu0  ;;  %v4214_v6 = vadd.f32 %v8837_v52, %v9251_v53  ;;  %v4215_v54 = vadd.f32 %v8843_v56, %v9252_v32  ;;  %v4728_v47 = vmax.f32 %v4696_v2, 0.0  ;;  %v4217_v56 = vadd.f32 %v8859_v11, %v9254_v29  ;;  %v9260_v32 = vld [vmem:[#allocation31_spill] sm:$0xff] }
 0x3b5   :  { %v8887_v20 = vadd.f32 %v4513_v31, %v4207_v45  ;;  %v8926_v57 = vpop.f32.mrf.mxu1  ;;  %v4697_v24 = vadd.f32 %v8759_v46, %v4658_v4  ;;  %v6369_v31 = vld [vmem:[%s9053_s6 + $0x8] sm:$0xff]   ;;  %v9253_v4 = vld [vmem:[#allocation24_spill] sm:$0xff] }
 0x3b6   :  { %5920 = vmatpush3.bf16.msra.mxu1 %v6364_v17  ;;  %v4517_v36 = vpop.f32.mrf.mxu0 }
 0x3b7   :  { %v4659_v18 = vmax.f32 %v8885_v43, %v8887_v20  ;;  %5921 = vmatprep.subr.bf16.mxu1 %v6365_v33  ;;  %v4616_v39 = vadd.f32 %v4517_v36, %v4208_v13  ;;  %v4216_v13 = vadd.f32 %v8853_v21, %v9253_v4 }
 0x3b8   :  { %v4519_v63 = vpop.f32.mrf.mxu0 }
 0x3b9   :  { %v4617_v15 = vadd.f32 %v4519_v63, %v4209_v59  ;;  %v4149_v59 = vpop.f32.mrf.mxu1 }
 0x3ba   :  { %5922 = vmatpush3.bf16.msra.mxu1 %v6365_v33  ;;  %v4521_v9 = vpop.f32.mrf.mxu0 }
 0x3bb   :  { %v4660_v41 = vmax.f32 %v4616_v39, %v4617_v15  ;;  %5923 = vmatprep.subr.bf16.mxu1 %v6366_v34  ;;  %v4618_v23 = vadd.f32 %v4521_v9, %v4210_v12  ;;  %v4698_v39 = vadd.f32 %v8759_v46, %v4659_v18  ;;  %v4151_v18 = vpop.f32.mrf.mxu1 }
 0x3bc   :  { %v4523_v38 = vpop.f32.mrf.mxu0 }
 0x3bd   :  { %v4699_v51 = vadd.f32 %v8759_v46, %v4660_v41  ;;  %v4619_v37 = vadd.f32 %v4523_v38, %v4211_v16  ;;  %v9255_v41 = vld [vmem:[#allocation26_spill] sm:$0xff] }
 0x3be   :  { %5924 = vmatpush3.bf16.msra.mxu1 %v6366_v34  ;;  %v4527_v1 = vpop.f32.mrf.mxu0  ;;  %v4729_v34 = vmax.f32 %v4697_v24, 0.0  ;;  %v9259_v24 = vld [vmem:[#allocation30_spill] sm:$0xff] }
 0x3bf   :  { %v4731_v22 = vmax.f32 %v4699_v51, 0.0  ;;  %v4661_v48 = vmax.f32 %v4618_v23, %v4619_v37  ;;  %5925 = vmatprep.subr.bf16.mxu1 %v6367_v19  ;;  %v4620_v17 = vadd.f32 %v4527_v1, %v4212_v25  ;;  %v9256_v51 = vld [vmem:[#allocation27_spill] sm:$0xff]  ;;  %v4730_v37 = vmax.f32 %v4698_v39, 0.0  ;;  %v9264_v39 = vld [vmem:[#allocation40_spill] sm:$0xff] }
 0x3c0   :  { %v4529_v0 = vpop.f32.mrf.mxu0  ;;  %v4219_v23 = vadd.f32 %v8872_v42, %v9256_v51  ;;  %v9258_v42 = vld [vmem:[#allocation29_spill] sm:$0xff] }
 0x3c1   :  { %v4700_v5 = vadd.f32 %v8759_v46, %v4661_v48  ;;  %v4621_v40 = vadd.f32 %v4529_v0, %v4213_v55  ;;  %v8922_v7 = vmax.f32 %v4727_v27, %v4731_v22  ;;  %v9257_v48 = vld [vmem:[#allocation28_spill] sm:$0xff]  ;;  %v4221_v0 = vadd.f32 %v8900_v50, %v9258_v42 }
 0x3c2   :  { %5926 = vmatpush3.bf16.msra.mxu1 %v6367_v19  ;;  %v4531_v8 = vpop.f32.mrf.mxu0  ;;  %v4218_v19 = vadd.f32 %v8863_v62, %v9255_v41  ;;  %v4153_v62 = vpop.f32.mrf.mxu1 }
 0x3c3   :  { %v4732_v45 = vmax.f32 %v4700_v5, 0.0  ;;  %v4662_v33 = vmax.f32 %v4620_v17, %v4621_v40  ;;  %5927 = vmatprep.subr.bf16.mxu1 %v6368_v60  ;;  %v4622_v20 = vadd.f32 %v4531_v8, %v4214_v6  ;;  %v6372_v40 = vld [vmem:[%s9053_s6 + $0xb0] sm:$0xff]   ;;  %v4222_v8 = vadd.f32 %v8915_v26, %v9259_v24 }
 0x3c4   :  { %v4533_v43 = vpop.f32.mrf.mxu0 }
 0x3c5   :  { %v4701_v52 = vadd.f32 %v8759_v46, %v4662_v33  ;;  %v4623_v36 = vadd.f32 %v4533_v43, %v4215_v54  ;;  %v4752_v30 = vmax.f32 %v4728_v47, %v4732_v45  ;;  %v4223_v54 = vadd.f32 %v8926_v57, %v9260_v32  ;;  %v6373_v45 = vld [vmem:[%s9053_s6 + $0xa8] sm:$0xff]   ;;  %v9261_v43 = vld [vmem:[#allocation32_spill] sm:$0xff]  ;;  %v6374_v57 = vld [vmem:[%s9053_s6 + $0xa0] sm:$0xff]  }
 0x3c6   :  { %5928 = vmatpush3.bf16.msra.mxu1 %v6368_v60  ;;  %v4537_v63 = vpop.f32.mrf.mxu0  ;;  %v4220_v60 = vadd.f32 %v8889_v28, %v9257_v48  ;;  %v4155_v28 = vpop.f32.mrf.mxu1  ;;  %v9267_v48 = vld [vmem:[#allocation44_spill] sm:$0xff] }
 0x3c7   :  { %v4733_v15 = vmax.f32 %v4701_v52, 0.0  ;;  %v4663_v9 = vmax.f32 %v4622_v20, %v4623_v36  ;;  %5929 = vmatprep.subr.bf16.mxu1 %v6369_v31  ;;  %v4763_v12 = vpack.c.bf16 %v4752_v30, %v8922_v7  ;;  %v4624_v16 = vadd.f32 %v4537_v63, %v4216_v13  ;;  %v9262_v20 = vld [vmem:[#allocation33_spill] sm:$0xff] }
 0x3c8   :  { %v4539_v44 = vpop.f32.mrf.mxu0  ;;  %v4159_v10 = vpop.f32.mrf.mxu1  ;;  %v4224_v52 = vadd.f32 %v4149_v59, %v9261_v43  ;;  %v4225_v36 = vadd.f32 %v4151_v18, %v9262_v20 }
 0x3c9   :  { %v8944_v21 = vmax.f32 %v4729_v34, %v4733_v15  ;;  %v4702_v11 = vadd.f32 %v8759_v46, %v4663_v9  ;;  %v4625_v58 = vadd.f32 %v4539_v44, %v4217_v56  ;;  %v9263_v34 = vld [vmem:[#allocation34_spill] sm:$0xff]  ;;  %v4227_v15 = vadd.f32 %v4155_v28, %v9264_v39 }
 0x3ca   :  { %5930 = vmatpush3.bf16.msra.mxu1 %v6369_v31  ;;  %v4541_v38 = vpop.f32.mrf.mxu0  ;;  %v4161_v29 = vpop.f32.mrf.mxu1  ;;  %v4226_v63 = vadd.f32 %v4153_v62, %v9263_v34 }
 0x3cb   :  { %v4734_v49 = vmax.f32 %v4702_v11, 0.0  ;;  %v4664_v25 = vmax.f32 %v4624_v16, %v4625_v58  ;;  %5931 = vmatprep.subr.bf16.mxu1 %v6370_v3  ;;  %v4626_v27 = vadd.f32 %v4541_v38, %v4218_v19  ;;  %v9265_v58 = vld [vmem:[#allocation41_spill] sm:$0xff]  ;;  %v9266_v19 = vld [vmem:[#allocation42_spill] sm:$0xff] }
 0x3cc   :  { %v4543_v55 = vpop.f32.mrf.mxu0  ;;  %v4228_v41 = vadd.f32 %v4159_v10, %v9265_v58  ;;  %v4229_v18 = vadd.f32 %v4161_v29, %v9266_v19  ;;  %v4163_v38 = vpop.f32.mrf.mxu1  ;;  %v6378_v10 = vld [vmem:[%s9053_s6 + $0x80] sm:$0xff]  }
 0x3cd   :  { %v8954_v1 = vmax.f32 %v4730_v37, %v4734_v49  ;;  %v4627_v2 = vadd.f32 %v4543_v55, %v4219_v23  ;;  %v4703_v59 = vadd.f32 %v8759_v46, %v4664_v25  ;;  %v6386_v29 = vld [vmem:[%s9053_s6 + $0xc0] sm:$0xff]  }
 0x3ce   :  { %5932 = vmatpush3.bf16.msra.mxu1 %v6370_v3  ;;  %v4547_v22 = vpop.f32.mrf.mxu0  ;;  %v6375_v3 = vld [vmem:[%s9053_s6 + $0x98] sm:$0xff]   ;;  %v4165_v42 = vpop.f32.mrf.mxu1 }
 0x3cf   :  { %v4764_v5 = vpack.c.bf16 %v8954_v1, %v8944_v21  ;;  %v4665_v17 = vmax.f32 %v4626_v27, %v4627_v2  ;;  %5937 = vmatprep.subr.bf16.mxu1 %v6371_v35  ;;  %v4628_v53 = vadd.f32 %v4547_v22, %v4220_v60  ;;  %v4735_v23 = vmax.f32 %v4703_v59, 0.0  ;;  %v6383_v21 = vld [vmem:[%s9053_s6 + $0xd8] sm:$0xff]   ;;  %v6384_v1 = vld [vmem:[%s9053_s6 + $0xd0] sm:$0xff]  }
 0x3d0   :  { %v4549_v7 = vpop.f32.mrf.mxu0  ;;  %v4230_v60 = vadd.f32 %v4163_v38, %v9267_v48  ;;  %v5856_v38 = vld [vmem:[%s9055_s7] ss:$0 sm:$0xff] }
 0x3d1   :  { %v4629_v6 = vadd.f32 %v4549_v7, %v4221_v0  ;;  %5934 = vmatmul.mubr.bf16.vlgmr.msra.gmra.mxu1 %v4760_v14  ;;  %v4704_v37 = vadd.f32 %v8759_v46, %v4665_v17 }
 0x3d2   :  { %5938 = vmatpush3.bf16.msra.mxu1 %v6371_v35  ;;  %5953 = vmatprep.mubr.bf16.mxu1 %v4763_v12  ;;  %v4551_v50 = vpop.f32.mrf.mxu0  ;;  %v6376_v35 = vld [vmem:[%s9053_s6 + $0x90] sm:$0xff]  }
 0x3d3   :  { %v4666_v47 = vmax.f32 %v4628_v53, %v4629_v6  ;;  %5939 = vmatprep.subr.bf16.mxu1 %v6372_v40  ;;  %v4630_v31 = vadd.f32 %v4551_v50, %v4222_v8  ;;  %v4736_v53 = vmax.f32 %v4704_v37, 0.0  ;;  %v6377_v50 = vld [vmem:[%s9053_s6 + $0x88] sm:$0xff]  }
 0x3d4   :  { %v4553_v33 = vpop.f32.mrf.mxu0 }
 0x3d5   :  { %v4631_v61 = vadd.f32 %v4553_v33, %v4223_v54  ;;  %v4705_v0 = vadd.f32 %v8759_v46, %v4666_v47 }
 0x3d6   :  { %5940 = vmatpush3.bf16.msra.mxu1 %v6372_v40  ;;  %v4557_v14 = vpop.f32.mrf.mxu0  ;;  %v9268_v40 = vld [vmem:[#allocation45_spill] sm:$0xff] }
 0x3d7   :  { %v4667_v26 = vmax.f32 %v4630_v31, %v4631_v61  ;;  %5941 = vmatprep.subr.bf16.mxu1 %v6373_v45  ;;  %v4632_v4 = vadd.f32 %v4557_v14, %v4224_v52  ;;  %v4231_v7 = vadd.f32 %v4165_v42, %v9268_v40  ;;  %v4737_v33 = vmax.f32 %v4705_v0, 0.0 }
 0x3d8   :  { %v4559_v30 = vpop.f32.mrf.mxu0 }
 0x3d9   :  { %v4633_v13 = vadd.f32 %v4559_v30, %v4225_v36  ;;  %v4706_v47 = vadd.f32 %v8759_v46, %v4667_v26 }
 0x3da   :  { %5942 = vmatpush3.bf16.msra.mxu1 %v6373_v45  ;;  %v4561_v56 = vpop.f32.mrf.mxu0 }
 0x3db   :  { %v4668_v9 = vmax.f32 %v4632_v4, %v4633_v13  ;;  %5943 = vmatprep.subr.bf16.mxu1 %v6374_v57  ;;  %v4634_v11 = vadd.f32 %v4561_v56, %v4226_v63  ;;  %v4738_v20 = vmax.f32 %v4706_v47, 0.0  ;;  %v6380_v4 = vld [vmem:[%s9053_s6 + $0xf0] sm:$0xff]   ;;  %v6382_v13 = vld [vmem:[%s9053_s6 + $0xe0] sm:$0xff]  }
 0x3dc   :  { %v4563_v12 = vpop.f32.mrf.mxu0 }
 0x3dd   :  { %v4707_v44 = vadd.f32 %v8759_v46, %v4668_v9  ;;  %v4635_v16 = vadd.f32 %v4563_v12, %v4227_v15 }
 0x3de   :  { %5944 = vmatpush3.bf16.msra.mxu1 %v6374_v57  ;;  %v4567_v51 = vpop.f32.mrf.mxu0  ;;  %v6379_v57 = vld [vmem:[%s9053_s6 + $0xf8] sm:$0xff]  }
 0x3df   :  { %v4739_v49 = vmax.f32 %v4707_v44, 0.0  ;;  %v4669_v25 = vmax.f32 %v4634_v11, %v4635_v16  ;;  %5945 = vmatprep.subr.bf16.mxu1 %v6375_v3  ;;  %v4636_v2 = vadd.f32 %v4567_v51, %v4228_v41 }
 0x3e0   :  { %v4569_v55 = vpop.f32.mrf.mxu0 }
 0x3e1   :  { %v4708_v27 = vadd.f32 %v8759_v46, %v4669_v25  ;;  %v4637_v62 = vadd.f32 %v4569_v55, %v4229_v18  ;;  %v4755_v22 = vmax.f32 %v4735_v23, %v4739_v49 }
 0x3e2   :  { %5946 = vmatpush3.bf16.msra.mxu1 %v6375_v3  ;;  %v4571_v17 = vpop.f32.mrf.mxu0 }
 0x3e3   :  { %v4740_v6 = vmax.f32 %v4708_v27, 0.0  ;;  %v4670_v28 = vmax.f32 %v4636_v2, %v4637_v62  ;;  %5947 = vmatprep.subr.bf16.mxu1 %v6376_v35  ;;  %v4638_v32 = vadd.f32 %v4571_v17, %v4230_v60 }
 0x3e4   :  { %v4573_v24 = vpop.f32.mrf.mxu0 }
 0x3e5   :  { %v4709_v8 = vadd.f32 %v8759_v46, %v4670_v28  ;;  %v4639_v54 = vadd.f32 %v4573_v24, %v4231_v7  ;;  %v4756_v45 = vmax.f32 %v4736_v53, %v4740_v6 }
 0x3e6   :  { %5948 = vmatpush3.bf16.msra.mxu1 %v6376_v35 }
 0x3e7   :  { %v4741_v31 = vmax.f32 %v4709_v8, 0.0  ;;  %v4671_v61 = vmax.f32 %v4638_v32, %v4639_v54  ;;  %5949 = vmatprep.subr.bf16.mxu1 %v6377_v50  ;;  %v4765_v14 = vpack.c.bf16 %v4756_v45, %v4755_v22 }
 0x3e9   :  { %v4757_v43 = vmax.f32 %v4737_v33, %v4741_v31  ;;  %v4710_v52 = vadd.f32 %v8759_v46, %v4671_v61  ;;  %v6381_v46 = vld [vmem:[%s9053_s6 + $0xe8] sm:$0xff]  }
 0x3ea   :  { %5950 = vmatpush3.bf16.msra.mxu1 %v6377_v50 }
 0x3eb   :  { %v4742_v36 = vmax.f32 %v4710_v52, 0.0  ;;  %5951 = vmatprep.subr.bf16.mxu1 %v6378_v10 }
 0x3ed   :  { %v4758_v26 = vmax.f32 %v4738_v20, %v4742_v36 }
 0x3ee   :  { %5952 = vmatpush3.bf16.msra.mxu1 %v6378_v10 }
 0x3ef   :  { %v4766_v30 = vpack.c.bf16 %v4758_v26, %v4757_v43  ;;  %5957 = vmatprep.subr.bf16.mxu1 %v6379_v57 }
 0x3f1   :  { %5954 = vmatmul.mubr.bf16.vlgmr.msra.gmra.mxu1 %v4764_v5  ;;  %v6385_v5 = vld [vmem:[%s9053_s6 + $0xc8] sm:$0xff]  }
 0x3f2   :  { %5958 = vmatpush3.bf16.msra.mxu1 %v6379_v57  ;;  %5973 = vmatprep.mubr.bf16.mxu1 %v4765_v14 }
 0x3f3   :  { %5959 = vmatprep.subr.bf16.mxu1 %v6380_v4 }
 0x3f6   :  { %5960 = vmatpush3.bf16.msra.mxu1 %v6380_v4 }
 0x3f7   :  { %5961 = vmatprep.subr.bf16.mxu1 %v6381_v46 }
 0x3fa   :  { %5962 = vmatpush3.bf16.msra.mxu1 %v6381_v46 }
 0x3fb   :  { %5963 = vmatprep.subr.bf16.mxu1 %v6382_v13 }
 0x3fe   :  { %5964 = vmatpush3.bf16.msra.mxu1 %v6382_v13 }
 0x3ff   :  { %5965 = vmatprep.subr.bf16.mxu1 %v6383_v21 }
 0x402   :  { %5966 = vmatpush3.bf16.msra.mxu1 %v6383_v21 }
 0x403   :  { %5967 = vmatprep.subr.bf16.mxu1 %v6384_v1 }
 0x406   :  { %5968 = vmatpush3.bf16.msra.mxu1 %v6384_v1 }
 0x407   :  { %5969 = vmatprep.subr.bf16.mxu1 %v6385_v5 }
 0x40a   :  { %5970 = vmatpush3.bf16.msra.mxu1 %v6385_v5 }
 0x40b   :  { %5971 = vmatprep.subr.bf16.mxu1 %v6386_v29 }
 0x40e   :  { %5972 = vmatpush3.bf16.msra.mxu1 %v6386_v29 }
 0x411   :  { %5974 = vmatmul.mubr.bf16.vlgmr.msra.gmra.mxu1 %v4766_v30 }
 0x471   :  { %v5915_v56 = vpop.f32.mrf.mxu1 }
 0x473   :  { %v4882_v34 = vpop.f32.mrf.mxu1 }
 0x475   :  { %v5916_v63 = vpop.f32.mrf.mxu1 }
 0x477   :  { %v4885_v39 = vpop.f32.mrf.mxu1 }
 0x491   :  { %v5935_v15 = vpop.f32.mrf.mxu1 }
 0x492   :  { %v4988_v16 = vadd.f32 %v5935_v15, %v5915_v56 }
 0x493   :  { %v4979_v59 = vpop.f32.mrf.mxu1 }
 0x494   :  { %v4980_v41 = vadd.f32 %v4979_v59, %v4882_v34 }
 0x495   :  { %v5936_v9 = vpop.f32.mrf.mxu1 }
 0x496   :  { %v4991_v51 = vadd.f32 %v5936_v9, %v5916_v63 }
 0x497   :  { %v4982_v3 = vpop.f32.mrf.mxu1 }
 0x498   :  { %v4983_v25 = vadd.f32 %v4982_v3, %v4885_v39 }
 0x4b1   :  { %v5955_v12 = vpop.f32.mrf.mxu1 }
 0x4b2   :  { %v5110_v19 = vadd.f32 %v5955_v12, %v4988_v16 }
 0x4b3   :  { %v5093_v44 = vpop.f32.mrf.mxu1 }
 0x4b4   :  { %v5108_v23 = vadd.f32 %v5093_v44, %v4980_v41 }
 0x4b5   :  { %v5956_v11 = vpop.f32.mrf.mxu1 }
 0x4b6   :  { %v5111_v35 = vadd.f32 %v5956_v11, %v4991_v51 }
 0x4b7   :  { %v5096_v58 = vpop.f32.mrf.mxu1 }
 0x4b8   :  { %v5109_v62 = vadd.f32 %v5096_v58, %v4983_v25 }
 0x4d1   :  { %v5975_v18 = vpop.f32.mrf.mxu1 }
 0x4d2   :  { %v5228_v37 = vadd.f32 %v5975_v18, %v5110_v19 }
 0x4d3   :  { %v5211_v49 = vpop.f32.mrf.mxu1 }
 0x4d4   :  { %v5239_v55 = vadd.f32 %v5856_v38, %v5228_v37  ;;  %v5226_v27 = vadd.f32 %v5211_v49, %v5108_v23 }
 0x4d5   :  { %v5976_v2 = vpop.f32.mrf.mxu1 }
 0x4d6   :  { %5243 = vst [vmem:[%s9056_s8 + $0x10] sm:$0xff] %v5239_v55  ;;  %v5237_v22 = vadd.f32 %v5856_v38, %v5226_v27  ;;  %v5229_v48 = vadd.f32 %v5976_v2, %v5111_v35 }
 0x4d7   :  { %v5214_v60 = vpop.f32.mrf.mxu1 }
 0x4d8   :  { %5241 = vst [vmem:[%s9056_s8] sm:$0xff] %v5237_v22  ;;  %v5240_v42 = vadd.f32 %v5856_v38, %v5229_v48  ;;  %v5227_v0 = vadd.f32 %v5214_v60, %v5109_v62 }
 0x4da   :  { %5244 = vst [vmem:[%s9056_s8 + $0x18] sm:$0xff] %v5240_v42  ;;  %v5238_v17 = vadd.f32 %v5856_v38, %v5227_v0 }
 0x4dc   :  { %5242 = vst [vmem:[%s9056_s8 + $0x8] sm:$0xff] %v5238_v17 }

</bundles_post_ra>
